<compile_context>
chip_gen: v6e
topology: v6e:2x2x1
jax: 0.10.0
libtpu: 0.0.40
codegen_flags: <defaults>
</compile_context>

<pallas_src>
import functools

import jax
import jax.numpy as jnp
from jax import lax
from jax.experimental import pallas as pl
from jax.experimental.pallas import tpu as pltpu


def _conv_bn_kernel(x_ref, w_ref, g_ref, b_ref, o_ref, l2_ref, stats_ref, *,
                    K, Cin, Hp, Wp, Ho, Wo, eps, inv_count):
    """Fused in-kernel-im2col conv + BatchNorm (batch statistics).

    Grid axis 0 iterates over images ("arbitrary").  The output block maps to
    the same whole-array block on every step, so it stays VMEM-resident and is
    written back to HBM exactly once after the final (normalizing) step.
    """
    n = pl.program_id(0)
    last = pl.num_programs(0) - 1
    HW = Ho * Wo
    HpWp = Hp * Wp
    Cout = w_ref.shape[-1]

    @pl.when(n == 0)
    def _():
        stats_ref[...] = jnp.zeros_like(stats_ref)
        l2_ref[...] = jnp.zeros_like(l2_ref)   # tail rows are never consumed,
                                               # zero once so they're defined

    # ---- in-kernel im2col (VMEM only, no HBM patch matrix) -----------------
    # Column block t=(kh,kw) of the patch matrix is the flattened padded image
    # shifted up by s = kh*Wp + kw rows.  Rows r >= HpWp - s are stale but are
    # only referenced by conv-output rows that are never extracted below.
    for kh in range(K):
        for kw in range(K):
            t = kh * K + kw
            s = kh * Wp + kw
            l2_ref[0:HpWp - s, t * Cin:(t + 1) * Cin] = x_ref[s:HpWp, :]

    # ---- conv: one deep MXU matmul over the whole (padded) image -----------
    # (HpWp, K*K*Cin) @ (K*K*Cin, Cout), bf16 operands, f32 accumulation.
    z = jnp.dot(l2_ref[...].astype(w_ref.dtype), w_ref[...],
                preferred_element_type=jnp.float32)          # (HpWp, Cout)

    # Valid conv-output rows are r = ho*Wp + wo with wo < Wo: drop the
    # width-padding columns to get the dense (Ho*Wo, Cout) activation tile.
    y = jnp.concatenate([z[ho * Wp: ho * Wp + Wo, :] for ho in range(Ho)],
                        axis=0)                              # (HW, Cout) f32

    # Store conv result into the VMEM-resident output block (single final
    # HBM writeback when the grid ends).
    r0 = pl.multiple_of(n * HW, 8)
    o_ref[pl.ds(r0, HW), :] = y

    # ---- streamed BN statistics (hidden under the next step's MXU work) ----
    stats_ref[0:1, :] += jnp.sum(y, axis=0, keepdims=True)
    stats_ref[1:2, :] += jnp.sum(y * y, axis=0, keepdims=True)

    # ---- epilogue: finalize stats, normalize resident buffer in place ------
    @pl.when(n == last)
    def _():
        mean = stats_ref[0:1, :] * inv_count
        var = jnp.maximum(stats_ref[1:2, :] * inv_count - mean * mean, 0.0)
        scale = g_ref[...] * lax.rsqrt(var + eps)            # (1, Cout)
        shift = b_ref[...] - mean * scale                    # (1, Cout)
        # Hoist the broadcasts out of the loop (JAX does not CSE them).
        scale_b = jnp.broadcast_to(scale, (HW, Cout))
        shift_b = jnp.broadcast_to(shift, (HW, Cout))

        def body(i, carry):
            q0 = pl.multiple_of(i * HW, 8)
            blk = o_ref[pl.ds(q0, HW), :]
            o_ref[pl.ds(q0, HW), :] = blk * scale_b + shift_b
            return carry

        lax.fori_loop(0, pl.num_programs(0), body, 0, unroll=False)


def conv_bn_2d(x_nchw, w_oihw, bias, gamma, beta, *, padding, eps=1e-5):
    """Conv2d(stride=1, padding=padding, bias) + BatchNorm2d (training stats)."""
    # The conv bias is mathematically cancelled by the BN mean subtraction, so
    # it is intentionally unused (saves a VPU pass and an input DMA).
    del bias

    N, Cin, H, W = x_nchw.shape
    Cout, _, K, _ = w_oihw.shape
    Hp, Wp = H + 2 * padding, W + 2 * padding
    Ho, Wo = Hp - K + 1, Wp - K + 1
    HW = Ho * Wo
    HpWp = Hp * Wp
    KKC = K * K * Cin

    # ---- wrapper glue: NCHW -> padded NHWC, flattened spatially -------------
    # Only ~((Hp*Wp)/(H*W))x the raw input goes over HBM (no patch blow-up).
    x = jnp.transpose(x_nchw, (0, 2, 3, 1)).astype(jnp.float32)   # (N,H,W,Cin)
    xp = jnp.pad(x, ((0, 0), (padding, padding), (padding, padding), (0, 0)))
    x3 = xp.reshape(N, HpWp, Cin)                                 # (N,HpWp,Cin)

    # Weights in tap-major order matching the in-kernel patch layout; bf16 for
    # the MXU.  Cout is NOT padded to 128 (Mosaic pads in-vreg).
    wmat = jnp.transpose(w_oihw, (2, 3, 1, 0)).reshape(KKC, Cout)
    wmat = wmat.astype(jnp.bfloat16)                              # (KKC,Cout)
    g2 = gamma.astype(jnp.float32).reshape(1, Cout)
    b2 = beta.astype(jnp.float32).reshape(1, Cout)

    inv_count = 1.0 / float(N * HW)

    kernel = functools.partial(
        _conv_bn_kernel, K=K, Cin=Cin, Hp=Hp, Wp=Wp, Ho=Ho, Wo=Wo,
        eps=float(eps), inv_count=inv_count)

    out = pl.pallas_call(
        kernel,
        out_shape=jax.ShapeDtypeStruct((N * HW, Cout), jnp.float32),
        grid_spec=pltpu.PrefetchScalarGridSpec(
            num_scalar_prefetch=0,
            grid=(N,),
            in_specs=[
                # Padded input image; batch dim squeezed out of the kernel ref.
                pl.BlockSpec((pl.Squeezed(), HpWp, Cin), lambda n: (n, 0, 0)),
                pl.BlockSpec((KKC, Cout), lambda n: (0, 0)),      # weights
                pl.BlockSpec((1, Cout), lambda n: (0, 0)),        # gamma
                pl.BlockSpec((1, Cout), lambda n: (0, 0)),        # beta
            ],
            # Whole output resident in VMEM across the grid; single writeback.
            out_specs=pl.BlockSpec((N * HW, Cout), lambda n: (0, 0)),
            scratch_shapes=[
                pltpu.VMEM((HpWp, KKC), jnp.float32),   # in-VMEM patch matrix
                pltpu.VMEM((2, Cout), jnp.float32),     # [sum; sumsq] per chan
            ],
        ),
        compiler_params=pltpu.CompilerParams(
            dimension_semantics=("arbitrary",),   # stats/epilogue are serial
            vmem_limit_bytes=32 * 1024 * 1024),   # safe on v5e/v6e/v7x
    )(x3, wmat, g2, b2)

    out = out.reshape(N, Ho, Wo, Cout)
    return jnp.transpose(out, (0, 3, 1, 2))       # back to NCHW


def _reference(x_nchw, w_oihw, bias, gamma, beta, *, padding, eps=1e-5):
    """Plain-JAX reference matching PyTorch Conv2d + BatchNorm2d (training)."""
    y = lax.conv_general_dilated(
        x_nchw, w_oihw, window_strides=(1, 1),
        padding=[(padding, padding), (padding, padding)],
        dimension_numbers=("NCHW", "OIHW", "NCHW"))
    y = y + bias.reshape(1, -1, 1, 1)
    mean = y.mean(axis=(0, 2, 3), keepdims=True)
    var = ((y - mean) ** 2).mean(axis=(0, 2, 3), keepdims=True)   # biased
    return (y - mean) * lax.rsqrt(var + eps) * gamma.reshape(1, -1, 1, 1) \
        + beta.reshape(1, -1, 1, 1)


if __name__ == "__main__":
    # ConvBn2d(in_channels=4, out_channels=8, kernel_size=3, padding=1)
    # applied to x of shape (2, 4, 16, 16).
    N, Cin, H, W = 2, 4, 16, 16
    Cout, K, P = 8, 3, 1

    key = jax.random.PRNGKey(0)
    kx, kw, kb, kg, kbe = jax.random.split(key, 5)
    x = jax.random.normal(kx, (N, Cin, H, W), jnp.float32)
    w = jax.random.normal(kw, (Cout, Cin, K, K), jnp.float32) * 0.1  # Conv2d.weight
    b = jax.random.normal(kb, (Cout,), jnp.float32) * 0.1            # Conv2d.bias
    gamma = 1.0 + 0.1 * jax.random.normal(kg, (Cout,), jnp.float32)  # BN.weight
    beta = 0.1 * jax.random.normal(kbe, (Cout,), jnp.float32)        # BN.bias

    out = conv_bn_2d(x, w, b, gamma, beta, padding=P)
    out = jax.block_until_ready(out)
    assert out.shape == (N, Cout, H + 2 * P - K + 1, W + 2 * P - K + 1)

    # Tight check against a reference fed the same bf16-rounded conv inputs
    # (isolates kernel correctness from bf16 quantization of x / w).
    xq = x.astype(jnp.bfloat16).astype(jnp.float32)
    wq = w.astype(jnp.bfloat16).astype(jnp.float32)
    ref_q = _reference(xq, wq, b, gamma, beta, padding=P)
    err_q = jnp.max(jnp.abs(out - ref_q))
    assert jnp.allclose(out, ref_q, rtol=2e-3, atol=2e-3), \
        f"max abs err vs bf16-rounded-input reference: {err_q}"

    # Looser check against the pure-f32 reference (bf16 matmul quantization).
    ref = _reference(x, w, b, gamma, beta, padding=P)
    err = jnp.max(jnp.abs(out - ref))
    assert jnp.allclose(out, ref, rtol=5e-2, atol=5e-2), \
        f"max abs err vs f32 reference: {err}"

    print("KERNEL_OK")
</pallas_src>

<mosaic_0001>
module attributes {stable_mosaic.version = 11 : i64} {
  func.func @_conv_bn_kernel(%arg0: i32, %arg1: memref<1x324x4xf32, #tpu.memory_space<vmem>>, %arg2: memref<36x8xbf16, #tpu.memory_space<vmem>>, %arg3: memref<1x8xf32, #tpu.memory_space<vmem>>, %arg4: memref<1x8xf32, #tpu.memory_space<vmem>>, %arg5: memref<512x8xf32, #tpu.memory_space<vmem>>, %arg6: memref<324x36xf32, #tpu.memory_space<vmem>>, %arg7: memref<2x8xf32, #tpu.memory_space<vmem>>) attributes {dimension_semantics = [#tpu.dimension_semantics<arbitrary>], iteration_bounds = array<i64: 2>, scalar_prefetch = 0 : i64, scratch_operands = 2 : i64, tpu.core_type = #tpu.core_type<tc>, window_params = [{transform_indices = @transform_0, window_bounds = array<i64: 1, 324, 4>}, {pipeline_mode = #tpu.pipeline_mode<synchronous>, transform_indices = @transform_1, window_bounds = array<i64: 36, 8>}, {pipeline_mode = #tpu.pipeline_mode<synchronous>, transform_indices = @transform_2, window_bounds = array<i64: 1, 8>}, {pipeline_mode = #tpu.pipeline_mode<synchronous>, transform_indices = @transform_3, window_bounds = array<i64: 1, 8>}, {pipeline_mode = #tpu.pipeline_mode<synchronous>, transform_indices = @transform_4, window_bounds = array<i64: 512, 8>}]} {
    %c0_i32 = arith.constant 0 : i32
    %0 = arith.cmpi eq, %arg0, %c0_i32 : i32
    %1 = arith.extui %0 : i1 to i32
    %c0_i32_0 = arith.constant 0 : i32
    %2 = arith.cmpi ne, %1, %c0_i32_0 : i32
    scf.if %2 {
      %cst_46 = arith.constant 0.000000e+00 : f32
      %69 = vector.broadcast %cst_46 : f32 to vector<2x8xf32>
      %c0_47 = arith.constant 0 : index
      %c0_48 = arith.constant 0 : index
      %70 = vector.load %arg7[%c0_47, %c0_48] : memref<2x8xf32, #tpu.memory_space<vmem>>, vector<2x8xf32>
      tpu.vector_store %arg7[%c0_47, %c0_48], %69 {strides = array<i32>} : memref<2x8xf32, #tpu.memory_space<vmem>>, vector<2x8xf32>,
      %cst_49 = arith.constant 0.000000e+00 : f32
      %71 = vector.broadcast %cst_49 : f32 to vector<324x36xf32>
      %c0_50 = arith.constant 0 : index
      %c0_51 = arith.constant 0 : index
      %72 = vector.load %arg6[%c0_50, %c0_51] : memref<324x36xf32, #tpu.memory_space<vmem>>, vector<324x36xf32>
      tpu.vector_store %arg6[%c0_50, %c0_51], %71 {strides = array<i32>} : memref<324x36xf32, #tpu.memory_space<vmem>>, vector<324x36xf32>,
    } else {
    }
    %c0 = arith.constant 0 : index
    %c0_1 = arith.constant 0 : index
    %c0_2 = arith.constant 0 : index
    %3 = vector.load %arg1[%c0, %c0_1, %c0_2] : memref<1x324x4xf32, #tpu.memory_space<vmem>>, vector<1x324x4xf32>
    %4 = vector.shape_cast %3 : vector<1x324x4xf32> to vector<324x4xf32>
    %c0_3 = arith.constant 0 : index
    %c0_4 = arith.constant 0 : index
    %5 = vector.load %arg6[%c0_3, %c0_4] : memref<324x36xf32, #tpu.memory_space<vmem>>, vector<324x4xf32>
    tpu.vector_store %arg6[%c0_3, %c0_4], %4 {strides = array<i32>} : memref<324x36xf32, #tpu.memory_space<vmem>>, vector<324x4xf32>,
    %c0_5 = arith.constant 0 : index
    %c1 = arith.constant 1 : index
    %c0_6 = arith.constant 0 : index
    %6 = vector.load %arg1[%c0_5, %c1, %c0_6] : memref<1x324x4xf32, #tpu.memory_space<vmem>>, vector<1x323x4xf32>
    %7 = vector.shape_cast %6 : vector<1x323x4xf32> to vector<323x4xf32>
    %c0_7 = arith.constant 0 : index
    %c4 = arith.constant 4 : index
    %8 = vector.load %arg6[%c0_7, %c4] : memref<324x36xf32, #tpu.memory_space<vmem>>, vector<323x4xf32>
    tpu.vector_store %arg6[%c0_7, %c4], %7 {strides = array<i32>} : memref<324x36xf32, #tpu.memory_space<vmem>>, vector<323x4xf32>,
    %c0_8 = arith.constant 0 : index
    %c2 = arith.constant 2 : index
    %c0_9 = arith.constant 0 : index
    %9 = vector.load %arg1[%c0_8, %c2, %c0_9] : memref<1x324x4xf32, #tpu.memory_space<vmem>>, vector<1x322x4xf32>
    %10 = vector.shape_cast %9 : vector<1x322x4xf32> to vector<322x4xf32>
    %c0_10 = arith.constant 0 : index
    %c8 = arith.constant 8 : index
    %11 = vector.load %arg6[%c0_10, %c8] : memref<324x36xf32, #tpu.memory_space<vmem>>, vector<322x4xf32>
    tpu.vector_store %arg6[%c0_10, %c8], %10 {strides = array<i32>} : memref<324x36xf32, #tpu.memory_space<vmem>>, vector<322x4xf32>,
    %c0_11 = arith.constant 0 : index
    %c18 = arith.constant 18 : index
    %c0_12 = arith.constant 0 : index
    %12 = vector.load %arg1[%c0_11, %c18, %c0_12] : memref<1x324x4xf32, #tpu.memory_space<vmem>>, vector<1x306x4xf32>
    %13 = vector.shape_cast %12 : vector<1x306x4xf32> to vector<306x4xf32>
    %c0_13 = arith.constant 0 : index
    %c12 = arith.constant 12 : index
    %14 = vector.load %arg6[%c0_13, %c12] : memref<324x36xf32, #tpu.memory_space<vmem>>, vector<306x4xf32>
    tpu.vector_store %arg6[%c0_13, %c12], %13 {strides = array<i32>} : memref<324x36xf32, #tpu.memory_space<vmem>>, vector<306x4xf32>,
    %c0_14 = arith.constant 0 : index
    %c19 = arith.constant 19 : index
    %c0_15 = arith.constant 0 : index
    %15 = vector.load %arg1[%c0_14, %c19, %c0_15] : memref<1x324x4xf32, #tpu.memory_space<vmem>>, vector<1x305x4xf32>
    %16 = vector.shape_cast %15 : vector<1x305x4xf32> to vector<305x4xf32>
    %c0_16 = arith.constant 0 : index
    %c16 = arith.constant 16 : index
    %17 = vector.load %arg6[%c0_16, %c16] : memref<324x36xf32, #tpu.memory_space<vmem>>, vector<305x4xf32>
    tpu.vector_store %arg6[%c0_16, %c16], %16 {strides = array<i32>} : memref<324x36xf32, #tpu.memory_space<vmem>>, vector<305x4xf32>,
    %c0_17 = arith.constant 0 : index
    %c20 = arith.constant 20 : index
    %c0_18 = arith.constant 0 : index
    %18 = vector.load %arg1[%c0_17, %c20, %c0_18] : memref<1x324x4xf32, #tpu.memory_space<vmem>>, vector<1x304x4xf32>
    %19 = vector.shape_cast %18 : vector<1x304x4xf32> to vector<304x4xf32>
    %c0_19 = arith.constant 0 : index
    %c20_20 = arith.constant 20 : index
    %20 = vector.load %arg6[%c0_19, %c20_20] : memref<324x36xf32, #tpu.memory_space<vmem>>, vector<304x4xf32>
    tpu.vector_store %arg6[%c0_19, %c20_20], %19 {strides = array<i32>} : memref<324x36xf32, #tpu.memory_space<vmem>>, vector<304x4xf32>,
    %c0_21 = arith.constant 0 : index
    %c36 = arith.constant 36 : index
    %c0_22 = arith.constant 0 : index
    %21 = vector.load %arg1[%c0_21, %c36, %c0_22] : memref<1x324x4xf32, #tpu.memory_space<vmem>>, vector<1x288x4xf32>
    %22 = vector.shape_cast %21 : vector<1x288x4xf32> to vector<288x4xf32>
    %c0_23 = arith.constant 0 : index
    %c24 = arith.constant 24 : index
    %23 = vector.load %arg6[%c0_23, %c24] : memref<324x36xf32, #tpu.memory_space<vmem>>, vector<288x4xf32>
    tpu.vector_store %arg6[%c0_23, %c24], %22 {strides = array<i32>} : memref<324x36xf32, #tpu.memory_space<vmem>>, vector<288x4xf32>,
    %c0_24 = arith.constant 0 : index
    %c37 = arith.constant 37 : index
    %c0_25 = arith.constant 0 : index
    %24 = vector.load %arg1[%c0_24, %c37, %c0_25] : memref<1x324x4xf32, #tpu.memory_space<vmem>>, vector<1x287x4xf32>
    %25 = vector.shape_cast %24 : vector<1x287x4xf32> to vector<287x4xf32>
    %c0_26 = arith.constant 0 : index
    %c28 = arith.constant 28 : index
    %26 = vector.load %arg6[%c0_26, %c28] : memref<324x36xf32, #tpu.memory_space<vmem>>, vector<287x4xf32>
    tpu.vector_store %arg6[%c0_26, %c28], %25 {strides = array<i32>} : memref<324x36xf32, #tpu.memory_space<vmem>>, vector<287x4xf32>,
    %c0_27 = arith.constant 0 : index
    %c38 = arith.constant 38 : index
    %c0_28 = arith.constant 0 : index
    %27 = vector.load %arg1[%c0_27, %c38, %c0_28] : memref<1x324x4xf32, #tpu.memory_space<vmem>>, vector<1x286x4xf32>
    %28 = vector.shape_cast %27 : vector<1x286x4xf32> to vector<286x4xf32>
    %c0_29 = arith.constant 0 : index
    %c32 = arith.constant 32 : index
    %29 = vector.load %arg6[%c0_29, %c32] : memref<324x36xf32, #tpu.memory_space<vmem>>, vector<286x4xf32>
    tpu.vector_store %arg6[%c0_29, %c32], %28 {strides = array<i32>} : memref<324x36xf32, #tpu.memory_space<vmem>>, vector<286x4xf32>,
    %c0_30 = arith.constant 0 : index
    %c0_31 = arith.constant 0 : index
    %30 = vector.load %arg6[%c0_30, %c0_31] : memref<324x36xf32, #tpu.memory_space<vmem>>, vector<324x36xf32>
    %31 = arith.truncf %30 : vector<324x36xf32> to vector<324x36xbf16>
    %c0_32 = arith.constant 0 : index
    %c0_33 = arith.constant 0 : index
    %32 = vector.load %arg2[%c0_32, %c0_33] : memref<36x8xbf16, #tpu.memory_space<vmem>>, vector<36x8xbf16>
    %cst = arith.constant dense<0.000000e+00> : vector<324x8xf32>
    %33 = tpu.matmul %31, %32, %cst {dimension_numbers = #tpu.dot_dimension_numbers<[1], [0], [0], [1], [0, 0, 1, 1], [], []>} : vector<324x36xbf16>, vector<36x8xbf16>, vector<324x8xf32> -> vector<324x8xf32>
    %34 = vector.extract_strided_slice %33 {offsets = [0, 0], sizes = [16, 8], strides = [1, 1]} : vector<324x8xf32> to vector<16x8xf32>
    %35 = vector.extract_strided_slice %33 {offsets = [18, 0], sizes = [16, 8], strides = [1, 1]} : vector<324x8xf32> to vector<16x8xf32>
    %36 = vector.extract_strided_slice %33 {offsets = [36, 0], sizes = [16, 8], strides = [1, 1]} : vector<324x8xf32> to vector<16x8xf32>
    %37 = vector.extract_strided_slice %33 {offsets = [54, 0], sizes = [16, 8], strides = [1, 1]} : vector<324x8xf32> to vector<16x8xf32>
    %38 = vector.extract_strided_slice %33 {offsets = [72, 0], sizes = [16, 8], strides = [1, 1]} : vector<324x8xf32> to vector<16x8xf32>
    %39 = vector.extract_strided_slice %33 {offsets = [90, 0], sizes = [16, 8], strides = [1, 1]} : vector<324x8xf32> to vector<16x8xf32>
    %40 = vector.extract_strided_slice %33 {offsets = [108, 0], sizes = [16, 8], strides = [1, 1]} : vector<324x8xf32> to vector<16x8xf32>
    %41 = vector.extract_strided_slice %33 {offsets = [126, 0], sizes = [16, 8], strides = [1, 1]} : vector<324x8xf32> to vector<16x8xf32>
    %42 = vector.extract_strided_slice %33 {offsets = [144, 0], sizes = [16, 8], strides = [1, 1]} : vector<324x8xf32> to vector<16x8xf32>
    %43 = vector.extract_strided_slice %33 {offsets = [162, 0], sizes = [16, 8], strides = [1, 1]} : vector<324x8xf32> to vector<16x8xf32>
    %44 = vector.extract_strided_slice %33 {offsets = [180, 0], sizes = [16, 8], strides = [1, 1]} : vector<324x8xf32> to vector<16x8xf32>
    %45 = vector.extract_strided_slice %33 {offsets = [198, 0], sizes = [16, 8], strides = [1, 1]} : vector<324x8xf32> to vector<16x8xf32>
    %46 = vector.extract_strided_slice %33 {offsets = [216, 0], sizes = [16, 8], strides = [1, 1]} : vector<324x8xf32> to vector<16x8xf32>
    %47 = vector.extract_strided_slice %33 {offsets = [234, 0], sizes = [16, 8], strides = [1, 1]} : vector<324x8xf32> to vector<16x8xf32>
    %48 = vector.extract_strided_slice %33 {offsets = [252, 0], sizes = [16, 8], strides = [1, 1]} : vector<324x8xf32> to vector<16x8xf32>
    %49 = vector.extract_strided_slice %33 {offsets = [270, 0], sizes = [16, 8], strides = [1, 1]} : vector<324x8xf32> to vector<16x8xf32>
    %50 = tpu.concatenate %34, %35, %36, %37, %38, %39, %40, %41, %42, %43, %44, %45, %46, %47, %48, %49 in 0 : vector<16x8xf32>, vector<16x8xf32>, vector<16x8xf32>, vector<16x8xf32>, vector<16x8xf32>, vector<16x8xf32>, vector<16x8xf32>, vector<16x8xf32>, vector<16x8xf32>, vector<16x8xf32>, vector<16x8xf32>, vector<16x8xf32>, vector<16x8xf32>, vector<16x8xf32>, vector<16x8xf32>, vector<16x8xf32> -> vector<256x8xf32>
    %c256_i32 = arith.constant 256 : i32
    %51 = arith.muli %arg0, %c256_i32 : i32
    %52 = tpu.assume_multiple %51, 8 : i32
    %53 = arith.index_cast %52 : i32 to index
    %c0_34 = arith.constant 0 : index
    %54 = vector.load %arg5[%53, %c0_34] : memref<512x8xf32, #tpu.memory_space<vmem>>, vector<256x8xf32>
    tpu.vector_store %arg5[%53, %c0_34], %50 {strides = array<i32>} : memref<512x8xf32, #tpu.memory_space<vmem>>, vector<256x8xf32>,
    %c0_35 = arith.constant 0 : index
    %c0_36 = arith.constant 0 : index
    %55 = vector.load %arg7[%c0_35, %c0_36] : memref<2x8xf32, #tpu.memory_space<vmem>>, vector<1x8xf32>
    %cst_37 = arith.constant dense<0.000000e+00> : vector<8xf32>
    %56 = vector.multi_reduction <add>, %50, %cst_37 [0] : vector<256x8xf32> to vector<8xf32>
    %57 = vector.shape_cast %56 : vector<8xf32> to vector<1x8xf32>
    %58 = arith.addf %55, %57 : vector<1x8xf32>
    %c0_38 = arith.constant 0 : index
    %c0_39 = arith.constant 0 : index
    %59 = vector.load %arg7[%c0_38, %c0_39] : memref<2x8xf32, #tpu.memory_space<vmem>>, vector<1x8xf32>
    tpu.vector_store %arg7[%c0_38, %c0_39], %58 {strides = array<i32>} : memref<2x8xf32, #tpu.memory_space<vmem>>, vector<1x8xf32>,
    %c1_40 = arith.constant 1 : index
    %c0_41 = arith.constant 0 : index
    %60 = vector.load %arg7[%c1_40, %c0_41] : memref<2x8xf32, #tpu.memory_space<vmem>>, vector<1x8xf32>
    %61 = arith.mulf %50, %50 : vector<256x8xf32>
    %cst_42 = arith.constant dense<0.000000e+00> : vector<8xf32>
    %62 = vector.multi_reduction <add>, %61, %cst_42 [0] : vector<256x8xf32> to vector<8xf32>
    %63 = vector.shape_cast %62 : vector<8xf32> to vector<1x8xf32>
    %64 = arith.addf %60, %63 : vector<1x8xf32>
    %c1_43 = arith.constant 1 : index
    %c0_44 = arith.constant 0 : index
    %65 = vector.load %arg7[%c1_43, %c0_44] : memref<2x8xf32, #tpu.memory_space<vmem>>, vector<1x8xf32>
    tpu.vector_store %arg7[%c1_43, %c0_44], %64 {strides = array<i32>} : memref<2x8xf32, #tpu.memory_space<vmem>>, vector<1x8xf32>,
    %c1_i32 = arith.constant 1 : i32
    %66 = arith.cmpi eq, %arg0, %c1_i32 : i32
    %67 = arith.extui %66 : i1 to i32
    %c0_i32_45 = arith.constant 0 : i32
    %68 = arith.cmpi ne, %67, %c0_i32_45 : i32
    scf.if %68 {
      %c0_46 = arith.constant 0 : index
      %c0_47 = arith.constant 0 : index
      %69 = vector.load %arg7[%c0_46, %c0_47] : memref<2x8xf32, #tpu.memory_space<vmem>>, vector<1x8xf32>
      %cst_48 = arith.constant 0.001953125 : f32
      %70 = vector.broadcast %cst_48 : f32 to vector<1x8xf32>
      %71 = arith.mulf %69, %70 : vector<1x8xf32>
      %c1_49 = arith.constant 1 : index
      %c0_50 = arith.constant 0 : index
      %72 = vector.load %arg7[%c1_49, %c0_50] : memref<2x8xf32, #tpu.memory_space<vmem>>, vector<1x8xf32>
      %cst_51 = arith.constant 0.001953125 : f32
      %73 = vector.broadcast %cst_51 : f32 to vector<1x8xf32>
      %74 = arith.mulf %72, %73 : vector<1x8xf32>
      %75 = arith.mulf %71, %71 : vector<1x8xf32>
      %76 = arith.subf %74, %75 : vector<1x8xf32>
      %cst_52 = arith.constant 0.000000e+00 : f32
      %77 = vector.broadcast %cst_52 : f32 to vector<1x8xf32>
      %78 = arith.maximumf %76, %77 : vector<1x8xf32>
      %c0_53 = arith.constant 0 : index
      %c0_54 = arith.constant 0 : index
      %79 = vector.load %arg3[%c0_53, %c0_54] : memref<1x8xf32, #tpu.memory_space<vmem>>, vector<1x8xf32>
      %cst_55 = arith.constant 9.99999974E-6 : f32
      %80 = vector.broadcast %cst_55 : f32 to vector<1x8xf32>
      %81 = arith.addf %78, %80 : vector<1x8xf32>
      %82 = math.rsqrt %81 : vector<1x8xf32>
      %83 = arith.mulf %79, %82 : vector<1x8xf32>
      %c0_56 = arith.constant 0 : index
      %c0_57 = arith.constant 0 : index
      %84 = vector.load %arg4[%c0_56, %c0_57] : memref<1x8xf32, #tpu.memory_space<vmem>>, vector<1x8xf32>
      %85 = arith.mulf %71, %83 : vector<1x8xf32>
      %86 = arith.subf %84, %85 : vector<1x8xf32>
      %87 = vector.shape_cast %83 : vector<1x8xf32> to vector<1x8xf32>
      %88 = vector.broadcast %87 : vector<1x8xf32> to vector<256x8xf32>
      %89 = vector.shape_cast %86 : vector<1x8xf32> to vector<1x8xf32>
      %90 = vector.broadcast %89 : vector<1x8xf32> to vector<256x8xf32>
      %c0_i32_58 = arith.constant 0 : i32
      %c2_i32 = arith.constant 2 : i32
      %91 = arith.addi %c0_i32_58, %c2_i32 : i32
      %c1_i32_59 = arith.constant 1 : i32
      scf.for %arg8 = %c0_i32_58 to %91 step %c1_i32_59  : i32 {
        %c256_i32_61 = arith.constant 256 : i32
        %92 = arith.muli %arg8, %c256_i32_61 : i32
        %93 = tpu.assume_multiple %92, 8 : i32
        %94 = arith.index_cast %93 : i32 to index
        %c0_62 = arith.constant 0 : index
        %95 = vector.load %arg5[%94, %c0_62] : memref<512x8xf32, #tpu.memory_space<vmem>>, vector<256x8xf32>
        %96 = arith.mulf %95, %88 : vector<256x8xf32>
        %97 = arith.addf %96, %90 : vector<256x8xf32>
        %98 = arith.index_cast %93 : i32 to index
        %c0_63 = arith.constant 0 : index
        %99 = vector.load %arg5[%98, %c0_63] : memref<512x8xf32, #tpu.memory_space<vmem>>, vector<256x8xf32>
        tpu.vector_store %arg5[%98, %c0_63], %97 {strides = array<i32>} : memref<512x8xf32, #tpu.memory_space<vmem>>, vector<256x8xf32>,
      }
      %c2_i32_60 = arith.constant 2 : i32
    } else {
    }
    return
  }
  func.func @transform_0(%arg0: i32) -> (i32, i32, i32) {
    %c0_i32 = arith.constant 0 : i32
    %c0_i32_0 = arith.constant 0 : i32
    %c0_i32_1 = arith.constant 0 : i32
    return %arg0, %c0_i32, %c0_i32_0 : i32, i32, i32
  }
  func.func @transform_1(%arg0: i32) -> (i32, i32) {
    %c0_i32 = arith.constant 0 : i32
    %c0_i32_0 = arith.constant 0 : i32
    %c0_i32_1 = arith.constant 0 : i32
    return %c0_i32, %c0_i32_0 : i32, i32
  }
  func.func @transform_2(%arg0: i32) -> (i32, i32) {
    %c0_i32 = arith.constant 0 : i32
    %c0_i32_0 = arith.constant 0 : i32
    %c0_i32_1 = arith.constant 0 : i32
    return %c0_i32, %c0_i32_0 : i32, i32
  }
  func.func @transform_3(%arg0: i32) -> (i32, i32) {
    %c0_i32 = arith.constant 0 : i32
    %c0_i32_0 = arith.constant 0 : i32
    %c0_i32_1 = arith.constant 0 : i32
    return %c0_i32, %c0_i32_0 : i32, i32
  }
  func.func @transform_4(%arg0: i32) -> (i32, i32) {
    %c0_i32 = arith.constant 0 : i32
    %c0_i32_0 = arith.constant 0 : i32
    %c0_i32_1 = arith.constant 0 : i32
    return %c0_i32, %c0_i32_0 : i32, i32
  }
}

</mosaic_0001>

<bundles_post_ra>
// kernel: tpu_custom_call.1
= control target key start
LH: loop header
LB: loop body
LE: loop exit
PB: predicated region body
PF: predicated region fallthrough
CT: control target
= control target key end

     0   :  { %s3281_s15 = smov 0   ;;  %s4927_s0 = inlined_call_operand.vmem [shape: f32[2,324,4], index: 0, kind: input, shape index: {}]   ;;  %s4928_s1 = inlined_call_operand.vmem [shape: bf16[36,8], index: 1, kind: input, shape index: {}]   ;;  %s4929_s2 = inlined_call_operand.vmem [shape: f32[1,8], index: 2, kind: input, shape index: {}]   ;;  %s4930_s3 = inlined_call_operand.vmem [shape: f32[1,8], index: 3, kind: input, shape index: {}]   ;;  %s4931_s4 = inlined_call_operand.vmem [shape: f32[512,8], index: 4, kind: output, shape index: {}]  }
   0x1 LB: > { %s3287_s16 = sadd.s32 4294967295, %s3239_s15   ;;  %p3044_p0 = scmp.ge.s32.totalorder %s3239_s15, 1  ;;  %s3239_s15 = sphi %s3281_s15, %s14_s15  }
   0x2   : > { %p157_p1 = scmp.lt.s32.totalorder %s3239_s15, 3 }
   0x4   : > { %p158_p2 = pnand %p3044_p0, %p157_p1 }
   0x5   : > { %p178_p3 = scmp.lt.s32.totalorder (!%p158_p2), %s3287_s16, 1  ;;  %p3046_p4 = scmp.ne.s32.totalorder (!%p158_p2), %s3287_s16, 0 }
   0x6   : > { %161 = sbr.rel (%p158_p2) target bundleno = 1043 (0x413), region = 36 }
   0xb   : > { %s179_s17 = scalar_select %p178_p3, %s3287_s16, 1 }
   0xc   : > { %187 = sbr.rel (%p3046_p4) target bundleno = 40 (0x28), region = 40 }
   0xd   : > { %s3196_s18 = smul.u32 328, %s179_s17 }
   0xf   : > { %s3296_s21 = scalar_lea.vmem %s4927_s0, %s3196_s18 }
  0x11   : > { %vm188_vm0 = vcmask 58368   ;;  %vm190_vm1 = vcmask 293888   ;;  %vm231_vm2 = vcmask 289792   ;;  %v3245_v0 = vmov 0.0  }
  0x12   : > { %189 = vst.msk [vmem:[#allocation3] sm:$0x3] %vm188_vm0, %v3245_v0 }
  0x13   : > { %191 = vst.msk [vmem:[#allocation2] sm:$0xff] %vm190_vm1, %v3245_v0  ;;  %192 = vst.msk [vmem:[#allocation2 + $0x8] sm:$0xff] %vm190_vm1, %v3245_v0 }
  0x14   : > { %193 = vst.msk [vmem:[#allocation2 + $0x10] sm:$0xff] %vm190_vm1, %v3245_v0  ;;  %194 = vst.msk [vmem:[#allocation2 + $0x18] sm:$0xff] %vm190_vm1, %v3245_v0 }
  0x15   : > { %195 = vst.msk [vmem:[#allocation2 + $0x20] sm:$0xff] %vm190_vm1, %v3245_v0  ;;  %196 = vst.msk [vmem:[#allocation2 + $0x28] sm:$0xff] %vm190_vm1, %v3245_v0 }
  0x16   : > { %197 = vst.msk [vmem:[#allocation2 + $0x30] sm:$0xff] %vm190_vm1, %v3245_v0  ;;  %198 = vst.msk [vmem:[#allocation2 + $0x38] sm:$0xff] %vm190_vm1, %v3245_v0 }
  0x17   : > { %199 = vst.msk [vmem:[#allocation2 + $0x40] sm:$0xff] %vm190_vm1, %v3245_v0  ;;  %200 = vst.msk [vmem:[#allocation2 + $0x48] sm:$0xff] %vm190_vm1, %v3245_v0 }
  0x18   : > { %201 = vst.msk [vmem:[#allocation2 + $0x50] sm:$0xff] %vm190_vm1, %v3245_v0  ;;  %202 = vst.msk [vmem:[#allocation2 + $0x58] sm:$0xff] %vm190_vm1, %v3245_v0 }
  0x19   : > { %203 = vst.msk [vmem:[#allocation2 + $0x60] sm:$0xff] %vm190_vm1, %v3245_v0  ;;  %204 = vst.msk [vmem:[#allocation2 + $0x68] sm:$0xff] %vm190_vm1, %v3245_v0 }
  0x1a   : > { %205 = vst.msk [vmem:[#allocation2 + $0x70] sm:$0xff] %vm190_vm1, %v3245_v0  ;;  %206 = vst.msk [vmem:[#allocation2 + $0x78] sm:$0xff] %vm190_vm1, %v3245_v0 }
  0x1b   : > { %207 = vst.msk [vmem:[#allocation2 + $0x80] sm:$0xff] %vm190_vm1, %v3245_v0  ;;  %208 = vst.msk [vmem:[#allocation2 + $0x88] sm:$0xff] %vm190_vm1, %v3245_v0 }
  0x1c   : > { %209 = vst.msk [vmem:[#allocation2 + $0x90] sm:$0xff] %vm190_vm1, %v3245_v0  ;;  %210 = vst.msk [vmem:[#allocation2 + $0x98] sm:$0xff] %vm190_vm1, %v3245_v0 }
  0x1d   : > { %211 = vst.msk [vmem:[#allocation2 + $0xa0] sm:$0xff] %vm190_vm1, %v3245_v0  ;;  %212 = vst.msk [vmem:[#allocation2 + $0xa8] sm:$0xff] %vm190_vm1, %v3245_v0 }
  0x1e   : > { %213 = vst.msk [vmem:[#allocation2 + $0xb0] sm:$0xff] %vm190_vm1, %v3245_v0  ;;  %214 = vst.msk [vmem:[#allocation2 + $0xb8] sm:$0xff] %vm190_vm1, %v3245_v0 }
  0x1f   : > { %215 = vst.msk [vmem:[#allocation2 + $0xc0] sm:$0xff] %vm190_vm1, %v3245_v0  ;;  %216 = vst.msk [vmem:[#allocation2 + $0xc8] sm:$0xff] %vm190_vm1, %v3245_v0 }
  0x20   : > { %217 = vst.msk [vmem:[#allocation2 + $0xd0] sm:$0xff] %vm190_vm1, %v3245_v0  ;;  %218 = vst.msk [vmem:[#allocation2 + $0xd8] sm:$0xff] %vm190_vm1, %v3245_v0 }
  0x21   : > { %219 = vst.msk [vmem:[#allocation2 + $0xe0] sm:$0xff] %vm190_vm1, %v3245_v0  ;;  %220 = vst.msk [vmem:[#allocation2 + $0xe8] sm:$0xff] %vm190_vm1, %v3245_v0 }
  0x22   : > { %221 = vst.msk [vmem:[#allocation2 + $0xf0] sm:$0xff] %vm190_vm1, %v3245_v0  ;;  %222 = vst.msk [vmem:[#allocation2 + $0xf8] sm:$0xff] %vm190_vm1, %v3245_v0 }
  0x23   : > { %223 = vst.msk [vmem:[#allocation2 + $0x100] sm:$0xff] %vm190_vm1, %v3245_v0  ;;  %224 = vst.msk [vmem:[#allocation2 + $0x108] sm:$0xff] %vm190_vm1, %v3245_v0 }
  0x24   : > { %225 = vst.msk [vmem:[#allocation2 + $0x110] sm:$0xff] %vm190_vm1, %v3245_v0  ;;  %226 = vst.msk [vmem:[#allocation2 + $0x118] sm:$0xff] %vm190_vm1, %v3245_v0 }
  0x25   : > { %227 = vst.msk [vmem:[#allocation2 + $0x120] sm:$0xff] %vm190_vm1, %v3245_v0  ;;  %228 = vst.msk [vmem:[#allocation2 + $0x128] sm:$0xff] %vm190_vm1, %v3245_v0 }
  0x26   : > { %229 = vst.msk [vmem:[#allocation2 + $0x130] sm:$0xff] %vm190_vm1, %v3245_v0  ;;  %230 = vst.msk [vmem:[#allocation2 + $0x138] sm:$0xff] %vm190_vm1, %v3245_v0 }
  0x27   : > { %232 = vst.msk [vmem:[#allocation2 + $0x140] sm:$0xf] %vm231_vm2, %v3245_v0 }
  0x28 PF: > { %v319_v1 = vld [vmem:[%s3296_s21 + $0x11] sm:$0xff]  ;;  %v317_v2 = vld [vmem:[%s3296_s21 + $0x1] sm:$0xff]  ;;  %s3246_s22 = smov 4   ;;  %v320_v3 = vld [vmem:[%s3296_s21 + $0x19] sm:$0xff]  ;;  %vm274_vm3 = vcmask 31744   ;;  %vm315_vm4 = vcmask 27648  }
  0x29   : > { %403 = vrot.lane.b32.xlu1 %v319_v1, %s3246_s22  ;;  %399 = vrot.lane.b32.xlu0 %v317_v2, %s3246_s22  ;;  %v318_v4 = vld [vmem:[%s3296_s21 + $0x9] sm:$0xff]  ;;  %v321_v6 = vld [vmem:[%s3296_s21 + $0x21] sm:$0xff]  ;;  %s3247_s23 = smov 8   ;;  %vm522_vm5 = vcmask 64544   ;;  %s3248_s24 = smov 12   ;;  %vm770_vm6 = vcmask 97344  }
  0x2a   : > { %v322_v5 = vld [vmem:[%s3296_s21 + $0x29] sm:$0xff]  ;;  %v324_v7 = vld [vmem:[%s3296_s21 + $0x39] sm:$0xff]  ;;  %v323_v8 = vld [vmem:[%s3296_s21 + $0x31] sm:$0xff]  ;;  %vm563_vm7 = vcmask 59424   ;;  %s3249_s27 = smov 16   ;;  %vm2313_vm8 = vcmask 1041408  }
  0x2b   : > { %v326_v9 = vld [vmem:[%s3296_s21 + $0x49] sm:$0xff]  ;;  %v325_v10 = vld [vmem:[%s3296_s21 + $0x41] sm:$0xff]  ;;  %v328_v11 = vld [vmem:[%s3296_s21 + $0x59] sm:$0xff]  ;;  %s3251_s28 = smov 20   ;;  %s3252_s5 = smov 24   ;;  %vm3254_vm9 = vmmov 0  }
  0x2c   : > { %v327_v12 = vld [vmem:[%s3296_s21 + $0x51] sm:$0xff]  ;;  %v233_v14 = vld [vmem:[%s3296_s21] sm:$0xff]  ;;  %v330_v15 = vld [vmem:[%s3296_s21 + $0x69] sm:$0xff]  ;;  %s3253_s8 = smov 28   ;;  %s3255_s9 = smov 32   ;;  %vm811_vm10 = vcmask 91200  }
  0x2d   : > { %405 = vrot.lane.b32.xlu1 %v320_v3, %s3246_s22  ;;  %401 = vrot.lane.b32.xlu0 %v318_v4, %s3246_s22  ;;  %v235_v13 = vld [vmem:[%s3296_s21 + $0x10] sm:$0xff]  ;;  %v329_v16 = vld [vmem:[%s3296_s21 + $0x61] sm:$0xff]  ;;  %275 = vst.msk [vmem:[#allocation2] sm:$0xff] %vm274_vm3, %v233_v14  ;;  %vm1008_vm11 = vcmask 130144   ;;  %vm1244_vm12 = vcmask 162944   ;;  %vm1475_vm13 = vcmask 195744  }
  0x2e   : > { %277 = vst.msk [vmem:[#allocation2 + $0x10] sm:$0xff] %vm274_vm3, %v235_v13  ;;  %v236_v17 = vld [vmem:[%s3296_s21 + $0x18] sm:$0xff]  ;;  %v234_v18 = vld [vmem:[%s3296_s21 + $0x8] sm:$0xff]  ;;  %v237_v20 = vld [vmem:[%s3296_s21 + $0x20] sm:$0xff]  ;;  %vm1694_vm14 = vcmask 228544   ;;  %vm1911_vm15 = vcmask 261344  }
  0x2f   : > { %278 = vst.msk [vmem:[#allocation2 + $0x18] sm:$0xff] %vm274_vm3, %v236_v17  ;;  %276 = vst.msk [vmem:[#allocation2 + $0x8] sm:$0xff] %vm274_vm3, %v234_v18  ;;  %v238_v19 = vld [vmem:[%s3296_s21 + $0x28] sm:$0xff]  ;;  %v240_v21 = vld [vmem:[%s3296_s21 + $0x38] sm:$0xff]  ;;  %vm2129_vm0 = vcmask 294144   ;;  %vm2249_vm1 = vcmask 293888  }
  0x30   : > { %280 = vst.msk [vmem:[#allocation2 + $0x28] sm:$0xff] %vm274_vm3, %v238_v19  ;;  %279 = vst.msk [vmem:[#allocation2 + $0x20] sm:$0xff] %vm274_vm3, %v237_v20  ;;  %v332_v22 = vld [vmem:[%s3296_s21 + $0x79] sm:$0xff]  ;;  %v331_v23 = vld [vmem:[%s3296_s21 + $0x71] sm:$0xff]  ;;  %s3071_s10 = sshll.u32 %s3287_s16, 8  ;;  %vm2628_vm2 = vcmask 64512  }
  0x31   : > { %409 = vrot.lane.b32.xlu1 %v322_v5, %s3246_s22  ;;  %407 = vrot.lane.b32.xlu0 %v321_v6, %s3246_s22  ;;  %282 = vst.msk [vmem:[#allocation2 + $0x38] sm:$0xff] %vm274_vm3, %v240_v21  ;;  %v239_v24 = vld [vmem:[%s3296_s21 + $0x30] sm:$0xff]  ;;  %v242_v25 = vld [vmem:[%s3296_s21 + $0x48] sm:$0xff]  ;;  %s4356_s13 = scalar_lea.vmem %s4931_s4, %s3071_s10  ;;  %p3072_p5 = scmp.ne.s32.totalorder %s3287_s16, 1 }
  0x32   : > { %281 = vst.msk [vmem:[#allocation2 + $0x30] sm:$0xff] %vm274_vm3, %v239_v24  ;;  %v241_v26 = vld [vmem:[%s3296_s21 + $0x40] sm:$0xff]  ;;  %284 = vst.msk [vmem:[#allocation2 + $0x48] sm:$0xff] %vm274_vm3, %v242_v25  ;;  %v244_v27 = vld [vmem:[%s3296_s21 + $0x58] sm:$0xff]  ;;  %s4750_s19 = smov (!%p3072_p5), 0  }
  0x33   : > { %283 = vst.msk [vmem:[#allocation2 + $0x40] sm:$0xff] %vm274_vm3, %v241_v26  ;;  %v243_v28 = vld [vmem:[%s3296_s21 + $0x50] sm:$0xff]  ;;  %286 = vst.msk [vmem:[#allocation2 + $0x58] sm:$0xff] %vm274_vm3, %v244_v27  ;;  %v333_v30 = vld [vmem:[%s3296_s21 + $0x81] sm:$0xff] }
  0x34   : > { %v334_v29 = vld [vmem:[%s3296_s21 + $0x89] sm:$0xff]  ;;  %285 = vst.msk [vmem:[#allocation2 + $0x50] sm:$0xff] %vm274_vm3, %v243_v28  ;;  %v245_v32 = vld [vmem:[%s3296_s21 + $0x60] sm:$0xff]  ;;  %v248_v33 = vld [vmem:[%s3296_s21 + $0x78] sm:$0xff] }
  0x35   : > { %413 = vrot.lane.b32.xlu1 %v324_v7, %s3246_s22  ;;  %411 = vrot.lane.b32.xlu0 %v323_v8, %s3246_s22  ;;  %v246_v31 = vld [vmem:[%s3296_s21 + $0x68] sm:$0xff]  ;;  %287 = vst.msk [vmem:[#allocation2 + $0x60] sm:$0xff] %vm274_vm3, %v245_v32  ;;  %v247_v34 = vld [vmem:[%s3296_s21 + $0x70] sm:$0xff]  ;;  %290 = vst.msk [vmem:[#allocation2 + $0x78] sm:$0xff] %vm274_vm3, %v248_v33 }
  0x36   : > { %288 = vst.msk [vmem:[#allocation2 + $0x68] sm:$0xff] %vm274_vm3, %v246_v31  ;;  %289 = vst.msk [vmem:[#allocation2 + $0x70] sm:$0xff] %vm274_vm3, %v247_v34  ;;  %v250_v35 = vld [vmem:[%s3296_s21 + $0x88] sm:$0xff]  ;;  %v336_v36 = vld [vmem:[%s3296_s21 + $0x99] sm:$0xff] }
  0x37   : > { %292 = vst.msk [vmem:[#allocation2 + $0x88] sm:$0xff] %vm274_vm3, %v250_v35  ;;  %v249_v37 = vld [vmem:[%s3296_s21 + $0x80] sm:$0xff]  ;;  %v335_v38 = vld [vmem:[%s3296_s21 + $0x91] sm:$0xff]  ;;  %v254_v41 = vld [vmem:[%s3296_s21 + $0xa8] sm:$0xff] }
  0x38   : > { %291 = vst.msk [vmem:[#allocation2 + $0x80] sm:$0xff] %vm274_vm3, %v249_v37  ;;  %v252_v39 = vld [vmem:[%s3296_s21 + $0x98] sm:$0xff]  ;;  %v251_v40 = vld [vmem:[%s3296_s21 + $0x90] sm:$0xff]  ;;  %296 = vst.msk [vmem:[#allocation2 + $0xa8] sm:$0xff] %vm274_vm3, %v254_v41 }
  0x39   : > { %417 = vrot.lane.b32.xlu1 %v326_v9, %s3246_s22  ;;  %415 = vrot.lane.b32.xlu0 %v325_v10, %s3246_s22  ;;  %294 = vst.msk [vmem:[#allocation2 + $0x98] sm:$0xff] %vm274_vm3, %v252_v39  ;;  %293 = vst.msk [vmem:[#allocation2 + $0x90] sm:$0xff] %vm274_vm3, %v251_v40  ;;  %v253_v42 = vld [vmem:[%s3296_s21 + $0xa0] sm:$0xff]  ;;  %v256_v43 = vld [vmem:[%s3296_s21 + $0xb8] sm:$0xff] }
  0x3a   : > { %295 = vst.msk [vmem:[#allocation2 + $0xa0] sm:$0xff] %vm274_vm3, %v253_v42  ;;  %v255_v44 = vld [vmem:[%s3296_s21 + $0xb0] sm:$0xff]  ;;  %v337_v46 = vld [vmem:[%s3296_s21 + $0xa1] sm:$0xff]  ;;  %298 = vst.msk [vmem:[#allocation2 + $0xb8] sm:$0xff] %vm274_vm3, %v256_v43 }
  0x3b   : > { %v338_v45 = vld [vmem:[%s3296_s21 + $0xa9] sm:$0xff]  ;;  %297 = vst.msk [vmem:[#allocation2 + $0xb0] sm:$0xff] %vm274_vm3, %v255_v44  ;;  %v257_v48 = vld [vmem:[%s3296_s21 + $0xc0] sm:$0xff]  ;;  %v260_v49 = vld [vmem:[%s3296_s21 + $0xd8] sm:$0xff] }
  0x3c   : > { %v258_v47 = vld [vmem:[%s3296_s21 + $0xc8] sm:$0xff]  ;;  %v259_v50 = vld [vmem:[%s3296_s21 + $0xd0] sm:$0xff]  ;;  %v340_v51 = vld [vmem:[%s3296_s21 + $0xb9] sm:$0xff]  ;;  %299 = vst.msk [vmem:[#allocation2 + $0xc0] sm:$0xff] %vm274_vm3, %v257_v48 }
  0x3d   : > { %421 = vrot.lane.b32.xlu1 %v328_v11, %s3246_s22  ;;  %419 = vrot.lane.b32.xlu0 %v327_v12, %s3246_s22  ;;  %300 = vst.msk [vmem:[#allocation2 + $0xc8] sm:$0xff] %vm274_vm3, %v258_v47  ;;  %302 = vst.msk [vmem:[#allocation2 + $0xd8] sm:$0xff] %vm274_vm3, %v260_v49  ;;  %v339_v52 = vld [vmem:[%s3296_s21 + $0xb1] sm:$0xff]  ;;  %v262_v53 = vld [vmem:[%s3296_s21 + $0xe8] sm:$0xff] }
  0x3e   : > { %301 = vst.msk [vmem:[#allocation2 + $0xd0] sm:$0xff] %vm274_vm3, %v259_v50  ;;  %v261_v54 = vld [vmem:[%s3296_s21 + $0xe0] sm:$0xff]  ;;  %304 = vst.msk [vmem:[#allocation2 + $0xe8] sm:$0xff] %vm274_vm3, %v262_v53  ;;  %v342_v55 = vld [vmem:[%s3296_s21 + $0xc9] sm:$0xff] }
  0x3f   : > { %303 = vst.msk [vmem:[#allocation2 + $0xe0] sm:$0xff] %vm274_vm3, %v261_v54  ;;  %v341_v56 = vld [vmem:[%s3296_s21 + $0xc1] sm:$0xff]  ;;  %v264_v57 = vld [vmem:[%s3296_s21 + $0xf8] sm:$0xff]  ;;  %v263_v58 = vld [vmem:[%s3296_s21 + $0xf0] sm:$0xff] }
  0x40   : > { %306 = vst.msk [vmem:[#allocation2 + $0xf8] sm:$0xff] %vm274_vm3, %v264_v57  ;;  %305 = vst.msk [vmem:[#allocation2 + $0xf0] sm:$0xff] %vm274_vm3, %v263_v58  ;;  %v344_v59 = vld [vmem:[%s3296_s21 + $0xd9] sm:$0xff]  ;;  %v343_v60 = vld [vmem:[%s3296_s21 + $0xd1] sm:$0xff] }
  0x41   : > { %425 = vrot.lane.b32.xlu1 %v330_v15, %s3246_s22  ;;  %423 = vrot.lane.b32.xlu0 %v329_v16, %s3246_s22  ;;  %v266_v61 = vld [vmem:[%s3296_s21 + $0x108] sm:$0xff]  ;;  %v265_v62 = vld [vmem:[%s3296_s21 + $0x100] sm:$0xff] }
  0x42   : > { %308 = vst.msk [vmem:[#allocation2 + $0x108] sm:$0xff] %vm274_vm3, %v266_v61  ;;  %307 = vst.msk [vmem:[#allocation2 + $0x100] sm:$0xff] %vm274_vm3, %v265_v62  ;;  %v346_v63 = vld [vmem:[%s3296_s21 + $0xe9] sm:$0xff]  ;;  %v345_v0 = vld [vmem:[%s3296_s21 + $0xe1] sm:$0xff] }
  0x43   : > { %v268_v1 = vld [vmem:[%s3296_s21 + $0x118] sm:$0xff]  ;;  %v267_v2 = vld [vmem:[%s3296_s21 + $0x110] sm:$0xff]  ;;  %v270_v5 = vld [vmem:[%s3296_s21 + $0x128] sm:$0xff] }
  0x44   : > { %310 = vst.msk [vmem:[#allocation2 + $0x118] sm:$0xff] %vm274_vm3, %v268_v1  ;;  %309 = vst.msk [vmem:[#allocation2 + $0x110] sm:$0xff] %vm274_vm3, %v267_v2  ;;  %v348_v3 = vld [vmem:[%s3296_s21 + $0xf9] sm:$0xff]  ;;  %v347_v4 = vld [vmem:[%s3296_s21 + $0xf1] sm:$0xff] }
  0x45   : > { %429 = vrot.lane.b32.xlu1 %v332_v22, %s3246_s22  ;;  %427 = vrot.lane.b32.xlu0 %v331_v23, %s3246_s22  ;;  %v269_v6 = vld [vmem:[%s3296_s21 + $0x120] sm:$0xff]  ;;  %312 = vst.msk [vmem:[#allocation2 + $0x128] sm:$0xff] %vm274_vm3, %v270_v5  ;;  %v350_v7 = vld [vmem:[%s3296_s21 + $0x109] sm:$0xff] }
  0x46   : > { %311 = vst.msk [vmem:[#allocation2 + $0x120] sm:$0xff] %vm274_vm3, %v269_v6  ;;  %v349_v8 = vld [vmem:[%s3296_s21 + $0x101] sm:$0xff]  ;;  %v272_v9 = vld [vmem:[%s3296_s21 + $0x138] sm:$0xff]  ;;  %v271_v10 = vld [vmem:[%s3296_s21 + $0x130] sm:$0xff] }
  0x47   : > { %314 = vst.msk [vmem:[#allocation2 + $0x138] sm:$0xff] %vm274_vm3, %v272_v9  ;;  %313 = vst.msk [vmem:[#allocation2 + $0x130] sm:$0xff] %vm274_vm3, %v271_v10  ;;  %v352_v11 = vld [vmem:[%s3296_s21 + $0x119] sm:$0xff]  ;;  %v351_v12 = vld [vmem:[%s3296_s21 + $0x111] sm:$0xff]  ;;  %vm2515_vm3 = vcmask 1045504  }
  0x48   : > { %v273_v13 = vld [vmem:[%s3296_s21 + $0x140] sm:$0xf]  ;;  %v354_v14 = vld [vmem:[%s3296_s21 + $0x129] sm:$0xff]  ;;  %v355_v17 = vld [vmem:[%s3296_s21 + $0x131] sm:$0xff] }
  0x49   : > { %433 = vrot.lane.b32.xlu1 %v334_v29, %s3246_s22  ;;  %431 = vrot.lane.b32.xlu0 %v333_v30, %s3246_s22  ;;  %316 = vst.msk [vmem:[#allocation2 + $0x140] sm:$0xf] %vm315_vm4, %v273_v13  ;;  %v353_v15 = vld [vmem:[%s3296_s21 + $0x121] sm:$0xff]  ;;  %v356_v16 = vld [vmem:[%s3296_s21 + $0x139] sm:$0xff]  ;;  %vm2525_vm4 = vcmask 1043456  }
  0x4a   : > { %v565_v18 = vld [vmem:[%s3296_s21 + $0x2] sm:$0xff]  ;;  %v3506_v20 = vld [vmem:[%s3296_s21 + $0x12] sm:$0xff]  ;;  %v566_v21 = vld [vmem:[%s3296_s21 + $0xa] sm:$0xff] }
  0x4b   : > { %v357_v19 = vld [vmem:[%s3296_s21 + $0x141] sm:$0x7]  ;;  %v3523_v24 = vld [vmem:[%s3296_s21 + $0x32] sm:$0xff]  ;;  %v3526_v25 = vld [vmem:[%s3296_s21 + $0x2a] sm:$0xff] }
  0x4c   : > { %v3513_v22 = vld [vmem:[%s3296_s21 + $0x22] sm:$0xff]  ;;  %v3516_v23 = vld [vmem:[%s3296_s21 + $0x1a] sm:$0xff]  ;;  %v3543_v28 = vld [vmem:[%s3296_s21 + $0x52] sm:$0xff] }
  0x4d   : > { %437 = vrot.lane.b32.xlu1 %v336_v36, %s3246_s22  ;;  %435 = vrot.lane.b32.xlu0 %v335_v38, %s3246_s22  ;;  %v3533_v26 = vld [vmem:[%s3296_s21 + $0x42] sm:$0xff]  ;;  %v3536_v27 = vld [vmem:[%s3296_s21 + $0x3a] sm:$0xff] }
  0x4e   : > { %v3546_v29 = vld [vmem:[%s3296_s21 + $0x4a] sm:$0xff]  ;;  %v3553_v30 = vld [vmem:[%s3296_s21 + $0x62] sm:$0xff]  ;;  %v3556_v31 = vld [vmem:[%s3296_s21 + $0x5a] sm:$0xff] }
  0x4f   : > { %v3563_v32 = vld [vmem:[%s3296_s21 + $0x72] sm:$0xff]  ;;  %v3566_v33 = vld [vmem:[%s3296_s21 + $0x6a] sm:$0xff]  ;;  %v3573_v34 = vld [vmem:[%s3296_s21 + $0x82] sm:$0xff] }
  0x50   : > { %v3576_v35 = vld [vmem:[%s3296_s21 + $0x7a] sm:$0xff]  ;;  %v3583_v36 = vld [vmem:[%s3296_s21 + $0x92] sm:$0xff]  ;;  %v3586_v37 = vld [vmem:[%s3296_s21 + $0x8a] sm:$0xff] }
  0x51   : > { %441 = vrot.lane.b32.xlu1 %v338_v45, %s3246_s22  ;;  %439 = vrot.lane.b32.xlu0 %v337_v46, %s3246_s22  ;;  %v3595_v40 = vld [vmem:[%s3296_s21 + $0xa2] sm:$0xff]  ;;  %v3598_v41 = vld [vmem:[%s3296_s21 + $0x9a] sm:$0xff] }
  0x52   : > { %v3607_v44 = vld [vmem:[%s3296_s21 + $0xb2] sm:$0xff]  ;;  %v3610_v45 = vld [vmem:[%s3296_s21 + $0xaa] sm:$0xff]  ;;  %v3619_v48 = vld [vmem:[%s3296_s21 + $0xc2] sm:$0xff] }
  0x53   : > { %v3622_v49 = vld [vmem:[%s3296_s21 + $0xba] sm:$0xff]  ;;  %v3634_v53 = vld [vmem:[%s3296_s21 + $0xca] sm:$0xff] }
  0x54   : > { %v3644_v57 = vld [vmem:[%s3296_s21 + $0xda] sm:$0xff]  ;;  %v594_v61 = vld [vmem:[%s3296_s21 + $0xea] sm:$0xff] }
  0x55   : > { %445 = vrot.lane.b32.xlu1 %v340_v51, %s3246_s22  ;;  %443 = vrot.lane.b32.xlu0 %v339_v52, %s3246_s22  ;;  %v3631_v52 = vld [vmem:[%s3296_s21 + $0xd2] sm:$0xff]  ;;  %v596_v1 = vld [vmem:[%s3296_s21 + $0xfa] sm:$0xff] }
  0x56   : > { %v598_v5 = vld [vmem:[%s3296_s21 + $0x10a] sm:$0xff]  ;;  %v600_v9 = vld [vmem:[%s3296_s21 + $0x11a] sm:$0xff] }
  0x57   : > { %v602_v13 = vld [vmem:[%s3296_s21 + $0x12a] sm:$0xff] }
  0x59   : > { %449 = vrot.lane.b32.xlu1 %v342_v55, %s3246_s22  ;;  %447 = vrot.lane.b32.xlu0 %v341_v56, %s3246_s22  ;;  %v593_v56 = vld [vmem:[%s3296_s21 + $0xe2] sm:$0xff] }
  0x5d   : > { %453 = vrot.lane.b32.xlu1 %v344_v59, %s3246_s22  ;;  %451 = vrot.lane.b32.xlu0 %v343_v60, %s3246_s22  ;;  %v595_v60 = vld [vmem:[%s3296_s21 + $0xf2] sm:$0xff] }
  0x61   : > { %457 = vrot.lane.b32.xlu1 %v346_v63, %s3246_s22  ;;  %455 = vrot.lane.b32.xlu0 %v345_v0, %s3246_s22  ;;  %v597_v0 = vld [vmem:[%s3296_s21 + $0x102] sm:$0xff] }
  0x65   : > { %461 = vrot.lane.b32.xlu1 %v348_v3, %s3246_s22  ;;  %459 = vrot.lane.b32.xlu0 %v347_v4, %s3246_s22  ;;  %v599_v4 = vld [vmem:[%s3296_s21 + $0x112] sm:$0xff] }
  0x69   : > { %465 = vrot.lane.b32.xlu1 %v350_v7, %s3246_s22  ;;  %463 = vrot.lane.b32.xlu0 %v349_v8, %s3246_s22  ;;  %v601_v8 = vld [vmem:[%s3296_s21 + $0x122] sm:$0xff] }
  0x6d   : > { %469 = vrot.lane.b32.xlu1 %v352_v11, %s3246_s22  ;;  %467 = vrot.lane.b32.xlu0 %v351_v12, %s3246_s22  ;;  %v603_v12 = vld [vmem:[%s3296_s21 + $0x132] sm:$0xff] }
  0x71   : > { %473 = vrot.lane.b32.xlu1 %v354_v14, %s3246_s22  ;;  %471 = vrot.lane.b32.xlu0 %v353_v15, %s3246_s22 }
  0x75   : > { %477 = vrot.lane.b32.xlu1 %v356_v16, %s3246_s22  ;;  %475 = vrot.lane.b32.xlu0 %v355_v17, %s3246_s22  ;;  %v605_v16 = vld [vmem:[%s3296_s21 + $0x142] sm:$0x3]  ;;  %v604_v17 = vld [vmem:[%s3296_s21 + $0x13a] sm:$0xff] }
  0x79   : > { %647 = vrot.lane.b32.xlu1 %v565_v18, %s3247_s23  ;;  %479 = vrot.lane.b32.xlu0 %v357_v19, %s3246_s22 }
  0x7d   : > { %651 = vrot.lane.b32.xlu1 %v3506_v20, %s3247_s23  ;;  %649 = vrot.lane.b32.xlu0 %v566_v21, %s3247_s23 }
  0x81   : > { %655 = vrot.lane.b32.xlu1 %v3513_v22, %s3247_s23  ;;  %653 = vrot.lane.b32.xlu0 %v3516_v23, %s3247_s23 }
  0x85   : > { %659 = vrot.lane.b32.xlu1 %v3523_v24, %s3247_s23  ;;  %657 = vrot.lane.b32.xlu0 %v3526_v25, %s3247_s23 }
  0x89   : > { %663 = vrot.lane.b32.xlu1 %v3533_v26, %s3247_s23  ;;  %661 = vrot.lane.b32.xlu0 %v3536_v27, %s3247_s23 }
  0x8d   : > { %667 = vrot.lane.b32.xlu1 %v3543_v28, %s3247_s23  ;;  %665 = vrot.lane.b32.xlu0 %v3546_v29, %s3247_s23 }
  0x91   : > { %671 = vrot.lane.b32.xlu1 %v3553_v30, %s3247_s23  ;;  %669 = vrot.lane.b32.xlu0 %v3556_v31, %s3247_s23 }
  0x95   : > { %675 = vrot.lane.b32.xlu1 %v3563_v32, %s3247_s23  ;;  %673 = vrot.lane.b32.xlu0 %v3566_v33, %s3247_s23 }
  0x99   : > { %679 = vrot.lane.b32.xlu1 %v3573_v34, %s3247_s23  ;;  %677 = vrot.lane.b32.xlu0 %v3576_v35, %s3247_s23 }
  0x9b   : > { %v404_v38 = vpop.permute.xlu1 %403  ;;  %v400_v39 = vpop.permute.xlu0 %399 }
  0x9c   : > { %525 = vst.msk [vmem:[#allocation2 + $0x10] sm:$0xff] %vm522_vm5, %v404_v38  ;;  %523 = vst.msk [vmem:[#allocation2] sm:$0xff] %vm522_vm5, %v400_v39 }
  0x9d   : > { %683 = vrot.lane.b32.xlu1 %v3583_v36, %s3247_s23  ;;  %681 = vrot.lane.b32.xlu0 %v3586_v37, %s3247_s23 }
  0x9f   : > { %v406_v42 = vpop.permute.xlu1 %405  ;;  %v402_v43 = vpop.permute.xlu0 %401 }
  0xa0   : > { %526 = vst.msk [vmem:[#allocation2 + $0x18] sm:$0xff] %vm522_vm5, %v406_v42  ;;  %524 = vst.msk [vmem:[#allocation2 + $0x8] sm:$0xff] %vm522_vm5, %v402_v43 }
  0xa1   : > { %687 = vrot.lane.b32.xlu1 %v3595_v40, %s3247_s23  ;;  %685 = vrot.lane.b32.xlu0 %v3598_v41, %s3247_s23 }
  0xa3   : > { %v410_v46 = vpop.permute.xlu1 %409  ;;  %v408_v47 = vpop.permute.xlu0 %407 }
  0xa4   : > { %528 = vst.msk [vmem:[#allocation2 + $0x28] sm:$0xff] %vm522_vm5, %v410_v46  ;;  %527 = vst.msk [vmem:[#allocation2 + $0x20] sm:$0xff] %vm522_vm5, %v408_v47  ;;  %v1049_v47 = vld [vmem:[%s3296_s21 + $0x13] sm:$0xff] }
  0xa5   : > { %691 = vrot.lane.b32.xlu1 %v3607_v44, %s3247_s23  ;;  %689 = vrot.lane.b32.xlu0 %v3610_v45, %s3247_s23 }
  0xa7   : > { %v414_v50 = vpop.permute.xlu1 %413  ;;  %v412_v51 = vpop.permute.xlu0 %411 }
  0xa8   : > { %530 = vst.msk [vmem:[#allocation2 + $0x38] sm:$0xff] %vm522_vm5, %v414_v50  ;;  %529 = vst.msk [vmem:[#allocation2 + $0x30] sm:$0xff] %vm522_vm5, %v412_v51  ;;  %v1286_v51 = vld [vmem:[%s3296_s21 + $0x1c] sm:$0xff] }
  0xa9   : > { %695 = vrot.lane.b32.xlu1 %v3619_v48, %s3247_s23  ;;  %693 = vrot.lane.b32.xlu0 %v3622_v49, %s3247_s23 }
  0xab   : > { %v418_v54 = vpop.permute.xlu1 %417  ;;  %v416_v55 = vpop.permute.xlu0 %415 }
  0xac   : > { %532 = vst.msk [vmem:[#allocation2 + $0x48] sm:$0xff] %vm522_vm5, %v418_v54  ;;  %531 = vst.msk [vmem:[#allocation2 + $0x40] sm:$0xff] %vm522_vm5, %v416_v55 }
  0xad   : > { %699 = vrot.lane.b32.xlu1 %v3631_v52, %s3247_s23  ;;  %697 = vrot.lane.b32.xlu0 %v3634_v53, %s3247_s23 }
  0xaf   : > { %v422_v58 = vpop.permute.xlu1 %421  ;;  %v420_v59 = vpop.permute.xlu0 %419 }
  0xb0   : > { %534 = vst.msk [vmem:[#allocation2 + $0x58] sm:$0xff] %vm522_vm5, %v422_v58  ;;  %533 = vst.msk [vmem:[#allocation2 + $0x50] sm:$0xff] %vm522_vm5, %v420_v59  ;;  %v1515_v58 = vld [vmem:[%s3296_s21 + $0x2c] sm:$0xff]  ;;  %v1514_v59 = vld [vmem:[%s3296_s21 + $0x24] sm:$0xff] }
  0xb1   : > { %703 = vrot.lane.b32.xlu1 %v593_v56, %s3247_s23  ;;  %701 = vrot.lane.b32.xlu0 %v3644_v57, %s3247_s23 }
  0xb3   : > { %v426_v62 = vpop.permute.xlu1 %425  ;;  %v424_v63 = vpop.permute.xlu0 %423 }
  0xb4   : > { %536 = vst.msk [vmem:[#allocation2 + $0x68] sm:$0xff] %vm522_vm5, %v426_v62  ;;  %535 = vst.msk [vmem:[#allocation2 + $0x60] sm:$0xff] %vm522_vm5, %v424_v63  ;;  %v3226_v62 = vld [vmem:[%s4928_s1] sm:$0xff]   ;;  %v1732_v63 = vld [vmem:[%s3296_s21 + $0x2d] sm:$0xff] }
  0xb5   : > { %707 = vrot.lane.b32.xlu1 %v595_v60, %s3247_s23  ;;  %705 = vrot.lane.b32.xlu0 %v594_v61, %s3247_s23 }
  0xb7   : > { %v430_v2 = vpop.permute.xlu1 %429  ;;  %v428_v3 = vpop.permute.xlu0 %427 }
  0xb8   : > { %538 = vst.msk [vmem:[#allocation2 + $0x78] sm:$0xff] %vm522_vm5, %v430_v2  ;;  %537 = vst.msk [vmem:[#allocation2 + $0x70] sm:$0xff] %vm522_vm5, %v428_v3  ;;  %v1950_v3 = vld [vmem:[%s3296_s21 + $0x2e] sm:$0xff] }
  0xb9   : > { %711 = vrot.lane.b32.xlu1 %v597_v0, %s3247_s23  ;;  %709 = vrot.lane.b32.xlu0 %v596_v1, %s3247_s23  ;;  %v1731_v0 = vld [vmem:[%s3296_s21 + $0x25] sm:$0xff] }
  0xbb   : > { %v434_v6 = vpop.permute.xlu1 %433  ;;  %v432_v7 = vpop.permute.xlu0 %431 }
  0xbc   : > { %540 = vst.msk [vmem:[#allocation2 + $0x88] sm:$0xff] %vm522_vm5, %v434_v6  ;;  %539 = vst.msk [vmem:[#allocation2 + $0x80] sm:$0xff] %vm522_vm5, %v432_v7  ;;  %v1052_v7 = vld [vmem:[%s3296_s21 + $0x2b] sm:$0xff] }
  0xbd   : > { %715 = vrot.lane.b32.xlu1 %v599_v4, %s3247_s23  ;;  %713 = vrot.lane.b32.xlu0 %v598_v5, %s3247_s23  ;;  %v1949_v4 = vld [vmem:[%s3296_s21 + $0x26] sm:$0xff] }
  0xbf   : > { %v438_v10 = vpop.permute.xlu1 %437  ;;  %v436_v11 = vpop.permute.xlu0 %435 }
  0xc0   : > { %542 = vst.msk [vmem:[#allocation2 + $0x98] sm:$0xff] %vm522_vm5, %v438_v10  ;;  %541 = vst.msk [vmem:[#allocation2 + $0x90] sm:$0xff] %vm522_vm5, %v436_v11 }
  0xc1   : > { %719 = vrot.lane.b32.xlu1 %v601_v8, %s3247_s23  ;;  %717 = vrot.lane.b32.xlu0 %v600_v9, %s3247_s23  ;;  %v1051_v8 = vld [vmem:[%s3296_s21 + $0x23] sm:$0xff] }
  0xc3   : > { %v442_v14 = vpop.permute.xlu1 %441  ;;  %v440_v15 = vpop.permute.xlu0 %439 }
  0xc4   : > { %544 = vst.msk [vmem:[#allocation2 + $0xa8] sm:$0xff] %vm522_vm5, %v442_v14  ;;  %543 = vst.msk [vmem:[#allocation2 + $0xa0] sm:$0xff] %vm522_vm5, %v440_v15  ;;  %v1516_v14 = vld [vmem:[%s3296_s21 + $0x34] sm:$0xff] }
  0xc5   : > { %723 = vrot.lane.b32.xlu1 %v603_v12, %s3247_s23  ;;  %721 = vrot.lane.b32.xlu0 %v602_v13, %s3247_s23  ;;  %v1517_v13 = vld [vmem:[%s3296_s21 + $0x3c] sm:$0xff] }
  0xc7   : > { %v446_v18 = vpop.permute.xlu1 %445  ;;  %v444_v19 = vpop.permute.xlu0 %443 }
  0xc8   : > { %546 = vst.msk [vmem:[#allocation2 + $0xb8] sm:$0xff] %vm522_vm5, %v446_v18  ;;  %545 = vst.msk [vmem:[#allocation2 + $0xb0] sm:$0xff] %vm522_vm5, %v444_v19  ;;  %v1733_v18 = vld [vmem:[%s3296_s21 + $0x35] sm:$0xff] }
  0xc9   : > { %727 = vrot.lane.b32.xlu1 %v605_v16, %s3247_s23  ;;  %725 = vrot.lane.b32.xlu0 %v604_v17, %s3247_s23  ;;  %v1734_v17 = vld [vmem:[%s3296_s21 + $0x3d] sm:$0xff] }
  0xcb   : > { %v450_v21 = vpop.permute.xlu1 %449  ;;  %v448_v38 = vpop.permute.xlu0 %447 }
  0xcc   : > { %548 = vst.msk [vmem:[#allocation2 + $0xc8] sm:$0xff] %vm522_vm5, %v450_v21  ;;  %547 = vst.msk [vmem:[#allocation2 + $0xc0] sm:$0xff] %vm522_vm5, %v448_v38  ;;  %v1952_v38 = vld [vmem:[%s3296_s21 + $0x3e] sm:$0xff] }
  0xcd   : > { %893 = vrot.lane.b32.xlu1 %v3516_v23, %s3248_s24  ;;  %891 = vrot.lane.b32.xlu0 %v3506_v20, %s3248_s24 }
  0xcf   : > { %v454_v39 = vpop.permute.xlu1 %453  ;;  %v452_v42 = vpop.permute.xlu0 %451 }
  0xd0   : > { %550 = vst.msk [vmem:[#allocation2 + $0xd8] sm:$0xff] %vm522_vm5, %v454_v39  ;;  %549 = vst.msk [vmem:[#allocation2 + $0xd0] sm:$0xff] %vm522_vm5, %v452_v42  ;;  %v1951_v39 = vld [vmem:[%s3296_s21 + $0x36] sm:$0xff] }
  0xd1   : > { %897 = vrot.lane.b32.xlu1 %v3526_v25, %s3248_s24  ;;  %895 = vrot.lane.b32.xlu0 %v3513_v22, %s3248_s24 }
  0xd3   : > { %v458_v43 = vpop.permute.xlu1 %457  ;;  %v456_v46 = vpop.permute.xlu0 %455 }
  0xd4   : > { %552 = vst.msk [vmem:[#allocation2 + $0xe8] sm:$0xff] %vm522_vm5, %v458_v43  ;;  %551 = vst.msk [vmem:[#allocation2 + $0xe0] sm:$0xff] %vm522_vm5, %v456_v46  ;;  %v1054_v46 = vld [vmem:[%s3296_s21 + $0x3b] sm:$0xff] }
  0xd5   : > { %901 = vrot.lane.b32.xlu1 %v3536_v27, %s3248_s24  ;;  %899 = vrot.lane.b32.xlu0 %v3523_v24, %s3248_s24 }
  0xd7   : > { %v462_v20 = vpop.permute.xlu1 %461  ;;  %v460_v23 = vpop.permute.xlu0 %459 }
  0xd8   : > { %554 = vst.msk [vmem:[#allocation2 + $0xf8] sm:$0xff] %vm522_vm5, %v462_v20  ;;  %553 = vst.msk [vmem:[#allocation2 + $0xf0] sm:$0xff] %vm522_vm5, %v460_v23  ;;  %v1053_v20 = vld [vmem:[%s3296_s21 + $0x33] sm:$0xff] }
  0xd9   : > { %905 = vrot.lane.b32.xlu1 %v3546_v29, %s3248_s24  ;;  %903 = vrot.lane.b32.xlu0 %v3533_v26, %s3248_s24 }
  0xdb   : > { %v466_v22 = vpop.permute.xlu1 %465  ;;  %v464_v25 = vpop.permute.xlu0 %463 }
  0xdc   : > { %556 = vst.msk [vmem:[#allocation2 + $0x108] sm:$0xff] %vm522_vm5, %v466_v22  ;;  %555 = vst.msk [vmem:[#allocation2 + $0x100] sm:$0xff] %vm522_vm5, %v464_v25 }
  0xdd   : > { %909 = vrot.lane.b32.xlu1 %v3556_v31, %s3248_s24  ;;  %907 = vrot.lane.b32.xlu0 %v3543_v28, %s3248_s24 }
  0xdf   : > { %v470_v24 = vpop.permute.xlu1 %469  ;;  %v468_v27 = vpop.permute.xlu0 %467 }
  0xe0   : > { %558 = vst.msk [vmem:[#allocation2 + $0x118] sm:$0xff] %vm522_vm5, %v470_v24  ;;  %557 = vst.msk [vmem:[#allocation2 + $0x110] sm:$0xff] %vm522_vm5, %v468_v27  ;;  %v1519_v27 = vld [vmem:[%s3296_s21 + $0x4c] sm:$0xff] }
  0xe1   : > { %913 = vrot.lane.b32.xlu1 %v3566_v33, %s3248_s24  ;;  %911 = vrot.lane.b32.xlu0 %v3553_v30, %s3248_s24 }
  0xe3   : > { %v474_v26 = vpop.permute.xlu1 %473  ;;  %v472_v29 = vpop.permute.xlu0 %471 }
  0xe4   : > { %560 = vst.msk [vmem:[#allocation2 + $0x128] sm:$0xff] %vm522_vm5, %v474_v26  ;;  %559 = vst.msk [vmem:[#allocation2 + $0x120] sm:$0xff] %vm522_vm5, %v472_v29  ;;  %v1518_v26 = vld [vmem:[%s3296_s21 + $0x44] sm:$0xff] }
  0xe5   : > { %917 = vrot.lane.b32.xlu1 %v3576_v35, %s3248_s24  ;;  %915 = vrot.lane.b32.xlu0 %v3563_v32, %s3248_s24 }
  0xe7   : > { %v478_v28 = vpop.permute.xlu1 %477  ;;  %v476_v31 = vpop.permute.xlu0 %475 }
  0xe8   : > { %562 = vst.msk [vmem:[#allocation2 + $0x138] sm:$0xff] %vm522_vm5, %v478_v28  ;;  %561 = vst.msk [vmem:[#allocation2 + $0x130] sm:$0xff] %vm522_vm5, %v476_v31  ;;  %v1736_v31 = vld [vmem:[%s3296_s21 + $0x4d] sm:$0xff]  ;;  %vm1947_vm5 = vcmask 260320  }
  0xe9   : > { %921 = vrot.lane.b32.xlu1 %v3586_v37, %s3248_s24  ;;  %919 = vrot.lane.b32.xlu0 %v3573_v34, %s3248_s24 }
  0xeb   : > { %v648_v30 = vpop.permute.xlu1 %647  ;;  %v480_v33 = vpop.permute.xlu0 %479 }
  0xec   : > { %771 = vst.msk [vmem:[#allocation2] sm:$0xff] %vm770_vm6, %v648_v30  ;;  %v1735_v30 = vld [vmem:[%s3296_s21 + $0x45] sm:$0xff] }
  0xed   : > { %564 = vst.msk [vmem:[#allocation2 + $0x140] sm:$0x7] %vm563_vm7, %v480_v33  ;;  %925 = vrot.lane.b32.xlu1 %v3598_v41, %s3248_s24  ;;  %923 = vrot.lane.b32.xlu0 %v3583_v36, %s3248_s24  ;;  %vm1047_vm7 = vcmask 124000  }
  0xef   : > { %v652_v32 = vpop.permute.xlu1 %651  ;;  %v650_v35 = vpop.permute.xlu0 %649 }
  0xf0   : > { %773 = vst.msk [vmem:[#allocation2 + $0x10] sm:$0xff] %vm770_vm6, %v652_v32  ;;  %772 = vst.msk [vmem:[#allocation2 + $0x8] sm:$0xff] %vm770_vm6, %v650_v35  ;;  %v1954_v35 = vld [vmem:[%s3296_s21 + $0x4e] sm:$0xff] }
  0xf1   : > { %929 = vrot.lane.b32.xlu1 %v3610_v45, %s3248_s24  ;;  %927 = vrot.lane.b32.xlu0 %v3595_v40, %s3248_s24 }
  0xf3   : > { %v656_v34 = vpop.permute.xlu1 %655  ;;  %v654_v37 = vpop.permute.xlu0 %653 }
  0xf4   : > { %775 = vst.msk [vmem:[#allocation2 + $0x20] sm:$0xff] %vm770_vm6, %v656_v34  ;;  %774 = vst.msk [vmem:[#allocation2 + $0x18] sm:$0xff] %vm770_vm6, %v654_v37  ;;  %v1953_v34 = vld [vmem:[%s3296_s21 + $0x46] sm:$0xff] }
  0xf5   : > { %933 = vrot.lane.b32.xlu1 %v3622_v49, %s3248_s24  ;;  %931 = vrot.lane.b32.xlu0 %v3607_v44, %s3248_s24  ;;  %v1050_v44 = vld [vmem:[%s3296_s21 + $0x1b] sm:$0xff] }
  0xf7   : > { %v660_v36 = vpop.permute.xlu1 %659  ;;  %v658_v41 = vpop.permute.xlu0 %657 }
  0xf8   : > { %777 = vst.msk [vmem:[#allocation2 + $0x30] sm:$0xff] %vm770_vm6, %v660_v36  ;;  %776 = vst.msk [vmem:[#allocation2 + $0x28] sm:$0xff] %vm770_vm6, %v658_v41  ;;  %v1056_v41 = vld [vmem:[%s3296_s21 + $0x4b] sm:$0xff] }
  0xf9   : > { %937 = vrot.lane.b32.xlu1 %v3634_v53, %s3248_s24  ;;  %935 = vrot.lane.b32.xlu0 %v3619_v48, %s3248_s24  ;;  %v3224_v48 = vld [vmem:[%s4928_s1 + $0x10] ss:$0 sps:$4 sm:$0x33]   ;;  %v3250_v53 = vmov 0.0  }
  0xfa   : > { %3100 = vmatprep.subr.bf16.mxu0 %v3250_v53  ;;  %v2315_v54 = vsel %vm2313_vm8, %v3224_v48, 0  ;;  %3190 = vmatprep.subr.bf16.mxu1 %v3250_v53  ;;  %v1520_v48 = vld [vmem:[%s3296_s21 + $0x54] sm:$0xff] }
  0xfb   : > { %v664_v40 = vpop.permute.xlu1 %663  ;;  %v662_v45 = vpop.permute.xlu0 %661  ;;  %3101 = vmatpush3.bf16.msra.mxu0 %v2315_v54  ;;  %3193 = vmatpush3.bf16.msra.mxu1 %v2315_v54  ;;  %v1738_v54 = vld [vmem:[%s3296_s21 + $0x5d] sm:$0xff] }
  0xfc   : > { %779 = vst.msk [vmem:[#allocation2 + $0x40] sm:$0xff] %vm770_vm6, %v664_v40  ;;  %778 = vst.msk [vmem:[#allocation2 + $0x38] sm:$0xff] %vm770_vm6, %v662_v45  ;;  %3102 = vmatprep.subr.bf16.mxu0 %v3250_v53  ;;  %3191 = vmatprep.subr.bf16.mxu1 %v3250_v53  ;;  %v1055_v40 = vld [vmem:[%s3296_s21 + $0x43] sm:$0xff] }
  0xfd   : > { %941 = vrot.lane.b32.xlu1 %v3644_v57, %s3248_s24  ;;  %939 = vrot.lane.b32.xlu0 %v3631_v52, %s3248_s24  ;;  %v1285_v52 = vld [vmem:[%s3296_s21 + $0x14] sm:$0xff]  ;;  %v3225_v57 = vld [vmem:[%s4928_s1 + $0x8] sm:$0xff]  }
  0xfe   : > { %3106 = vmatprep.mubr.msk.bf16.mxu0 %vm3254_vm9, %v3250_v53  ;;  %3150 = vmatprep.mubr.msk.bf16.mxu1 %vm3254_vm9, %v3250_v53 }
  0xff   : > { %v668_v49 = vpop.permute.xlu1 %667  ;;  %v666_v50 = vpop.permute.xlu0 %665  ;;  %3103 = vmatpush3.bf16.msra.mxu0 %v3225_v57  ;;  %3194 = vmatpush3.bf16.msra.mxu1 %v3225_v57 }
 0x100   : > { %781 = vst.msk [vmem:[#allocation2 + $0x50] sm:$0xff] %vm770_vm6, %v668_v49  ;;  %780 = vst.msk [vmem:[#allocation2 + $0x48] sm:$0xff] %vm770_vm6, %v666_v50  ;;  %3104 = vmatprep.subr.bf16.mxu0 %v3250_v53  ;;  %3192 = vmatprep.subr.bf16.mxu1 %v3250_v53  ;;  %v1521_v50 = vld [vmem:[%s3296_s21 + $0x5c] sm:$0xff] }
 0x101   : > { %1129 = vrot.lane.b32.xlu1 %v1050_v44, %s3249_s27  ;;  %1127 = vrot.lane.b32.xlu0 %v1049_v47, %s3249_s27 }
 0x103   : > { %v672_v55 = vpop.permute.xlu1 %671  ;;  %v670_v56 = vpop.permute.xlu0 %669  ;;  %3105 = vmatpush3.bf16.msra.mxu0 %v3226_v62  ;;  %3195 = vmatpush3.bf16.msra.mxu1 %v3226_v62  ;;  %v1058_v62 = vld [vmem:[%s3296_s21 + $0x5b] sm:$0xff] }
 0x104   : > { %783 = vst.msk [vmem:[#allocation2 + $0x60] sm:$0xff] %vm770_vm6, %v672_v55  ;;  %782 = vst.msk [vmem:[#allocation2 + $0x58] sm:$0xff] %vm770_vm6, %v670_v56  ;;  %v1737_v55 = vld [vmem:[%s3296_s21 + $0x55] sm:$0xff] }
 0x105   : > { %1363 = vrot.lane.b32.xlu1 %v1286_v51, %s3251_s28  ;;  %1361 = vrot.lane.b32.xlu0 %v1285_v52, %s3251_s28 }
 0x107   : > { %v676_v60 = vpop.permute.xlu1 %675  ;;  %v674_v61 = vpop.permute.xlu0 %673 }
 0x108   : > { %785 = vst.msk [vmem:[#allocation2 + $0x70] sm:$0xff] %vm770_vm6, %v676_v60  ;;  %784 = vst.msk [vmem:[#allocation2 + $0x68] sm:$0xff] %vm770_vm6, %v674_v61 }
 0x109   : > { %1588 = vrot.lane.b32.xlu1 %v1515_v58, %s3252_s5  ;;  %1586 = vrot.lane.b32.xlu0 %v1514_v59, %s3252_s5 }
 0x10b   : > { %v680_v1 = vpop.permute.xlu1 %679  ;;  %v678_v2 = vpop.permute.xlu0 %677 }
 0x10c   : > { %787 = vst.msk [vmem:[#allocation2 + $0x80] sm:$0xff] %vm770_vm6, %v680_v1  ;;  %786 = vst.msk [vmem:[#allocation2 + $0x78] sm:$0xff] %vm770_vm6, %v678_v2 }
 0x10d   : > { %1805 = vrot.lane.b32.xlu1 %v1732_v63, %s3253_s8  ;;  %1803 = vrot.lane.b32.xlu0 %v1731_v0, %s3253_s8  ;;  %v1057_v63 = vld [vmem:[%s3296_s21 + $0x53] sm:$0xff] }
 0x10f   : > { %v684_v5 = vpop.permute.xlu1 %683  ;;  %v682_v6 = vpop.permute.xlu0 %681 }
 0x110   : > { %789 = vst.msk [vmem:[#allocation2 + $0x90] sm:$0xff] %vm770_vm6, %v684_v5  ;;  %788 = vst.msk [vmem:[#allocation2 + $0x88] sm:$0xff] %vm770_vm6, %v682_v6  ;;  %v1522_v5 = vld [vmem:[%s3296_s21 + $0x64] sm:$0xff] }
 0x111   : > { %2023 = vrot.lane.b32.xlu1 %v1950_v3, %s3255_s9  ;;  %2021 = vrot.lane.b32.xlu0 %v1949_v4, %s3255_s9  ;;  %v1523_v4 = vld [vmem:[%s3296_s21 + $0x6c] sm:$0xff] }
 0x113   : > { %v688_v9 = vpop.permute.xlu1 %687  ;;  %v686_v10 = vpop.permute.xlu0 %685 }
 0x114   : > { %791 = vst.msk [vmem:[#allocation2 + $0xa0] sm:$0xff] %vm770_vm6, %v688_v9  ;;  %790 = vst.msk [vmem:[#allocation2 + $0x98] sm:$0xff] %vm770_vm6, %v686_v10  ;;  %v1739_v9 = vld [vmem:[%s3296_s21 + $0x65] sm:$0xff] }
 0x115   : > { %1133 = vrot.lane.b32.xlu1 %v1052_v7, %s3249_s27  ;;  %1131 = vrot.lane.b32.xlu0 %v1051_v8, %s3249_s27  ;;  %v1740_v8 = vld [vmem:[%s3296_s21 + $0x6d] sm:$0xff] }
 0x117   : > { %v692_v11 = vpop.permute.xlu1 %691  ;;  %v690_v12 = vpop.permute.xlu0 %689 }
 0x118   : > { %793 = vst.msk [vmem:[#allocation2 + $0xb0] sm:$0xff] %vm770_vm6, %v692_v11  ;;  %792 = vst.msk [vmem:[#allocation2 + $0xa8] sm:$0xff] %vm770_vm6, %v690_v12  ;;  %v1958_v12 = vld [vmem:[%s3296_s21 + $0x6e] sm:$0xff] }
 0x119   : > { %1367 = vrot.lane.b32.xlu1 %v1515_v58, %s3251_s28  ;;  %1365 = vrot.lane.b32.xlu0 %v1514_v59, %s3251_s28  ;;  %v1956_v58 = vld [vmem:[%s3296_s21 + $0x5e] sm:$0xff]  ;;  %v1955_v59 = vld [vmem:[%s3296_s21 + $0x56] sm:$0xff] }
 0x11b   : > { %v696_v15 = vpop.permute.xlu1 %695  ;;  %v694_v16 = vpop.permute.xlu0 %693 }
 0x11c   : > { %795 = vst.msk [vmem:[#allocation2 + $0xc0] sm:$0xff] %vm770_vm6, %v696_v15  ;;  %794 = vst.msk [vmem:[#allocation2 + $0xb8] sm:$0xff] %vm770_vm6, %v694_v16  ;;  %v1060_v16 = vld [vmem:[%s3296_s21 + $0x6b] sm:$0xff] }
 0x11d   : > { %1592 = vrot.lane.b32.xlu1 %v1517_v13, %s3252_s5  ;;  %1590 = vrot.lane.b32.xlu0 %v1516_v14, %s3252_s5 }
 0x11f   : > { %v700_v19 = vpop.permute.xlu1 %699  ;;  %v698_v21 = vpop.permute.xlu0 %697 }
 0x120   : > { %797 = vst.msk [vmem:[#allocation2 + $0xd0] sm:$0xff] %vm770_vm6, %v700_v19  ;;  %796 = vst.msk [vmem:[#allocation2 + $0xc8] sm:$0xff] %vm770_vm6, %v698_v21 }
 0x121   : > { %1809 = vrot.lane.b32.xlu1 %v1734_v17, %s3253_s8  ;;  %1807 = vrot.lane.b32.xlu0 %v1733_v18, %s3253_s8  ;;  %v1059_v17 = vld [vmem:[%s3296_s21 + $0x63] sm:$0xff] }
 0x123   : > { %v704_v42 = vpop.permute.xlu1 %703  ;;  %v702_v43 = vpop.permute.xlu0 %701 }
 0x124   : > { %799 = vst.msk [vmem:[#allocation2 + $0xe0] sm:$0xff] %vm770_vm6, %v704_v42  ;;  %798 = vst.msk [vmem:[#allocation2 + $0xd8] sm:$0xff] %vm770_vm6, %v702_v43  ;;  %v1524_v42 = vld [vmem:[%s3296_s21 + $0x74] sm:$0xff] }
 0x125   : > { %2027 = vrot.lane.b32.xlu1 %v1952_v38, %s3255_s9  ;;  %2025 = vrot.lane.b32.xlu0 %v1951_v39, %s3255_s9  ;;  %v1525_v39 = vld [vmem:[%s3296_s21 + $0x7c] sm:$0xff] }
 0x127   : > { %v708_v23 = vpop.permute.xlu1 %707  ;;  %v706_v22 = vpop.permute.xlu0 %705 }
 0x128   : > { %801 = vst.msk [vmem:[#allocation2 + $0xf0] sm:$0xff] %vm770_vm6, %v708_v23  ;;  %800 = vst.msk [vmem:[#allocation2 + $0xe8] sm:$0xff] %vm770_vm6, %v706_v22  ;;  %v1741_v23 = vld [vmem:[%s3296_s21 + $0x75] sm:$0xff] }
 0x129   : > { %1137 = vrot.lane.b32.xlu1 %v1054_v46, %s3249_s27  ;;  %1135 = vrot.lane.b32.xlu0 %v1053_v20, %s3249_s27  ;;  %v1742_v20 = vld [vmem:[%s3296_s21 + $0x7d] sm:$0xff] }
 0x12b   : > { %v712_v25 = vpop.permute.xlu1 %711  ;;  %v710_v24 = vpop.permute.xlu0 %709 }
 0x12c   : > { %803 = vst.msk [vmem:[#allocation2 + $0x100] sm:$0xff] %vm770_vm6, %v712_v25  ;;  %802 = vst.msk [vmem:[#allocation2 + $0xf8] sm:$0xff] %vm770_vm6, %v710_v24  ;;  %v1960_v24 = vld [vmem:[%s3296_s21 + $0x7e] sm:$0xff] }
 0x12d   : > { %1371 = vrot.lane.b32.xlu1 %v1517_v13, %s3251_s28  ;;  %1369 = vrot.lane.b32.xlu0 %v1516_v14, %s3251_s28  ;;  %v1957_v13 = vld [vmem:[%s3296_s21 + $0x66] sm:$0xff] }
 0x12f   : > { %v716_v29 = vpop.permute.xlu1 %715  ;;  %v714_v28 = vpop.permute.xlu0 %713 }
 0x130   : > { %805 = vst.msk [vmem:[#allocation2 + $0x110] sm:$0xff] %vm770_vm6, %v716_v29  ;;  %804 = vst.msk [vmem:[#allocation2 + $0x108] sm:$0xff] %vm770_vm6, %v714_v28  ;;  %v1062_v28 = vld [vmem:[%s3296_s21 + $0x7b] sm:$0xff] }
 0x131   : > { %1596 = vrot.lane.b32.xlu1 %v1519_v27, %s3252_s5  ;;  %1594 = vrot.lane.b32.xlu0 %v1518_v26, %s3252_s5 }
 0x133   : > { %v720_v33 = vpop.permute.xlu1 %719  ;;  %v718_v32 = vpop.permute.xlu0 %717 }
 0x134   : > { %807 = vst.msk [vmem:[#allocation2 + $0x120] sm:$0xff] %vm770_vm6, %v720_v33  ;;  %806 = vst.msk [vmem:[#allocation2 + $0x118] sm:$0xff] %vm770_vm6, %v718_v32 }
 0x135   : > { %1813 = vrot.lane.b32.xlu1 %v1736_v31, %s3253_s8  ;;  %1811 = vrot.lane.b32.xlu0 %v1735_v30, %s3253_s8  ;;  %v1061_v31 = vld [vmem:[%s3296_s21 + $0x73] sm:$0xff] }
 0x137   : > { %v724_v37 = vpop.permute.xlu1 %723  ;;  %v722_v36 = vpop.permute.xlu0 %721 }
 0x138   : > { %809 = vst.msk [vmem:[#allocation2 + $0x130] sm:$0xff] %vm770_vm6, %v724_v37  ;;  %808 = vst.msk [vmem:[#allocation2 + $0x128] sm:$0xff] %vm770_vm6, %v722_v36  ;;  %v1526_v37 = vld [vmem:[%s3296_s21 + $0x84] sm:$0xff] }
 0x139   : > { %2031 = vrot.lane.b32.xlu1 %v1954_v35, %s3255_s9  ;;  %2029 = vrot.lane.b32.xlu0 %v1953_v34, %s3255_s9  ;;  %v1527_v34 = vld [vmem:[%s3296_s21 + $0x8c] sm:$0xff] }
 0x13b   : > { %v728_v45 = vpop.permute.xlu1 %727  ;;  %v726_v44 = vpop.permute.xlu0 %725 }
 0x13c   : > { %812 = vst.msk [vmem:[#allocation2 + $0x140] sm:$0x3] %vm811_vm10, %v728_v45  ;;  %v1743_v45 = vld [vmem:[%s3296_s21 + $0x85] sm:$0xff]  ;;  %vm1283_vm10 = vcmask 155776  }
 0x13d   : > { %810 = vst.msk [vmem:[#allocation2 + $0x138] sm:$0xff] %vm770_vm6, %v726_v44  ;;  %1141 = vrot.lane.b32.xlu1 %v1056_v41, %s3249_s27  ;;  %1139 = vrot.lane.b32.xlu0 %v1055_v40, %s3249_s27  ;;  %v1744_v40 = vld [vmem:[%s3296_s21 + $0x8d] sm:$0xff]  ;;  %vm2165_vm6 = vcmask 292096  }
 0x13f   : > { %v894_v47 = vpop.permute.xlu1 %893  ;;  %v892_v49 = vpop.permute.xlu0 %891 }
 0x140   : > { %1010 = vst.msk [vmem:[#allocation2 + $0x8] sm:$0xff] %vm1008_vm11, %v894_v47  ;;  %1009 = vst.msk [vmem:[#allocation2] sm:$0xff] %vm1008_vm11, %v892_v49  ;;  %v1962_v49 = vld [vmem:[%s3296_s21 + $0x8e] sm:$0xff] }
 0x141   : > { %1375 = vrot.lane.b32.xlu1 %v1519_v27, %s3251_s28  ;;  %1373 = vrot.lane.b32.xlu0 %v1518_v26, %s3251_s28  ;;  %v1959_v27 = vld [vmem:[%s3296_s21 + $0x76] sm:$0xff] }
 0x143   : > { %v898_v51 = vpop.permute.xlu1 %897  ;;  %v896_v52 = vpop.permute.xlu0 %895 }
 0x144   : > { %1012 = vst.msk [vmem:[#allocation2 + $0x18] sm:$0xff] %vm1008_vm11, %v898_v51  ;;  %1011 = vst.msk [vmem:[#allocation2 + $0x10] sm:$0xff] %vm1008_vm11, %v896_v52  ;;  %v1072_v52 = vld [vmem:[%s3296_s21 + $0xcb] sm:$0xff] }
 0x145   : > { %1600 = vrot.lane.b32.xlu1 %v1521_v50, %s3252_s5  ;;  %1598 = vrot.lane.b32.xlu0 %v1520_v48, %s3252_s5 }
 0x147   : > { %v902_v56 = vpop.permute.xlu1 %901  ;;  %v900_v57 = vpop.permute.xlu0 %899 }
 0x148   : > { %1014 = vst.msk [vmem:[#allocation2 + $0x28] sm:$0xff] %vm1008_vm11, %v902_v56  ;;  %1013 = vst.msk [vmem:[#allocation2 + $0x20] sm:$0xff] %vm1008_vm11, %v900_v57 }
 0x149   : > { %1817 = vrot.lane.b32.xlu1 %v1738_v54, %s3253_s8  ;;  %1815 = vrot.lane.b32.xlu0 %v1737_v55, %s3253_s8  ;;  %v1071_v54 = vld [vmem:[%s3296_s21 + $0xc3] sm:$0xff] }
 0x14b   : > { %v906_v60 = vpop.permute.xlu1 %905  ;;  %v904_v61 = vpop.permute.xlu0 %903 }
 0x14c   : > { %1016 = vst.msk [vmem:[#allocation2 + $0x38] sm:$0xff] %vm1008_vm11, %v906_v60  ;;  %1015 = vst.msk [vmem:[#allocation2 + $0x30] sm:$0xff] %vm1008_vm11, %v904_v61  ;;  %v1064_v60 = vld [vmem:[%s3296_s21 + $0x8b] sm:$0xff]  ;;  %v1063_v61 = vld [vmem:[%s3296_s21 + $0x83] sm:$0xff] }
 0x14d   : > { %2035 = vrot.lane.b32.xlu1 %v1956_v58, %s3255_s9  ;;  %2033 = vrot.lane.b32.xlu0 %v1955_v59, %s3255_s9 }
 0x14f   : > { %v910_v0 = vpop.permute.xlu1 %909  ;;  %v908_v1 = vpop.permute.xlu0 %907 }
 0x150   : > { %1018 = vst.msk [vmem:[#allocation2 + $0x48] sm:$0xff] %vm1008_vm11, %v910_v0  ;;  %1017 = vst.msk [vmem:[#allocation2 + $0x40] sm:$0xff] %vm1008_vm11, %v908_v1  ;;  %v3997_v0 = vld [vmem:[%s3296_s21 + $0xcc] sm:$0xff]  ;;  %v4000_v1 = vld [vmem:[%s3296_s21 + $0xc4] sm:$0xff] }
 0x151   : > { %1145 = vrot.lane.b32.xlu1 %v1058_v62, %s3249_s27  ;;  %1143 = vrot.lane.b32.xlu0 %v1057_v63, %s3249_s27 }
 0x153   : > { %v914_v2 = vpop.permute.xlu1 %913  ;;  %v912_v3 = vpop.permute.xlu0 %911 }
 0x154   : > { %1020 = vst.msk [vmem:[#allocation2 + $0x58] sm:$0xff] %vm1008_vm11, %v914_v2  ;;  %1019 = vst.msk [vmem:[#allocation2 + $0x50] sm:$0xff] %vm1008_vm11, %v912_v3 }
 0x155   : > { %1379 = vrot.lane.b32.xlu1 %v1521_v50, %s3251_s28  ;;  %1377 = vrot.lane.b32.xlu0 %v1520_v48, %s3251_s28  ;;  %v1961_v50 = vld [vmem:[%s3296_s21 + $0x86] sm:$0xff] }
 0x157   : > { %v918_v6 = vpop.permute.xlu1 %917  ;;  %v916_v7 = vpop.permute.xlu0 %915 }
 0x158   : > { %1022 = vst.msk [vmem:[#allocation2 + $0x68] sm:$0xff] %vm1008_vm11, %v918_v6  ;;  %1021 = vst.msk [vmem:[#allocation2 + $0x60] sm:$0xff] %vm1008_vm11, %v916_v7  ;;  %v4013_v6 = vld [vmem:[%s3296_s21 + $0xdc] sm:$0xff]  ;;  %v4016_v7 = vld [vmem:[%s3296_s21 + $0xd4] sm:$0xff] }
 0x159   : > { %1604 = vrot.lane.b32.xlu1 %v1523_v4, %s3252_s5  ;;  %1602 = vrot.lane.b32.xlu0 %v1522_v5, %s3252_s5 }
 0x15b   : > { %v922_v10 = vpop.permute.xlu1 %921  ;;  %v920_v11 = vpop.permute.xlu0 %919 }
 0x15c   : > { %1024 = vst.msk [vmem:[#allocation2 + $0x78] sm:$0xff] %vm1008_vm11, %v922_v10  ;;  %1023 = vst.msk [vmem:[#allocation2 + $0x70] sm:$0xff] %vm1008_vm11, %v920_v11  ;;  %v4025_v10 = vld [vmem:[%s3296_s21 + $0x9c] sm:$0xff]  ;;  %v4028_v11 = vld [vmem:[%s3296_s21 + $0x94] sm:$0xff] }
 0x15d   : > { %1821 = vrot.lane.b32.xlu1 %v1740_v8, %s3253_s8  ;;  %1819 = vrot.lane.b32.xlu0 %v1739_v9, %s3253_s8 }
 0x15f   : > { %v926_v14 = vpop.permute.xlu1 %925  ;;  %v924_v15 = vpop.permute.xlu0 %923 }
 0x160   : > { %1026 = vst.msk [vmem:[#allocation2 + $0x88] sm:$0xff] %vm1008_vm11, %v926_v14  ;;  %1025 = vst.msk [vmem:[#allocation2 + $0x80] sm:$0xff] %vm1008_vm11, %v924_v15 }
 0x161   : > { %2039 = vrot.lane.b32.xlu1 %v1958_v12, %s3255_s9  ;;  %2037 = vrot.lane.b32.xlu0 %v1957_v13, %s3255_s9 }
 0x163   : > { %v930_v18 = vpop.permute.xlu1 %929  ;;  %v928_v19 = vpop.permute.xlu0 %927 }
 0x164   : > { %1028 = vst.msk [vmem:[#allocation2 + $0x98] sm:$0xff] %vm1008_vm11, %v930_v18  ;;  %1027 = vst.msk [vmem:[#allocation2 + $0x90] sm:$0xff] %vm1008_vm11, %v928_v19  ;;  %v1753_v18 = vld [vmem:[%s3296_s21 + $0xd5] sm:$0xff] }
 0x165   : > { %1149 = vrot.lane.b32.xlu1 %v1060_v16, %s3249_s27  ;;  %1147 = vrot.lane.b32.xlu0 %v1059_v17, %s3249_s27  ;;  %v1754_v17 = vld [vmem:[%s3296_s21 + $0xdd] sm:$0xff] }
 0x167   : > { %v934_v21 = vpop.permute.xlu1 %933  ;;  %v932_v38 = vpop.permute.xlu0 %931 }
 0x168   : > { %1030 = vst.msk [vmem:[#allocation2 + $0xa8] sm:$0xff] %vm1008_vm11, %v934_v21  ;;  %1029 = vst.msk [vmem:[#allocation2 + $0xa0] sm:$0xff] %vm1008_vm11, %v932_v38  ;;  %v1746_v38 = vld [vmem:[%s3296_s21 + $0x9d] sm:$0xff] }
 0x169   : > { %1383 = vrot.lane.b32.xlu1 %v1523_v4, %s3251_s28  ;;  %1381 = vrot.lane.b32.xlu0 %v1522_v5, %s3251_s28 }
 0x16b   : > { %v938_v43 = vpop.permute.xlu1 %937  ;;  %v936_v46 = vpop.permute.xlu0 %935 }
 0x16c   : > { %1032 = vst.msk [vmem:[#allocation2 + $0xb8] sm:$0xff] %vm1008_vm11, %v938_v43  ;;  %1031 = vst.msk [vmem:[#allocation2 + $0xb0] sm:$0xff] %vm1008_vm11, %v936_v46  ;;  %v1972_v46 = vld [vmem:[%s3296_s21 + $0xde] sm:$0xff] }
 0x16d   : > { %1608 = vrot.lane.b32.xlu1 %v1525_v39, %s3252_s5  ;;  %1606 = vrot.lane.b32.xlu0 %v1524_v42, %s3252_s5 }
 0x16f   : > { %v942_v22 = vpop.permute.xlu1 %941  ;;  %v940_v25 = vpop.permute.xlu0 %939 }
 0x170   : > { %1034 = vst.msk [vmem:[#allocation2 + $0xc8] sm:$0xff] %vm1008_vm11, %v942_v22  ;;  %1033 = vst.msk [vmem:[#allocation2 + $0xc0] sm:$0xff] %vm1008_vm11, %v940_v25  ;;  %v1964_v25 = vld [vmem:[%s3296_s21 + $0x9e] sm:$0xff] }
 0x171   : > { %1825 = vrot.lane.b32.xlu1 %v1742_v20, %s3253_s8  ;;  %1823 = vrot.lane.b32.xlu0 %v1741_v23, %s3253_s8  ;;  %v1971_v20 = vld [vmem:[%s3296_s21 + $0xd6] sm:$0xff] }
 0x173   : > { %v1130_v26 = vpop.permute.xlu1 %1129  ;;  %v1128_v29 = vpop.permute.xlu0 %1127 }
 0x174   : > { %1246 = vst.msk [vmem:[#allocation2 + $0x8] sm:$0xff] %vm1244_vm12, %v1130_v26  ;;  %1245 = vst.msk [vmem:[#allocation2] sm:$0xff] %vm1244_vm12, %v1128_v29  ;;  %v1074_v29 = vld [vmem:[%s3296_s21 + $0xdb] sm:$0xff] }
 0x175   : > { %2043 = vrot.lane.b32.xlu1 %v1960_v24, %s3255_s9  ;;  %2041 = vrot.lane.b32.xlu0 %v1959_v27, %s3255_s9  ;;  %v1963_v24 = vld [vmem:[%s3296_s21 + $0x96] sm:$0xff] }
 0x177   : > { %v1364_v30 = vpop.permute.xlu1 %1363  ;;  %v1362_v33 = vpop.permute.xlu0 %1361 }
 0x178   : > { %1477 = vst.msk [vmem:[#allocation2 + $0x8] sm:$0xff] %vm1475_vm13, %v1364_v30  ;;  %1476 = vst.msk [vmem:[#allocation2] sm:$0xff] %vm1475_vm13, %v1362_v33 }
 0x179   : > { %1153 = vrot.lane.b32.xlu1 %v1062_v28, %s3249_s27  ;;  %1151 = vrot.lane.b32.xlu0 %v1061_v31, %s3249_s27  ;;  %v1073_v28 = vld [vmem:[%s3296_s21 + $0xd3] sm:$0xff] }
 0x17b   : > { %v1589_v32 = vpop.permute.xlu1 %1588  ;;  %v1587_v35 = vpop.permute.xlu0 %1586 }
 0x17c   : > { %1696 = vst.msk [vmem:[#allocation2 + $0x8] sm:$0xff] %vm1694_vm14, %v1589_v32  ;;  %1695 = vst.msk [vmem:[#allocation2] sm:$0xff] %vm1694_vm14, %v1587_v35 }
 0x17d   : > { %1387 = vrot.lane.b32.xlu1 %v1525_v39, %s3251_s28  ;;  %1385 = vrot.lane.b32.xlu0 %v1524_v42, %s3251_s28  ;;  %v1745_v39 = vld [vmem:[%s3296_s21 + $0x95] sm:$0xff] }
 0x17f   : > { %v1806_v36 = vpop.permute.xlu1 %1805  ;;  %v1804_v41 = vpop.permute.xlu0 %1803 }
 0x180   : > { %1913 = vst.msk [vmem:[#allocation2 + $0x8] sm:$0xff] %vm1911_vm15, %v1806_v36  ;;  %1912 = vst.msk [vmem:[#allocation2] sm:$0xff] %vm1911_vm15, %v1804_v41 }
 0x181   : > { %1612 = vrot.lane.b32.xlu1 %v1527_v34, %s3252_s5  ;;  %1610 = vrot.lane.b32.xlu0 %v1526_v37, %s3252_s5 }
 0x183   : > { %v2024_v44 = vpop.permute.xlu1 %2023  ;;  %v2022_v47 = vpop.permute.xlu0 %2021 }
 0x184   : > { %2131 = vst.msk [vmem:[#allocation2 + $0x8] sm:$0xff] %vm2129_vm0, %v2024_v44  ;;  %2130 = vst.msk [vmem:[#allocation2] sm:$0xff] %vm2129_vm0, %v2022_v47 }
 0x185   : > { %1829 = vrot.lane.b32.xlu1 %v1744_v40, %s3253_s8  ;;  %1827 = vrot.lane.b32.xlu0 %v1743_v45, %s3253_s8 }
 0x187   : > { %v1134_v48 = vpop.permute.xlu1 %1133  ;;  %v1132_v51 = vpop.permute.xlu0 %1131 }
 0x188   : > { %1248 = vst.msk [vmem:[#allocation2 + $0x18] sm:$0xff] %vm1244_vm12, %v1134_v48  ;;  %1247 = vst.msk [vmem:[#allocation2 + $0x10] sm:$0xff] %vm1244_vm12, %v1132_v51 }
 0x189   : > { %2047 = vrot.lane.b32.xlu1 %v1962_v49, %s3255_s9  ;;  %2045 = vrot.lane.b32.xlu0 %v1961_v50, %s3255_s9  ;;  %v4091_v49 = vld [vmem:[%s3296_s21 + $0xec] sm:$0xff]  ;;  %v4094_v50 = vld [vmem:[%s3296_s21 + $0xe4] sm:$0xff] }
 0x18b   : > { %v1368_v55 = vpop.permute.xlu1 %1367  ;;  %v1366_v56 = vpop.permute.xlu0 %1365  ;;  %v2167_v57 = vld [vmem:[#allocation2] sm:$0xff]  ;;  %v2168_v58 = vld [vmem:[#allocation2 + $0x8] sm:$0xff] }
 0x18c   : > { %1479 = vst.msk [vmem:[#allocation2 + $0x18] sm:$0xff] %vm1475_vm13, %v1368_v55  ;;  %1478 = vst.msk [vmem:[#allocation2 + $0x10] sm:$0xff] %vm1475_vm13, %v1366_v56  ;;  %v2208_v59 = vpack.c.bf16 %v2168_v58, %v2167_v57 }
 0x18d   : > { %1173 = vrot.lane.b32.xlu1 %v1072_v52, %s3249_s27  ;;  %1171 = vrot.lane.b32.xlu0 %v1071_v54, %s3249_s27  ;;  %v4103_v52 = vld [vmem:[%s3296_s21 + $0xac] sm:$0xff]  ;;  %v4106_v54 = vld [vmem:[%s3296_s21 + $0xa4] sm:$0xff] }
 0x18e   : > { %3107 = vmatmul.mubr.msk.bf16.vlgmr.msra.gmra.mxu0 %vm2249_vm1, %v2208_v59 }
 0x18f   : > { %v1593_v62 = vpop.permute.xlu1 %1592  ;;  %v1591_v63 = vpop.permute.xlu0 %1590  ;;  %3110 = vmatprep.mubr.msk.bf16.mxu0 %vm3254_vm9, %v3250_v53 }
 0x190   : > { %1698 = vst.msk [vmem:[#allocation2 + $0x18] sm:$0xff] %vm1694_vm14, %v1593_v62  ;;  %1697 = vst.msk [vmem:[#allocation2 + $0x10] sm:$0xff] %vm1694_vm14, %v1591_v63 }
 0x191   : > { %1157 = vrot.lane.b32.xlu1 %v1064_v60, %s3249_s27  ;;  %1155 = vrot.lane.b32.xlu0 %v1063_v61, %s3249_s27  ;;  %v1756_v60 = vld [vmem:[%s3296_s21 + $0xed] sm:$0xff]  ;;  %v1755_v61 = vld [vmem:[%s3296_s21 + $0xe5] sm:$0xff] }
 0x193   : > { %v1810_v2 = vpop.permute.xlu1 %1809  ;;  %v1808_v3 = vpop.permute.xlu0 %1807 }
 0x194   : > { %1915 = vst.msk [vmem:[#allocation2 + $0x18] sm:$0xff] %vm1911_vm15, %v1810_v2  ;;  %1914 = vst.msk [vmem:[#allocation2 + $0x10] sm:$0xff] %vm1911_vm15, %v1808_v3  ;;  %v1748_v2 = vld [vmem:[%s3296_s21 + $0xad] sm:$0xff]  ;;  %v1747_v3 = vld [vmem:[%s3296_s21 + $0xa5] sm:$0xff] }
 0x195   : > { %1407 = vrot.lane.b32.xlu1 %v3997_v0, %s3251_s28  ;;  %1405 = vrot.lane.b32.xlu0 %v4000_v1, %s3251_s28 }
 0x197   : > { %v2028_v4 = vpop.permute.xlu1 %2027  ;;  %v2026_v5 = vpop.permute.xlu0 %2025 }
 0x198   : > { %2133 = vst.msk [vmem:[#allocation2 + $0x18] sm:$0xff] %vm2129_vm0, %v2028_v4  ;;  %2132 = vst.msk [vmem:[#allocation2 + $0x10] sm:$0xff] %vm2129_vm0, %v2026_v5 }
 0x199   : > { %1391 = vrot.lane.b32.xlu1 %v1527_v34, %s3251_s28  ;;  %1389 = vrot.lane.b32.xlu0 %v1526_v37, %s3251_s28  ;;  %v1066_v34 = vld [vmem:[%s3296_s21 + $0x9b] sm:$0xff]  ;;  %v1065_v37 = vld [vmem:[%s3296_s21 + $0x93] sm:$0xff] }
 0x19b   : > { %v1138_v8 = vpop.permute.xlu1 %1137  ;;  %v1136_v9 = vpop.permute.xlu0 %1135 }
 0x19c   : > { %1250 = vst.msk [vmem:[#allocation2 + $0x28] sm:$0xff] %vm1244_vm12, %v1138_v8  ;;  %1249 = vst.msk [vmem:[#allocation2 + $0x20] sm:$0xff] %vm1244_vm12, %v1136_v9 }
 0x19d   : > { %1632 = vrot.lane.b32.xlu1 %v4013_v6, %s3252_s5  ;;  %1630 = vrot.lane.b32.xlu0 %v4016_v7, %s3252_s5 }
 0x19f   : > { %v1372_v12 = vpop.permute.xlu1 %1371  ;;  %v1370_v13 = vpop.permute.xlu0 %1369  ;;  %v2169_v14 = vld [vmem:[#allocation2 + $0x10] sm:$0xff]  ;;  %v2170_v15 = vld [vmem:[#allocation2 + $0x18] sm:$0xff] }
 0x1a0   : > { %1481 = vst.msk [vmem:[#allocation2 + $0x28] sm:$0xff] %vm1475_vm13, %v1372_v12  ;;  %1480 = vst.msk [vmem:[#allocation2 + $0x20] sm:$0xff] %vm1475_vm13, %v1370_v13  ;;  %v2209_v16 = vpack.c.bf16 %v2170_v15, %v2169_v14  ;;  %v840_v14 = vld [vmem:[%s3296_s21 + $0xea] sm:$0xff]  ;;  %v839_v15 = vld [vmem:[%s3296_s21 + $0xe2] sm:$0xff] }
 0x1a1   : > { %1616 = vrot.lane.b32.xlu1 %v4025_v10, %s3252_s5  ;;  %1614 = vrot.lane.b32.xlu0 %v4028_v11, %s3252_s5 }
 0x1a2   : > { %3111 = vmatmul.mubr.msk.bf16.gmra.mxu0 %vm2249_vm1, %v2209_v16 }
 0x1a3   : > { %v1597_v19 = vpop.permute.xlu1 %1596  ;;  %v1595_v21 = vpop.permute.xlu0 %1594  ;;  %3114 = vmatprep.mubr.msk.bf16.mxu0 %vm3254_vm9, %v3250_v53 }
 0x1a4   : > { %1700 = vst.msk [vmem:[#allocation2 + $0x28] sm:$0xff] %vm1694_vm14, %v1597_v19  ;;  %1699 = vst.msk [vmem:[#allocation2 + $0x20] sm:$0xff] %vm1694_vm14, %v1595_v21 }
 0x1a5   : > { %1849 = vrot.lane.b32.xlu1 %v1754_v17, %s3253_s8  ;;  %1847 = vrot.lane.b32.xlu0 %v1753_v18, %s3253_s8 }
 0x1a7   : > { %v1814_v42 = vpop.permute.xlu1 %1813  ;;  %v1812_v43 = vpop.permute.xlu0 %1811 }
 0x1a8   : > { %1917 = vst.msk [vmem:[#allocation2 + $0x28] sm:$0xff] %vm1911_vm15, %v1814_v42  ;;  %1916 = vst.msk [vmem:[#allocation2 + $0x20] sm:$0xff] %vm1911_vm15, %v1812_v43 }
 0x1a9   : > { %1833 = vrot.lane.b32.xlu1 %v1746_v38, %s3253_s8  ;;  %1831 = vrot.lane.b32.xlu0 %v1745_v39, %s3253_s8  ;;  %v1076_v38 = vld [vmem:[%s3296_s21 + $0xeb] sm:$0xff]  ;;  %v1075_v39 = vld [vmem:[%s3296_s21 + $0xe3] sm:$0xff] }
 0x1ab   : > { %v2032_v23 = vpop.permute.xlu1 %2031  ;;  %v2030_v22 = vpop.permute.xlu0 %2029 }
 0x1ac   : > { %2135 = vst.msk [vmem:[#allocation2 + $0x28] sm:$0xff] %vm2129_vm0, %v2032_v23  ;;  %2134 = vst.msk [vmem:[#allocation2 + $0x20] sm:$0xff] %vm2129_vm0, %v2030_v22 }
 0x1ad   : > { %2067 = vrot.lane.b32.xlu1 %v1972_v46, %s3255_s9  ;;  %2065 = vrot.lane.b32.xlu0 %v1971_v20, %s3255_s9  ;;  %v1068_v46 = vld [vmem:[%s3296_s21 + $0xab] sm:$0xff]  ;;  %v1067_v20 = vld [vmem:[%s3296_s21 + $0xa3] sm:$0xff] }
 0x1af   : > { %v1142_v27 = vpop.permute.xlu1 %1141  ;;  %v1140_v26 = vpop.permute.xlu0 %1139 }
 0x1b0   : > { %1252 = vst.msk [vmem:[#allocation2 + $0x38] sm:$0xff] %vm1244_vm12, %v1142_v27  ;;  %1251 = vst.msk [vmem:[#allocation2 + $0x30] sm:$0xff] %vm1244_vm12, %v1140_v26 }
 0x1b1   : > { %2051 = vrot.lane.b32.xlu1 %v1964_v25, %s3255_s9  ;;  %2049 = vrot.lane.b32.xlu0 %v1963_v24, %s3255_s9 }
 0x1b3   : > { %v1376_v31 = vpop.permute.xlu1 %1375  ;;  %v1374_v30 = vpop.permute.xlu0 %1373  ;;  %v2171_v33 = vld [vmem:[#allocation2 + $0x20] sm:$0xff]  ;;  %v2172_v32 = vld [vmem:[#allocation2 + $0x28] sm:$0xff] }
 0x1b4   : > { %1483 = vst.msk [vmem:[#allocation2 + $0x38] sm:$0xff] %vm1475_vm13, %v1376_v31  ;;  %1482 = vst.msk [vmem:[#allocation2 + $0x30] sm:$0xff] %vm1475_vm13, %v1374_v30  ;;  %v2210_v35 = vpack.c.bf16 %v2172_v32, %v2171_v33 }
 0x1b5   : > { %1177 = vrot.lane.b32.xlu1 %v1074_v29, %s3249_s27  ;;  %1175 = vrot.lane.b32.xlu0 %v1073_v28, %s3249_s27  ;;  %v4175_v29 = vld [vmem:[%s3296_s21 + $0xfc] sm:$0xff]  ;;  %v4178_v28 = vld [vmem:[%s3296_s21 + $0xf4] sm:$0xff] }
 0x1b6   : > { %3115 = vmatmul.mubr.msk.bf16.gmra.mxu0 %vm2249_vm1, %v2210_v35 }
 0x1b7   : > { %v1601_v36 = vpop.permute.xlu1 %1600  ;;  %v1599_v41 = vpop.permute.xlu0 %1598  ;;  %3118 = vmatprep.mubr.msk.bf16.mxu0 %vm3254_vm9, %v3250_v53 }
 0x1b8   : > { %1702 = vst.msk [vmem:[#allocation2 + $0x38] sm:$0xff] %vm1694_vm14, %v1601_v36  ;;  %1701 = vst.msk [vmem:[#allocation2 + $0x30] sm:$0xff] %vm1694_vm14, %v1599_v41 }
 0x1b9   : > { %1161 = vrot.lane.b32.xlu1 %v1066_v34, %s3249_s27  ;;  %1159 = vrot.lane.b32.xlu0 %v1065_v37, %s3249_s27  ;;  %v4188_v34 = vld [vmem:[%s3296_s21 + $0xbc] sm:$0xff]  ;;  %v4191_v37 = vld [vmem:[%s3296_s21 + $0xb4] sm:$0xff] }
 0x1bb   : > { %v1818_v40 = vpop.permute.xlu1 %1817  ;;  %v1816_v45 = vpop.permute.xlu0 %1815 }
 0x1bc   : > { %1919 = vst.msk [vmem:[#allocation2 + $0x38] sm:$0xff] %vm1911_vm15, %v1818_v40  ;;  %1918 = vst.msk [vmem:[#allocation2 + $0x30] sm:$0xff] %vm1911_vm15, %v1816_v45  ;;  %v1758_v40 = vld [vmem:[%s3296_s21 + $0xfd] sm:$0xff]  ;;  %v1757_v45 = vld [vmem:[%s3296_s21 + $0xf5] sm:$0xff] }
 0x1bd   : > { %1411 = vrot.lane.b32.xlu1 %v4013_v6, %s3251_s28  ;;  %1409 = vrot.lane.b32.xlu0 %v4016_v7, %s3251_s28  ;;  %v1974_v6 = vld [vmem:[%s3296_s21 + $0xee] sm:$0xff]  ;;  %v1973_v7 = vld [vmem:[%s3296_s21 + $0xe6] sm:$0xff] }
 0x1bf   : > { %v2036_v44 = vpop.permute.xlu1 %2035  ;;  %v2034_v47 = vpop.permute.xlu0 %2033 }
 0x1c0   : > { %2137 = vst.msk [vmem:[#allocation2 + $0x38] sm:$0xff] %vm2129_vm0, %v2036_v44  ;;  %2136 = vst.msk [vmem:[#allocation2 + $0x30] sm:$0xff] %vm2129_vm0, %v2034_v47 }
 0x1c1   : > { %1395 = vrot.lane.b32.xlu1 %v4025_v10, %s3251_s28  ;;  %1393 = vrot.lane.b32.xlu0 %v4028_v11, %s3251_s28  ;;  %v1966_v10 = vld [vmem:[%s3296_s21 + $0xae] sm:$0xff]  ;;  %v1965_v11 = vld [vmem:[%s3296_s21 + $0xa6] sm:$0xff] }
 0x1c3   : > { %v1146_v48 = vpop.permute.xlu1 %1145  ;;  %v1144_v51 = vpop.permute.xlu0 %1143 }
 0x1c4   : > { %1254 = vst.msk [vmem:[#allocation2 + $0x48] sm:$0xff] %vm1244_vm12, %v1146_v48  ;;  %1253 = vst.msk [vmem:[#allocation2 + $0x40] sm:$0xff] %vm1244_vm12, %v1144_v51 }
 0x1c5   : > { %1636 = vrot.lane.b32.xlu1 %v4091_v49, %s3252_s5  ;;  %1634 = vrot.lane.b32.xlu0 %v4094_v50, %s3252_s5 }
 0x1c7   : > { %v1380_v55 = vpop.permute.xlu1 %1379  ;;  %v1378_v56 = vpop.permute.xlu0 %1377  ;;  %v2173_v57 = vld [vmem:[#allocation2 + $0x30] sm:$0xff]  ;;  %v2174_v58 = vld [vmem:[#allocation2 + $0x38] sm:$0xff] }
 0x1c8   : > { %1485 = vst.msk [vmem:[#allocation2 + $0x48] sm:$0xff] %vm1475_vm13, %v1380_v55  ;;  %1484 = vst.msk [vmem:[#allocation2 + $0x40] sm:$0xff] %vm1475_vm13, %v1378_v56  ;;  %v2211_v59 = vpack.c.bf16 %v2174_v58, %v2173_v57  ;;  %v1968_v57 = vld [vmem:[%s3296_s21 + $0xbe] sm:$0xff]  ;;  %v1967_v58 = vld [vmem:[%s3296_s21 + $0xb6] sm:$0xff] }
 0x1c9   : > { %1620 = vrot.lane.b32.xlu1 %v4103_v52, %s3252_s5  ;;  %1618 = vrot.lane.b32.xlu0 %v4106_v54, %s3252_s5 }
 0x1ca   : > { %3119 = vmatmul.mubr.msk.bf16.gmra.mxu0 %vm2249_vm1, %v2211_v59 }
 0x1cb   : > { %v1605_v62 = vpop.permute.xlu1 %1604  ;;  %v1603_v63 = vpop.permute.xlu0 %1602  ;;  %3122 = vmatprep.mubr.msk.bf16.mxu0 %vm3254_vm9, %v3250_v53 }
 0x1cc   : > { %1704 = vst.msk [vmem:[#allocation2 + $0x48] sm:$0xff] %vm1694_vm14, %v1605_v62  ;;  %1703 = vst.msk [vmem:[#allocation2 + $0x40] sm:$0xff] %vm1694_vm14, %v1603_v63 }
 0x1cd   : > { %1853 = vrot.lane.b32.xlu1 %v1756_v60, %s3253_s8  ;;  %1851 = vrot.lane.b32.xlu0 %v1755_v61, %s3253_s8 }
 0x1cf   : > { %v1822_v4 = vpop.permute.xlu1 %1821  ;;  %v1820_v5 = vpop.permute.xlu0 %1819 }
 0x1d0   : > { %1921 = vst.msk [vmem:[#allocation2 + $0x48] sm:$0xff] %vm1911_vm15, %v1822_v4  ;;  %1920 = vst.msk [vmem:[#allocation2 + $0x40] sm:$0xff] %vm1911_vm15, %v1820_v5 }
 0x1d1   : > { %1837 = vrot.lane.b32.xlu1 %v1748_v2, %s3253_s8  ;;  %1835 = vrot.lane.b32.xlu0 %v1747_v3, %s3253_s8  ;;  %v842_v2 = vld [vmem:[%s3296_s21 + $0xfa] sm:$0xff]  ;;  %v841_v3 = vld [vmem:[%s3296_s21 + $0xf2] sm:$0xff] }
 0x1d3   : > { %v2040_v8 = vpop.permute.xlu1 %2039  ;;  %v2038_v9 = vpop.permute.xlu0 %2037 }
 0x1d4   : > { %2139 = vst.msk [vmem:[#allocation2 + $0x48] sm:$0xff] %vm2129_vm0, %v2040_v8  ;;  %2138 = vst.msk [vmem:[#allocation2 + $0x40] sm:$0xff] %vm2129_vm0, %v2038_v9 }
 0x1d5   : > { %2071 = vrot.lane.b32.xlu1 %v1974_v6, %s3255_s9  ;;  %2069 = vrot.lane.b32.xlu0 %v1973_v7, %s3255_s9  ;;  %v1078_v6 = vld [vmem:[%s3296_s21 + $0xfb] sm:$0xff]  ;;  %v1077_v7 = vld [vmem:[%s3296_s21 + $0xf3] sm:$0xff] }
 0x1d7   : > { %v1150_v12 = vpop.permute.xlu1 %1149  ;;  %v1148_v13 = vpop.permute.xlu0 %1147 }
 0x1d8   : > { %1256 = vst.msk [vmem:[#allocation2 + $0x58] sm:$0xff] %vm1244_vm12, %v1150_v12  ;;  %1255 = vst.msk [vmem:[#allocation2 + $0x50] sm:$0xff] %vm1244_vm12, %v1148_v13 }
 0x1d9   : > { %2055 = vrot.lane.b32.xlu1 %v1966_v10, %s3255_s9  ;;  %2053 = vrot.lane.b32.xlu0 %v1965_v11, %s3255_s9  ;;  %v1070_v10 = vld [vmem:[%s3296_s21 + $0xbb] sm:$0xff]  ;;  %v1069_v11 = vld [vmem:[%s3296_s21 + $0xb3] sm:$0xff] }
 0x1db   : > { %v1384_v16 = vpop.permute.xlu1 %1383  ;;  %v1382_v17 = vpop.permute.xlu0 %1381  ;;  %v2175_v18 = vld [vmem:[#allocation2 + $0x40] sm:$0xff]  ;;  %v2176_v19 = vld [vmem:[#allocation2 + $0x48] sm:$0xff] }
 0x1dc   : > { %1487 = vst.msk [vmem:[#allocation2 + $0x58] sm:$0xff] %vm1475_vm13, %v1384_v16  ;;  %1486 = vst.msk [vmem:[#allocation2 + $0x50] sm:$0xff] %vm1475_vm13, %v1382_v17  ;;  %v2212_v21 = vpack.c.bf16 %v2176_v19, %v2175_v18  ;;  %v4259_v18 = vld [vmem:[%s3296_s21 + $0x10c] sm:$0xff]  ;;  %v4262_v19 = vld [vmem:[%s3296_s21 + $0x104] sm:$0xff] }
 0x1dd   : > { %945 = vrot.lane.b32.xlu1 %v840_v14, %s3248_s24  ;;  %943 = vrot.lane.b32.xlu0 %v839_v15, %s3248_s24 }
 0x1de   : > { %3123 = vmatmul.mubr.msk.bf16.gmra.mxu0 %vm2249_vm1, %v2212_v21 }
 0x1df   : > { %v1609_v42 = vpop.permute.xlu1 %1608  ;;  %v1607_v43 = vpop.permute.xlu0 %1606  ;;  %3126 = vmatprep.mubr.msk.bf16.mxu0 %vm3254_vm9, %v3250_v53 }
 0x1e0   : > { %1706 = vst.msk [vmem:[#allocation2 + $0x58] sm:$0xff] %vm1694_vm14, %v1609_v42  ;;  %1705 = vst.msk [vmem:[#allocation2 + $0x50] sm:$0xff] %vm1694_vm14, %v1607_v43  ;;  %v1760_v43 = vld [vmem:[%s3296_s21 + $0x10d] sm:$0xff] }
 0x1e1   : > { %1181 = vrot.lane.b32.xlu1 %v1076_v38, %s3249_s27  ;;  %1179 = vrot.lane.b32.xlu0 %v1075_v39, %s3249_s27 }
 0x1e3   : > { %v1826_v23 = vpop.permute.xlu1 %1825  ;;  %v1824_v22 = vpop.permute.xlu0 %1823 }
 0x1e4   : > { %1923 = vst.msk [vmem:[#allocation2 + $0x58] sm:$0xff] %vm1911_vm15, %v1826_v23  ;;  %1922 = vst.msk [vmem:[#allocation2 + $0x50] sm:$0xff] %vm1911_vm15, %v1824_v22  ;;  %v1752_v22 = vld [vmem:[%s3296_s21 + $0xcd] sm:$0xff] }
 0x1e5   : > { %1165 = vrot.lane.b32.xlu1 %v1068_v46, %s3249_s27  ;;  %1163 = vrot.lane.b32.xlu0 %v1067_v20, %s3249_s27  ;;  %v1759_v46 = vld [vmem:[%s3296_s21 + $0x105] sm:$0xff] }
 0x1e7   : > { %v2044_v25 = vpop.permute.xlu1 %2043  ;;  %v2042_v24 = vpop.permute.xlu0 %2041 }
 0x1e8   : > { %2141 = vst.msk [vmem:[#allocation2 + $0x58] sm:$0xff] %vm2129_vm0, %v2044_v25  ;;  %2140 = vst.msk [vmem:[#allocation2 + $0x50] sm:$0xff] %vm2129_vm0, %v2042_v24  ;;  %v1751_v25 = vld [vmem:[%s3296_s21 + $0xc5] sm:$0xff] }
 0x1e9   : > { %1415 = vrot.lane.b32.xlu1 %v4091_v49, %s3251_s28  ;;  %1413 = vrot.lane.b32.xlu0 %v4094_v50, %s3251_s28  ;;  %v1750_v49 = vld [vmem:[%s3296_s21 + $0xbd] sm:$0xff]  ;;  %v1749_v50 = vld [vmem:[%s3296_s21 + $0xb5] sm:$0xff] }
 0x1eb   : > { %v1154_v27 = vpop.permute.xlu1 %1153  ;;  %v1152_v26 = vpop.permute.xlu0 %1151 }
 0x1ec   : > { %1258 = vst.msk [vmem:[#allocation2 + $0x68] sm:$0xff] %vm1244_vm12, %v1154_v27  ;;  %1257 = vst.msk [vmem:[#allocation2 + $0x60] sm:$0xff] %vm1244_vm12, %v1152_v26 }
 0x1ed   : > { %1399 = vrot.lane.b32.xlu1 %v4103_v52, %s3251_s28  ;;  %1397 = vrot.lane.b32.xlu0 %v4106_v54, %s3251_s28  ;;  %v1976_v52 = vld [vmem:[%s3296_s21 + $0xfe] sm:$0xff]  ;;  %v1975_v54 = vld [vmem:[%s3296_s21 + $0xf6] sm:$0xff] }
 0x1ef   : > { %v1388_v31 = vpop.permute.xlu1 %1387  ;;  %v1386_v30 = vpop.permute.xlu0 %1385  ;;  %v2177_v33 = vld [vmem:[#allocation2 + $0x50] sm:$0xff]  ;;  %v2178_v32 = vld [vmem:[#allocation2 + $0x58] sm:$0xff] }
 0x1f0   : > { %1489 = vst.msk [vmem:[#allocation2 + $0x68] sm:$0xff] %vm1475_vm13, %v1388_v31  ;;  %1488 = vst.msk [vmem:[#allocation2 + $0x60] sm:$0xff] %vm1475_vm13, %v1386_v30  ;;  %v2213_v35 = vpack.c.bf16 %v2178_v32, %v2177_v33 }
 0x1f1   : > { %1640 = vrot.lane.b32.xlu1 %v4175_v29, %s3252_s5  ;;  %1638 = vrot.lane.b32.xlu0 %v4178_v28, %s3252_s5 }
 0x1f2   : > { %3127 = vmatmul.mubr.msk.bf16.gmra.mxu0 %vm2249_vm1, %v2213_v35 }
 0x1f3   : > { %v1613_v36 = vpop.permute.xlu1 %1612  ;;  %v1611_v41 = vpop.permute.xlu0 %1610  ;;  %3130 = vmatprep.mubr.msk.bf16.mxu0 %vm3254_vm9, %v3250_v53 }
 0x1f4   : > { %1708 = vst.msk [vmem:[#allocation2 + $0x68] sm:$0xff] %vm1694_vm14, %v1613_v36  ;;  %1707 = vst.msk [vmem:[#allocation2 + $0x60] sm:$0xff] %vm1694_vm14, %v1611_v41 }
 0x1f5   : > { %1624 = vrot.lane.b32.xlu1 %v4188_v34, %s3252_s5  ;;  %1622 = vrot.lane.b32.xlu0 %v4191_v37, %s3252_s5 }
 0x1f7   : > { %v1830_v44 = vpop.permute.xlu1 %1829  ;;  %v1828_v47 = vpop.permute.xlu0 %1827 }
 0x1f8   : > { %1925 = vst.msk [vmem:[#allocation2 + $0x68] sm:$0xff] %vm1911_vm15, %v1830_v44  ;;  %1924 = vst.msk [vmem:[#allocation2 + $0x60] sm:$0xff] %vm1911_vm15, %v1828_v47 }
 0x1f9   : > { %1857 = vrot.lane.b32.xlu1 %v1758_v40, %s3253_s8  ;;  %1855 = vrot.lane.b32.xlu0 %v1757_v45, %s3253_s8  ;;  %v844_v40 = vld [vmem:[%s3296_s21 + $0x10a] sm:$0xff]  ;;  %v843_v45 = vld [vmem:[%s3296_s21 + $0x102] sm:$0xff] }
 0x1fb   : > { %v2048_v48 = vpop.permute.xlu1 %2047  ;;  %v2046_v51 = vpop.permute.xlu0 %2045 }
 0x1fc   : > { %2143 = vst.msk [vmem:[#allocation2 + $0x68] sm:$0xff] %vm2129_vm0, %v2048_v48  ;;  %2142 = vst.msk [vmem:[#allocation2 + $0x60] sm:$0xff] %vm2129_vm0, %v2046_v51 }
 0x1fd   : > { %1841 = vrot.lane.b32.xlu1 %v1750_v49, %s3253_s8  ;;  %1839 = vrot.lane.b32.xlu0 %v1749_v50, %s3253_s8  ;;  %v1080_v49 = vld [vmem:[%s3296_s21 + $0x10b] sm:$0xff]  ;;  %v1079_v50 = vld [vmem:[%s3296_s21 + $0x103] sm:$0xff] }
 0x1ff   : > { %v1174_v55 = vpop.permute.xlu1 %1173  ;;  %v1172_v56 = vpop.permute.xlu0 %1171 }
 0x200   : > { %1268 = vst.msk [vmem:[#allocation2 + $0xb8] sm:$0xff] %vm1244_vm12, %v1174_v55  ;;  %1267 = vst.msk [vmem:[#allocation2 + $0xb0] sm:$0xff] %vm1244_vm12, %v1172_v56  ;;  %v4325_v55 = vld [vmem:[%s3296_s21 + $0x11c] sm:$0xff]  ;;  %v4328_v56 = vld [vmem:[%s3296_s21 + $0x114] sm:$0xff] }
 0x201   : > { %2075 = vrot.lane.b32.xlu1 %v1976_v52, %s3255_s9  ;;  %2073 = vrot.lane.b32.xlu0 %v1975_v54, %s3255_s9 }
 0x203   : > { %v1158_v59 = vpop.permute.xlu1 %1157  ;;  %v1156_v60 = vpop.permute.xlu0 %1155  ;;  %v2179_v61 = vld [vmem:[#allocation2 + $0x60] sm:$0xff]  ;;  %v2180_v62 = vld [vmem:[#allocation2 + $0x68] sm:$0xff] }
 0x204   : > { %1260 = vst.msk [vmem:[#allocation2 + $0x78] sm:$0xff] %vm1244_vm12, %v1158_v59  ;;  %1259 = vst.msk [vmem:[#allocation2 + $0x70] sm:$0xff] %vm1244_vm12, %v1156_v60  ;;  %v2214_v63 = vpack.c.bf16 %v2180_v62, %v2179_v61  ;;  %v1762_v59 = vld [vmem:[%s3296_s21 + $0x11d] sm:$0xff]  ;;  %v1761_v60 = vld [vmem:[%s3296_s21 + $0x115] sm:$0xff] }
 0x205   : > { %2059 = vrot.lane.b32.xlu1 %v1968_v57, %s3255_s9  ;;  %2057 = vrot.lane.b32.xlu0 %v1967_v58, %s3255_s9 }
 0x206   : > { %3131 = vmatmul.mubr.msk.bf16.gmra.mxu0 %vm2249_vm1, %v2214_v63  ;;  %v1980_v63 = vld [vmem:[%s3296_s21 + $0x11e] sm:$0xff] }
 0x207   : > { %v1408_v4 = vpop.permute.xlu1 %1407  ;;  %v1406_v5 = vpop.permute.xlu0 %1405  ;;  %3134 = vmatprep.mubr.msk.bf16.mxu0 %vm3254_vm9, %v3250_v53 }
 0x208   : > { %1499 = vst.msk [vmem:[#allocation2 + $0xb8] sm:$0xff] %vm1475_vm13, %v1408_v4  ;;  %1498 = vst.msk [vmem:[#allocation2 + $0xb0] sm:$0xff] %vm1475_vm13, %v1406_v5  ;;  %v846_v5 = vld [vmem:[%s3296_s21 + $0x11a] sm:$0xff] }
 0x209   : > { %949 = vrot.lane.b32.xlu1 %v842_v2, %s3248_s24  ;;  %947 = vrot.lane.b32.xlu0 %v841_v3, %s3248_s24  ;;  %v1979_v2 = vld [vmem:[%s3296_s21 + $0x116] sm:$0xff] }
 0x20b   : > { %v1392_v8 = vpop.permute.xlu1 %1391  ;;  %v1390_v9 = vpop.permute.xlu0 %1389 }
 0x20c   : > { %1491 = vst.msk [vmem:[#allocation2 + $0x78] sm:$0xff] %vm1475_vm13, %v1392_v8  ;;  %1490 = vst.msk [vmem:[#allocation2 + $0x70] sm:$0xff] %vm1475_vm13, %v1390_v9 }
 0x20d   : > { %1185 = vrot.lane.b32.xlu1 %v1078_v6, %s3249_s27  ;;  %1183 = vrot.lane.b32.xlu0 %v1077_v7, %s3249_s27  ;;  %v845_v6 = vld [vmem:[%s3296_s21 + $0x112] sm:$0xff] }
 0x20f   : > { %v1633_v12 = vpop.permute.xlu1 %1632  ;;  %v1631_v13 = vpop.permute.xlu0 %1630 }
 0x210   : > { %1718 = vst.msk [vmem:[#allocation2 + $0xb8] sm:$0xff] %vm1694_vm14, %v1633_v12  ;;  %1717 = vst.msk [vmem:[#allocation2 + $0xb0] sm:$0xff] %vm1694_vm14, %v1631_v13 }
 0x211   : > { %1169 = vrot.lane.b32.xlu1 %v1070_v10, %s3249_s27  ;;  %1167 = vrot.lane.b32.xlu0 %v1069_v11, %s3249_s27  ;;  %v1082_v10 = vld [vmem:[%s3296_s21 + $0x11b] sm:$0xff]  ;;  %v1081_v11 = vld [vmem:[%s3296_s21 + $0x113] sm:$0xff] }
 0x213   : > { %v1617_v14 = vpop.permute.xlu1 %1616  ;;  %v1615_v15 = vpop.permute.xlu0 %1614 }
 0x214   : > { %1710 = vst.msk [vmem:[#allocation2 + $0x78] sm:$0xff] %vm1694_vm14, %v1617_v14  ;;  %1709 = vst.msk [vmem:[#allocation2 + $0x70] sm:$0xff] %vm1694_vm14, %v1615_v15 }
 0x215   : > { %1419 = vrot.lane.b32.xlu1 %v4175_v29, %s3251_s28  ;;  %1417 = vrot.lane.b32.xlu0 %v4178_v28, %s3251_s28  ;;  %v1978_v29 = vld [vmem:[%s3296_s21 + $0x10e] sm:$0xff]  ;;  %v1977_v28 = vld [vmem:[%s3296_s21 + $0x106] sm:$0xff] }
 0x217   : > { %v1850_v16 = vpop.permute.xlu1 %1849  ;;  %v1848_v17 = vpop.permute.xlu0 %1847 }
 0x218   : > { %1935 = vst.msk [vmem:[#allocation2 + $0xb8] sm:$0xff] %vm1911_vm15, %v1850_v16  ;;  %1934 = vst.msk [vmem:[#allocation2 + $0xb0] sm:$0xff] %vm1911_vm15, %v1848_v17 }
 0x219   : > { %1403 = vrot.lane.b32.xlu1 %v4188_v34, %s3251_s28  ;;  %1401 = vrot.lane.b32.xlu0 %v4191_v37, %s3251_s28  ;;  %v1970_v34 = vld [vmem:[%s3296_s21 + $0xce] sm:$0xff]  ;;  %v1969_v37 = vld [vmem:[%s3296_s21 + $0xc6] sm:$0xff] }
 0x21b   : > { %v1834_v21 = vpop.permute.xlu1 %1833  ;;  %v1832_v38 = vpop.permute.xlu0 %1831 }
 0x21c   : > { %1927 = vst.msk [vmem:[#allocation2 + $0x78] sm:$0xff] %vm1911_vm15, %v1834_v21  ;;  %1926 = vst.msk [vmem:[#allocation2 + $0x70] sm:$0xff] %vm1911_vm15, %v1832_v38 }
 0x21d   : > { %1644 = vrot.lane.b32.xlu1 %v4259_v18, %s3252_s5  ;;  %1642 = vrot.lane.b32.xlu0 %v4262_v19, %s3252_s5 }
 0x21f   : > { %v2068_v39 = vpop.permute.xlu1 %2067  ;;  %v2066_v42 = vpop.permute.xlu0 %2065 }
 0x220   : > { %2153 = vst.msk [vmem:[#allocation2 + $0xb8] sm:$0xff] %vm2129_vm0, %v2068_v39  ;;  %2152 = vst.msk [vmem:[#allocation2 + $0xb0] sm:$0xff] %vm2129_vm0, %v2066_v42 }
 0x221   : > { %1628 = vrot.lane.b32.xlu1 %v3997_v0, %s3252_s5  ;;  %1626 = vrot.lane.b32.xlu0 %v4000_v1, %s3252_s5 }
 0x223   : > { %v2052_v20 = vpop.permute.xlu1 %2051  ;;  %v2050_v23 = vpop.permute.xlu0 %2049 }
 0x224   : > { %2145 = vst.msk [vmem:[#allocation2 + $0x78] sm:$0xff] %vm2129_vm0, %v2052_v20  ;;  %2144 = vst.msk [vmem:[#allocation2 + $0x70] sm:$0xff] %vm2129_vm0, %v2050_v23 }
 0x225   : > { %1861 = vrot.lane.b32.xlu1 %v1760_v43, %s3253_s8  ;;  %1859 = vrot.lane.b32.xlu0 %v1759_v46, %s3253_s8 }
 0x227   : > { %v1178_v0 = vpop.permute.xlu1 %1177  ;;  %v1176_v24 = vpop.permute.xlu0 %1175  ;;  %v2189_v27 = vld [vmem:[#allocation2 + $0xb0] sm:$0xff]  ;;  %v2190_v1 = vld [vmem:[#allocation2 + $0xb8] sm:$0xff] }
 0x228   : > { %1270 = vst.msk [vmem:[#allocation2 + $0xc8] sm:$0xff] %vm1244_vm12, %v1178_v0  ;;  %1269 = vst.msk [vmem:[#allocation2 + $0xc0] sm:$0xff] %vm1244_vm12, %v1176_v24  ;;  %v2219_v26 = vpack.c.bf16 %v2190_v1, %v2189_v27  ;;  %v1547_v1 = vld [vmem:[%s3296_s21 + $0x12c] sm:$0xff] }
 0x229   : > { %1845 = vrot.lane.b32.xlu1 %v1752_v22, %s3253_s8  ;;  %1843 = vrot.lane.b32.xlu0 %v1751_v25, %s3253_s8 }
 0x22a   : > { %3151 = vmatmul.mubr.msk.bf16.vlgmr.msra.gmra.mxu1 %vm2249_vm1, %v2219_v26  ;;  %v1546_v26 = vld [vmem:[%s3296_s21 + $0x124] sm:$0xff] }
 0x22b   : > { %v1162_v31 = vpop.permute.xlu1 %1161  ;;  %v1160_v30 = vpop.permute.xlu0 %1159  ;;  %v2181_v33 = vld [vmem:[#allocation2 + $0x70] sm:$0xff]  ;;  %v2182_v32 = vld [vmem:[#allocation2 + $0x78] sm:$0xff]  ;;  %3154 = vmatprep.mubr.msk.bf16.mxu1 %vm3254_vm9, %v3250_v53 }
 0x22c   : > { %1262 = vst.msk [vmem:[#allocation2 + $0x88] sm:$0xff] %vm1244_vm12, %v1162_v31  ;;  %1261 = vst.msk [vmem:[#allocation2 + $0x80] sm:$0xff] %vm1244_vm12, %v1160_v30  ;;  %v2215_v35 = vpack.c.bf16 %v2182_v32, %v2181_v33  ;;  %v1764_v31 = vld [vmem:[%s3296_s21 + $0x12d] sm:$0xff]  ;;  %v1763_v30 = vld [vmem:[%s3296_s21 + $0x125] sm:$0xff] }
 0x22d   : > { %2079 = vrot.lane.b32.xlu1 %v1978_v29, %s3255_s9  ;;  %2077 = vrot.lane.b32.xlu0 %v1977_v28, %s3255_s9 }
 0x22e   : > { %3135 = vmatmul.mubr.msk.bf16.gmra.mxu0 %vm2249_vm1, %v2215_v35  ;;  %v1982_v35 = vld [vmem:[%s3296_s21 + $0x12e] sm:$0xff] }
 0x22f   : > { %v1412_v36 = vpop.permute.xlu1 %1411  ;;  %v1410_v41 = vpop.permute.xlu0 %1409  ;;  %3138 = vmatprep.mubr.msk.bf16.mxu0 %vm3254_vm9, %v3250_v53 }
 0x230   : > { %1501 = vst.msk [vmem:[#allocation2 + $0xc8] sm:$0xff] %vm1475_vm13, %v1412_v36  ;;  %1500 = vst.msk [vmem:[#allocation2 + $0xc0] sm:$0xff] %vm1475_vm13, %v1410_v41 }
 0x231   : > { %2063 = vrot.lane.b32.xlu1 %v1970_v34, %s3255_s9  ;;  %2061 = vrot.lane.b32.xlu0 %v1969_v37, %s3255_s9  ;;  %v1981_v34 = vld [vmem:[%s3296_s21 + $0x126] sm:$0xff] }
 0x233   : > { %v1396_v44 = vpop.permute.xlu1 %1395  ;;  %v1394_v47 = vpop.permute.xlu0 %1393 }
 0x234   : > { %1493 = vst.msk [vmem:[#allocation2 + $0x88] sm:$0xff] %vm1475_vm13, %v1396_v44  ;;  %1492 = vst.msk [vmem:[#allocation2 + $0x80] sm:$0xff] %vm1475_vm13, %v1394_v47 }
 0x235   : > { %953 = vrot.lane.b32.xlu1 %v844_v40, %s3248_s24  ;;  %951 = vrot.lane.b32.xlu0 %v843_v45, %s3248_s24  ;;  %v848_v40 = vld [vmem:[%s3296_s21 + $0x12a] sm:$0xff]  ;;  %v847_v45 = vld [vmem:[%s3296_s21 + $0x122] sm:$0xff] }
 0x237   : > { %v1637_v48 = vpop.permute.xlu1 %1636  ;;  %v1635_v51 = vpop.permute.xlu0 %1634 }
 0x238   : > { %1720 = vst.msk [vmem:[#allocation2 + $0xc8] sm:$0xff] %vm1694_vm14, %v1637_v48  ;;  %1719 = vst.msk [vmem:[#allocation2 + $0xc0] sm:$0xff] %vm1694_vm14, %v1635_v51  ;;  %v1084_v48 = vld [vmem:[%s3296_s21 + $0x12b] sm:$0xff]  ;;  %v1083_v51 = vld [vmem:[%s3296_s21 + $0x123] sm:$0xff] }
 0x239   : > { %1189 = vrot.lane.b32.xlu1 %v1080_v49, %s3249_s27  ;;  %1187 = vrot.lane.b32.xlu0 %v1079_v50, %s3249_s27 }
 0x23b   : > { %v1621_v52 = vpop.permute.xlu1 %1620  ;;  %v1619_v54 = vpop.permute.xlu0 %1618 }
 0x23c   : > { %1712 = vst.msk [vmem:[#allocation2 + $0x88] sm:$0xff] %vm1694_vm14, %v1621_v52  ;;  %1711 = vst.msk [vmem:[#allocation2 + $0x80] sm:$0xff] %vm1694_vm14, %v1619_v54 }
 0x23d   : > { %1423 = vrot.lane.b32.xlu1 %v4259_v18, %s3251_s28  ;;  %1421 = vrot.lane.b32.xlu0 %v4262_v19, %s3251_s28 }
 0x23f   : > { %v1854_v57 = vpop.permute.xlu1 %1853  ;;  %v1852_v58 = vpop.permute.xlu0 %1851 }
 0x240   : > { %1937 = vst.msk [vmem:[#allocation2 + $0xc8] sm:$0xff] %vm1911_vm15, %v1854_v57  ;;  %1936 = vst.msk [vmem:[#allocation2 + $0xc0] sm:$0xff] %vm1911_vm15, %v1852_v58 }
 0x241   : > { %1648 = vrot.lane.b32.xlu1 %v4325_v55, %s3252_s5  ;;  %1646 = vrot.lane.b32.xlu0 %v4328_v56, %s3252_s5 }
 0x243   : > { %v1838_v61 = vpop.permute.xlu1 %1837  ;;  %v1836_v62 = vpop.permute.xlu0 %1835 }
 0x244   : > { %1929 = vst.msk [vmem:[#allocation2 + $0x88] sm:$0xff] %vm1911_vm15, %v1838_v61  ;;  %1928 = vst.msk [vmem:[#allocation2 + $0x80] sm:$0xff] %vm1911_vm15, %v1836_v62 }
 0x245   : > { %1865 = vrot.lane.b32.xlu1 %v1762_v59, %s3253_s8  ;;  %1863 = vrot.lane.b32.xlu0 %v1761_v60, %s3253_s8 }
 0x247   : > { %v2072_v3 = vpop.permute.xlu1 %2071  ;;  %v2070_v4 = vpop.permute.xlu0 %2069 }
 0x248   : > { %2155 = vst.msk [vmem:[#allocation2 + $0xc8] sm:$0xff] %vm2129_vm0, %v2072_v3  ;;  %2154 = vst.msk [vmem:[#allocation2 + $0xc0] sm:$0xff] %vm2129_vm0, %v2070_v4  ;;  %v4429_v4 = vld [vmem:[%s3296_s21 + $0x13c] sm:$0xff] }
 0x249   : > { %2083 = vrot.lane.b32.xlu1 %v1980_v63, %s3255_s9  ;;  %2081 = vrot.lane.b32.xlu0 %v1979_v2, %s3255_s9 }
 0x24b   : > { %v2056_v7 = vpop.permute.xlu1 %2055  ;;  %v2054_v8 = vpop.permute.xlu0 %2053 }
 0x24c   : > { %2147 = vst.msk [vmem:[#allocation2 + $0x88] sm:$0xff] %vm2129_vm0, %v2056_v7  ;;  %2146 = vst.msk [vmem:[#allocation2 + $0x80] sm:$0xff] %vm2129_vm0, %v2054_v8  ;;  %v1766_v8 = vld [vmem:[%s3296_s21 + $0x13d] sm:$0x7f] }
 0x24d   : > { %957 = vrot.lane.b32.xlu1 %v846_v5, %s3248_s24  ;;  %955 = vrot.lane.b32.xlu0 %v845_v6, %s3248_s24  ;;  %v4432_v5 = vld [vmem:[%s3296_s21 + $0x134] sm:$0xff] }
 0x24e   : > { %v2351_v9 = vpop.f32.mrf.mxu0 }
 0x24f   : > { %2629 = vst.msk [vmem:[%s4356_s13] sm:$0xff] %vm2628_vm2, %v2351_v9  ;;  %v946_v12 = vpop.permute.xlu1 %945  ;;  %v944_v13 = vpop.permute.xlu0 %943  ;;  %v2191_v14 = vld [vmem:[#allocation2 + $0xc0] sm:$0xff]  ;;  %v2192_v15 = vld [vmem:[#allocation2 + $0xc8] sm:$0xff]  ;;  %v2735_v18 = vmul.f32 %v2351_v9, %v2351_v9  ;;  %v2662_v21 = vsel %vm2628_vm2, %v2351_v9, 0.0  ;;  %v1765_v9 = vld [vmem:[%s3296_s21 + $0x135] sm:$0xff] }
 0x250   : > { %1036 = vst.msk [vmem:[#allocation2 + $0xd8] sm:$0xff] %vm1008_vm11, %v946_v12  ;;  %1035 = vst.msk [vmem:[#allocation2 + $0xd0] sm:$0xff] %vm1008_vm11, %v944_v13  ;;  %v3108_v16 = vpop.f32.mrf.mxu0  ;;  %v2220_v17 = vpack.c.bf16 %v2192_v15, %v2191_v14  ;;  %v1984_v13 = vld [vmem:[%s3296_s21 + $0x13e] sm:$0x3f]  ;;  %v1983_v14 = vld [vmem:[%s3296_s21 + $0x136] sm:$0xff] }
 0x251   : > { %1193 = vrot.lane.b32.xlu1 %v1082_v10, %s3249_s27  ;;  %1191 = vrot.lane.b32.xlu0 %v1081_v11, %s3249_s27  ;;  %v2767_v0 = vsel %vm2628_vm2, %v2735_v18, 0.0 }
 0x252   : > { %v2354_v19 = vpop.f32.mrf.mxu0  ;;  %3155 = vmatmul.mubr.msk.bf16.gmra.mxu1 %vm2249_vm1, %v2220_v17 }
 0x253   : > { %2630 = vst.msk [vmem:[%s4356_s13 + $0x8] sm:$0xff] %vm2628_vm2, %v2354_v19  ;;  %v2663_v38 = vsel %vm2628_vm2, %v2354_v19, 0.0  ;;  %v2736_v39 = vmul.f32 %v2354_v19, %v2354_v19  ;;  %v1182_v42 = vpop.permute.xlu1 %1181  ;;  %v1180_v43 = vpop.permute.xlu0 %1179  ;;  %v2183_v46 = vld [vmem:[#allocation2 + $0x80] sm:$0xff]  ;;  %v2184_v20 = vld [vmem:[#allocation2 + $0x88] sm:$0xff]  ;;  %3158 = vmatprep.mubr.msk.bf16.mxu1 %vm3254_vm9, %v3250_v53 }
 0x254   : > { %v4375_v23 = vadd.f32 %v2663_v38, %v2662_v21  ;;  %1272 = vst.msk [vmem:[#allocation2 + $0xd8] sm:$0xff] %vm1244_vm12, %v1182_v42  ;;  %1271 = vst.msk [vmem:[#allocation2 + $0xd0] sm:$0xff] %vm1244_vm12, %v1180_v43  ;;  %v3109_v22 = vpop.f32.mrf.mxu0  ;;  %v2216_v25 = vpack.c.bf16 %v2184_v20, %v2183_v46  ;;  %v850_v42 = vld [vmem:[%s3296_s21 + $0x13a] sm:$0xff]  ;;  %v849_v43 = vld [vmem:[%s3296_s21 + $0x132] sm:$0xff] }
 0x255   : > { %v2768_v24 = vsel %vm2628_vm2, %v2736_v39, 0.0  ;;  %1427 = vrot.lane.b32.xlu1 %v4325_v55, %s3251_s28  ;;  %1425 = vrot.lane.b32.xlu0 %v4328_v56, %s3251_s28 }
 0x256   : > { %v2769_v27 = vadd.f32 %v2768_v24, %v2767_v0  ;;  %3139 = vmatmul.mubr.msk.bf16.gmra.mxu0 %vm2249_vm1, %v2216_v25 }
 0x257   : > { %v1166_v29 = vpop.permute.xlu1 %1165  ;;  %v1164_v28 = vpop.permute.xlu0 %1163  ;;  %3142 = vmatprep.mubr.msk.bf16.mxu0 %vm3254_vm9, %v3250_v53 }
 0x258   : > { %1264 = vst.msk [vmem:[#allocation2 + $0x98] sm:$0xff] %vm1244_vm12, %v1166_v29  ;;  %1263 = vst.msk [vmem:[#allocation2 + $0x90] sm:$0xff] %vm1244_vm12, %v1164_v28 }
 0x259   : > { %1652 = vrot.lane.b32.xlu1 %v1547_v1, %s3252_s5  ;;  %1650 = vrot.lane.b32.xlu0 %v1546_v26, %s3252_s5 }
 0x25b   : > { %v1416_v33 = vpop.permute.xlu1 %1415  ;;  %v1414_v32 = vpop.permute.xlu0 %1413 }
 0x25c   : > { %1503 = vst.msk [vmem:[#allocation2 + $0xd8] sm:$0xff] %vm1475_vm13, %v1416_v33  ;;  %1502 = vst.msk [vmem:[#allocation2 + $0xd0] sm:$0xff] %vm1475_vm13, %v1414_v32  ;;  %v1086_v33 = vld [vmem:[%s3296_s21 + $0x13b] sm:$0xff]  ;;  %v1085_v32 = vld [vmem:[%s3296_s21 + $0x133] sm:$0xff] }
 0x25d   : > { %1869 = vrot.lane.b32.xlu1 %v1764_v31, %s3253_s8  ;;  %1867 = vrot.lane.b32.xlu0 %v1763_v30, %s3253_s8 }
 0x25f   : > { %v1400_v37 = vpop.permute.xlu1 %1399  ;;  %v1398_v36 = vpop.permute.xlu0 %1397 }
 0x260   : > { %1495 = vst.msk [vmem:[#allocation2 + $0x98] sm:$0xff] %vm1475_vm13, %v1400_v37  ;;  %1494 = vst.msk [vmem:[#allocation2 + $0x90] sm:$0xff] %vm1475_vm13, %v1398_v36 }
 0x261   : > { %2087 = vrot.lane.b32.xlu1 %v1982_v35, %s3255_s9  ;;  %2085 = vrot.lane.b32.xlu0 %v1981_v34, %s3255_s9 }
 0x262   : > { %v2359_v41 = vpop.f32.mrf.mxu0 }
 0x263   : > { %v1641_v44 = vpop.permute.xlu1 %1640  ;;  %v1639_v47 = vpop.permute.xlu0 %1638  ;;  %v2516_v52 = vrot.slane %v2359_v41, 2 }
 0x264   : > { %1722 = vst.msk [vmem:[#allocation2 + $0xd8] sm:$0xff] %vm1694_vm14, %v1641_v44  ;;  %1721 = vst.msk [vmem:[#allocation2 + $0xd0] sm:$0xff] %vm1694_vm14, %v1639_v47  ;;  %v3112_v49 = vpop.f32.mrf.mxu0 }
 0x265   : > { %961 = vrot.lane.b32.xlu1 %v848_v40, %s3248_s24  ;;  %959 = vrot.lane.b32.xlu0 %v847_v45, %s3248_s24 }
 0x266   : > { %v2362_v50 = vpop.f32.mrf.mxu0 }
 0x267   : > { %v2517_v54 = vrot.slane %v2362_v50, 2  ;;  %v1625_v55 = vpop.permute.xlu1 %1624  ;;  %v1623_v56 = vpop.permute.xlu0 %1622  ;;  %v851_v50 = vld [vmem:[%s3296_s21 + $0x142] sm:$0x3] }
 0x268   : > { %1714 = vst.msk [vmem:[#allocation2 + $0x98] sm:$0xff] %vm1694_vm14, %v1625_v55  ;;  %1713 = vst.msk [vmem:[#allocation2 + $0x90] sm:$0xff] %vm1694_vm14, %v1623_v56  ;;  %v3113_v57 = vpop.f32.mrf.mxu0 }
 0x269   : > { %v2518_v58 = vsel %vm2515_vm3, %v2516_v52, %v2517_v54  ;;  %1197 = vrot.lane.b32.xlu1 %v1084_v48, %s3249_s27  ;;  %1195 = vrot.lane.b32.xlu0 %v1083_v51, %s3249_s27  ;;  %v1087_v48 = vld [vmem:[%s3296_s21 + $0x143] sm:$0x1] }
 0x26a   : > { %2631 = vst.msk [vmem:[%s4356_s13 + $0x10] sm:$0xff] %vm2628_vm2, %v2518_v58  ;;  %v2665_v59 = vsel %vm2628_vm2, %v2518_v58, 0.0  ;;  %v2737_v60 = vmul.f32 %v2518_v58, %v2518_v58 }
 0x26b   : > { %v2666_v61 = vadd.f32 %v2665_v59, %v4375_v23  ;;  %v1858_v62 = vpop.permute.xlu1 %1857  ;;  %v1856_v63 = vpop.permute.xlu0 %1855 }
 0x26c   : > { %v2770_v2 = vsel %vm2628_vm2, %v2737_v60, 0.0  ;;  %1939 = vst.msk [vmem:[#allocation2 + $0xd8] sm:$0xff] %vm1911_vm15, %v1858_v62  ;;  %1938 = vst.msk [vmem:[#allocation2 + $0xd0] sm:$0xff] %vm1911_vm15, %v1856_v63 }
 0x26d   : > { %v2771_v3 = vadd.f32 %v2770_v2, %v2769_v27  ;;  %1431 = vrot.lane.b32.xlu1 %v1547_v1, %s3251_s28  ;;  %1429 = vrot.lane.b32.xlu0 %v1546_v26, %s3251_s28 }
 0x26f   : > { %v1842_v6 = vpop.permute.xlu1 %1841  ;;  %v1840_v7 = vpop.permute.xlu0 %1839 }
 0x270   : > { %1931 = vst.msk [vmem:[#allocation2 + $0x98] sm:$0xff] %vm1911_vm15, %v1842_v6  ;;  %1930 = vst.msk [vmem:[#allocation2 + $0x90] sm:$0xff] %vm1911_vm15, %v1840_v7 }
 0x271   : > { %1656 = vrot.lane.b32.xlu1 %v4429_v4, %s3252_s5  ;;  %1654 = vrot.lane.b32.xlu0 %v4432_v5, %s3252_s5 }
 0x273   : > { %v2076_v10 = vpop.permute.xlu1 %2075  ;;  %v2074_v11 = vpop.permute.xlu0 %2073 }
 0x274   : > { %2157 = vst.msk [vmem:[#allocation2 + $0xd8] sm:$0xff] %vm2129_vm0, %v2076_v10  ;;  %2156 = vst.msk [vmem:[#allocation2 + $0xd0] sm:$0xff] %vm2129_vm0, %v2074_v11 }
 0x275   : > { %1873 = vrot.lane.b32.xlu1 %v1766_v8, %s3253_s8  ;;  %1871 = vrot.lane.b32.xlu0 %v1765_v9, %s3253_s8 }
 0x276   : > { %v2367_v12 = vpop.f32.mrf.mxu0 }
 0x277   : > { %v2519_v15 = vrot.slane %v2367_v12, 2  ;;  %v2060_v16 = vpop.permute.xlu1 %2059  ;;  %v2058_v17 = vpop.permute.xlu0 %2057  ;;  %v2526_v46 = vrot.slane %v2367_v12, 4 }
 0x278   : > { %2149 = vst.msk [vmem:[#allocation2 + $0x98] sm:$0xff] %vm2129_vm0, %v2060_v16  ;;  %2148 = vst.msk [vmem:[#allocation2 + $0x90] sm:$0xff] %vm2129_vm0, %v2058_v17  ;;  %v3116_v18 = vpop.f32.mrf.mxu0 }
 0x279   : > { %v2520_v19 = vsel %vm2515_vm3, %v2517_v54, %v2519_v15  ;;  %2091 = vrot.lane.b32.xlu1 %v1984_v13, %s3255_s9  ;;  %2089 = vrot.lane.b32.xlu0 %v1983_v14, %s3255_s9 }
 0x27a   : > { %2632 = vst.msk [vmem:[%s4356_s13 + $0x18] sm:$0xff] %vm2628_vm2, %v2520_v19  ;;  %v2667_v21 = vsel %vm2628_vm2, %v2520_v19, 0.0  ;;  %v2738_v38 = vmul.f32 %v2520_v19, %v2520_v19  ;;  %v4456_v39 = vpop.f32.mrf.mxu0 }
 0x27b   : > { %v2668_v20 = vadd.f32 %v2667_v21, %v2666_v61  ;;  %v2527_v23 = vrot.slane %v4456_v39, 4  ;;  %v950_v22 = vpop.permute.xlu1 %949  ;;  %v948_v25 = vpop.permute.xlu0 %947  ;;  %v2193_v0 = vld [vmem:[#allocation2 + $0xd0] sm:$0xff]  ;;  %v2194_v24 = vld [vmem:[#allocation2 + $0xd8] sm:$0xff] }
 0x27c   : > { %v2772_v27 = vsel %vm2628_vm2, %v2738_v38, 0.0  ;;  %1038 = vst.msk [vmem:[#allocation2 + $0xe8] sm:$0xff] %vm1008_vm11, %v950_v22  ;;  %1037 = vst.msk [vmem:[#allocation2 + $0xe0] sm:$0xff] %vm1008_vm11, %v948_v25  ;;  %v3117_v1 = vpop.f32.mrf.mxu0  ;;  %v2221_v26 = vpack.c.bf16 %v2194_v24, %v2193_v0 }
 0x27d   : > { %v2773_v29 = vadd.f32 %v2772_v27, %v2771_v3  ;;  %v2528_v28 = vsel %vm2525_vm4, %v2526_v46, %v2527_v23  ;;  %965 = vrot.lane.b32.xlu1 %v850_v42, %s3248_s24  ;;  %963 = vrot.lane.b32.xlu0 %v849_v43, %s3248_s24 }
 0x27e   : > { %2633 = vst.msk [vmem:[%s4356_s13 + $0x20] sm:$0xff] %vm2628_vm2, %v2528_v28  ;;  %v2669_v31 = vsel %vm2628_vm2, %v2528_v28, 0.0  ;;  %v2739_v30 = vmul.f32 %v2528_v28, %v2528_v28  ;;  %3159 = vmatmul.mubr.msk.bf16.gmra.mxu1 %vm2249_vm1, %v2221_v26 }
 0x27f   : > { %v2670_v35 = vadd.f32 %v2669_v31, %v2668_v20  ;;  %v1186_v34 = vpop.permute.xlu1 %1185  ;;  %v1184_v37 = vpop.permute.xlu0 %1183  ;;  %v2185_v36 = vld [vmem:[#allocation2 + $0x90] sm:$0xff]  ;;  %v2186_v41 = vld [vmem:[#allocation2 + $0x98] sm:$0xff]  ;;  %3162 = vmatprep.mubr.msk.bf16.mxu1 %vm3254_vm9, %v3250_v53 }
 0x280   : > { %v2774_v40 = vsel %vm2628_vm2, %v2739_v30, 0.0  ;;  %1274 = vst.msk [vmem:[#allocation2 + $0xe8] sm:$0xff] %vm1244_vm12, %v1186_v34  ;;  %1273 = vst.msk [vmem:[#allocation2 + $0xe0] sm:$0xff] %vm1244_vm12, %v1184_v37  ;;  %v2217_v45 = vpack.c.bf16 %v2186_v41, %v2185_v36 }
 0x281   : > { %v2775_v44 = vadd.f32 %v2774_v40, %v2773_v29  ;;  %1201 = vrot.lane.b32.xlu1 %v1086_v33, %s3249_s27  ;;  %1199 = vrot.lane.b32.xlu0 %v1085_v32, %s3249_s27 }
 0x282   : > { %3143 = vmatmul.mubr.msk.bf16.gmra.mxu0 %vm2249_vm1, %v2217_v45 }
 0x283   : > { %v1170_v47 = vpop.permute.xlu1 %1169  ;;  %v1168_v49 = vpop.permute.xlu0 %1167  ;;  %3146 = vmatprep.mubr.msk.bf16.mxu0 %vm3254_vm9, %v3250_v53 }
 0x284   : > { %1266 = vst.msk [vmem:[#allocation2 + $0xa8] sm:$0xff] %vm1244_vm12, %v1170_v47  ;;  %1265 = vst.msk [vmem:[#allocation2 + $0xa0] sm:$0xff] %vm1244_vm12, %v1168_v49 }
 0x285   : > { %1435 = vrot.lane.b32.xlu1 %v4429_v4, %s3251_s28  ;;  %1433 = vrot.lane.b32.xlu0 %v4432_v5, %s3251_s28 }
 0x287   : > { %v1420_v51 = vpop.permute.xlu1 %1419  ;;  %v1418_v52 = vpop.permute.xlu0 %1417 }
 0x288   : > { %1505 = vst.msk [vmem:[#allocation2 + $0xe8] sm:$0xff] %vm1475_vm13, %v1420_v51  ;;  %1504 = vst.msk [vmem:[#allocation2 + $0xe0] sm:$0xff] %vm1475_vm13, %v1418_v52 }
 0x289   : > { %967 = vrot.lane.b32.xlu0 %v851_v50, %s3248_s24  ;;  %1203 = vrot.lane.b32.xlu1 %v1087_v48, %s3249_s27 }
 0x28a   : > { %v2375_v54 = vpop.f32.mrf.mxu0 }
 0x28b   : > { %v2529_v55 = vrot.slane %v2375_v54, 4  ;;  %v1404_v56 = vpop.permute.xlu1 %1403  ;;  %v1402_v57 = vpop.permute.xlu0 %1401  ;;  %v2535_v63 = vrot.slane %v2375_v54, 6 }
 0x28c   : > { %1497 = vst.msk [vmem:[#allocation2 + $0xa8] sm:$0xff] %vm1475_vm13, %v1404_v56  ;;  %1496 = vst.msk [vmem:[#allocation2 + $0xa0] sm:$0xff] %vm1475_vm13, %v1402_v57  ;;  %v3120_v58 = vpop.f32.mrf.mxu0 }
 0x28d   : > { %v2530_v59 = vsel %vm2525_vm4, %v2527_v23, %v2529_v55 }
 0x28e   : > { %2634 = vst.msk [vmem:[%s4356_s13 + $0x28] sm:$0xff] %vm2628_vm2, %v2530_v59  ;;  %v2671_v60 = vsel %vm2628_vm2, %v2530_v59, 0.0  ;;  %v2740_v61 = vmul.f32 %v2530_v59, %v2530_v59  ;;  %v2378_v62 = vpop.f32.mrf.mxu0 }
 0x28f   : > { %v2672_v2 = vadd.f32 %v2671_v60, %v2670_v35  ;;  %v2536_v3 = vrot.slane %v2378_v62, 6  ;;  %v1645_v4 = vpop.permute.xlu1 %1644  ;;  %v1643_v5 = vpop.permute.xlu0 %1642 }
 0x290   : > { %v2776_v6 = vsel %vm2628_vm2, %v2740_v61, 0.0  ;;  %1724 = vst.msk [vmem:[#allocation2 + $0xe8] sm:$0xff] %vm1694_vm14, %v1645_v4  ;;  %1723 = vst.msk [vmem:[#allocation2 + $0xe0] sm:$0xff] %vm1694_vm14, %v1643_v5  ;;  %v3121_v7 = vpop.f32.mrf.mxu0 }
 0x291   : > { %v2777_v8 = vadd.f32 %v2776_v6, %v2775_v44  ;;  %v2537_v9 = vsel %vm2313_vm8, %v2535_v63, %v2536_v3 }
 0x292   : > { %2635 = vst.msk [vmem:[%s4356_s13 + $0x30] sm:$0xff] %vm2628_vm2, %v2537_v9  ;;  %v2673_v10 = vsel %vm2628_vm2, %v2537_v9, 0.0  ;;  %v2741_v11 = vmul.f32 %v2537_v9, %v2537_v9 }
 0x293   : > { %v2674_v12 = vadd.f32 %v2673_v10, %v2672_v2  ;;  %v1629_v13 = vpop.permute.xlu1 %1628  ;;  %v1627_v14 = vpop.permute.xlu0 %1626 }
 0x294   : > { %v2778_v15 = vsel %vm2628_vm2, %v2741_v11, 0.0  ;;  %1716 = vst.msk [vmem:[#allocation2 + $0xa8] sm:$0xff] %vm1694_vm14, %v1629_v13  ;;  %1715 = vst.msk [vmem:[#allocation2 + $0xa0] sm:$0xff] %vm1694_vm14, %v1627_v14 }
 0x295   : > { %v2779_v16 = vadd.f32 %v2778_v15, %v2777_v8 }
 0x297   : > { %v1862_v17 = vpop.permute.xlu1 %1861  ;;  %v1860_v18 = vpop.permute.xlu0 %1859 }
 0x298   : > { %1941 = vst.msk [vmem:[#allocation2 + $0xe8] sm:$0xff] %vm1911_vm15, %v1862_v17  ;;  %1940 = vst.msk [vmem:[#allocation2 + $0xe0] sm:$0xff] %vm1911_vm15, %v1860_v18 }
 0x29b   : > { %v1846_v19 = vpop.permute.xlu1 %1845  ;;  %v1844_v21 = vpop.permute.xlu0 %1843 }
 0x29c   : > { %1933 = vst.msk [vmem:[#allocation2 + $0xa8] sm:$0xff] %vm1911_vm15, %v1846_v19  ;;  %1932 = vst.msk [vmem:[#allocation2 + $0xa0] sm:$0xff] %vm1911_vm15, %v1844_v21 }
 0x29e   : > { %v2383_v38 = vpop.f32.mrf.mxu0 }
 0x29f   : > { %v2538_v39 = vrot.slane %v2383_v38, 6  ;;  %v2080_v42 = vpop.permute.xlu1 %2079  ;;  %v2078_v43 = vpop.permute.xlu0 %2077 }
 0x2a0   : > { %2159 = vst.msk [vmem:[#allocation2 + $0xe8] sm:$0xff] %vm2129_vm0, %v2080_v42  ;;  %2158 = vst.msk [vmem:[#allocation2 + $0xe0] sm:$0xff] %vm2129_vm0, %v2078_v43  ;;  %v3124_v46 = vpop.f32.mrf.mxu0 }
 0x2a1   : > { %v2539_v20 = vsel %vm2313_vm8, %v2536_v3, %v2538_v39 }
 0x2a2   : > { %2636 = vst.msk [vmem:[%s4356_s13 + $0x38] sm:$0xff] %vm2628_vm2, %v2539_v20  ;;  %v2675_v23 = vsel %vm2628_vm2, %v2539_v20, 0.0  ;;  %v2742_v22 = vmul.f32 %v2539_v20, %v2539_v20  ;;  %v2386_v25 = vpop.f32.mrf.mxu0 }
 0x2a3   : > { %2637 = vst.msk [vmem:[%s4356_s13 + $0x40] sm:$0xff] %vm2628_vm2, %v2386_v25  ;;  %v2676_v0 = vadd.f32 %v2675_v23, %v2674_v12  ;;  %v2677_v24 = vsel %vm2628_vm2, %v2386_v25, 0.0  ;;  %v2743_v27 = vmul.f32 %v2386_v25, %v2386_v25  ;;  %v2064_v1 = vpop.permute.xlu1 %2063  ;;  %v2062_v26 = vpop.permute.xlu0 %2061 }
 0x2a4   : > { %v2780_v29 = vsel %vm2628_vm2, %v2742_v22, 0.0  ;;  %2151 = vst.msk [vmem:[#allocation2 + $0xa8] sm:$0xff] %vm2129_vm0, %v2064_v1  ;;  %2150 = vst.msk [vmem:[#allocation2 + $0xa0] sm:$0xff] %vm2129_vm0, %v2062_v26  ;;  %v3125_v28 = vpop.f32.mrf.mxu0 }
 0x2a5   : > { %v2678_v31 = vadd.f32 %v2677_v24, %v2676_v0  ;;  %v2781_v30 = vadd.f32 %v2780_v29, %v2779_v16  ;;  %v2782_v33 = vsel %vm2628_vm2, %v2743_v27, 0.0 }
 0x2a7   : > { %v2783_v32 = vadd.f32 %v2782_v33, %v2781_v30  ;;  %v954_v35 = vpop.permute.xlu1 %953  ;;  %v952_v34 = vpop.permute.xlu0 %951  ;;  %v2195_v37 = vld [vmem:[#allocation2 + $0xe0] sm:$0xff]  ;;  %v2196_v36 = vld [vmem:[#allocation2 + $0xe8] sm:$0xff] }
 0x2a8   : > { %1040 = vst.msk [vmem:[#allocation2 + $0xf8] sm:$0xff] %vm1008_vm11, %v954_v35  ;;  %1039 = vst.msk [vmem:[#allocation2 + $0xf0] sm:$0xff] %vm1008_vm11, %v952_v34  ;;  %v2222_v41 = vpack.c.bf16 %v2196_v36, %v2195_v37 }
 0x2aa   : > { %3163 = vmatmul.mubr.msk.bf16.gmra.mxu1 %vm2249_vm1, %v2222_v41 }
 0x2ab   : > { %v1190_v40 = vpop.permute.xlu1 %1189  ;;  %v1188_v45 = vpop.permute.xlu0 %1187  ;;  %v2187_v44 = vld [vmem:[#allocation2 + $0xa0] sm:$0xff]  ;;  %v2188_v47 = vld [vmem:[#allocation2 + $0xa8] sm:$0xff]  ;;  %3166 = vmatprep.mubr.msk.bf16.mxu1 %vm3254_vm9, %v3250_v53 }
 0x2ac   : > { %1276 = vst.msk [vmem:[#allocation2 + $0xf8] sm:$0xff] %vm1244_vm12, %v1190_v40  ;;  %1275 = vst.msk [vmem:[#allocation2 + $0xf0] sm:$0xff] %vm1244_vm12, %v1188_v45  ;;  %v2218_v49 = vpack.c.bf16 %v2188_v47, %v2187_v44 }
 0x2ae   : > { %3147 = vmatmul.mubr.msk.bf16.gmra.mxu0 %vm2249_vm1, %v2218_v49 }
 0x2af   : > { %v1424_v50 = vpop.permute.xlu1 %1423  ;;  %v1422_v48 = vpop.permute.xlu0 %1421 }
 0x2b0   : > { %1507 = vst.msk [vmem:[#allocation2 + $0xf8] sm:$0xff] %vm1475_vm13, %v1424_v50  ;;  %1506 = vst.msk [vmem:[#allocation2 + $0xf0] sm:$0xff] %vm1475_vm13, %v1422_v48 }
 0x2b2   : > { %v2391_v51 = vpop.f32.mrf.mxu0 }
 0x2b3   : > { %2638 = vst.msk [vmem:[%s4356_s13 + $0x48] sm:$0xff] %vm2628_vm2, %v2391_v51  ;;  %v2679_v52 = vsel %vm2628_vm2, %v2391_v51, 0.0  ;;  %v2744_v54 = vmul.f32 %v2391_v51, %v2391_v51  ;;  %v1649_v55 = vpop.permute.xlu1 %1648  ;;  %v1647_v56 = vpop.permute.xlu0 %1646 }
 0x2b4   : > { %v2680_v57 = vadd.f32 %v2679_v52, %v2678_v31  ;;  %1726 = vst.msk [vmem:[#allocation2 + $0xf8] sm:$0xff] %vm1694_vm14, %v1649_v55  ;;  %1725 = vst.msk [vmem:[#allocation2 + $0xf0] sm:$0xff] %vm1694_vm14, %v1647_v56  ;;  %v3128_v58 = vpop.f32.mrf.mxu0 }
 0x2b5   : > { %v2784_v59 = vsel %vm2628_vm2, %v2744_v54, 0.0 }
 0x2b6   : > { %v2785_v60 = vadd.f32 %v2784_v59, %v2783_v32  ;;  %v2394_v61 = vpop.f32.mrf.mxu0 }
 0x2b7   : > { %v1866_v62 = vpop.permute.xlu1 %1865  ;;  %v1864_v63 = vpop.permute.xlu0 %1863  ;;  %v2545_v13 = vrot.slane %v2394_v61, 2 }
 0x2b8   : > { %1943 = vst.msk [vmem:[#allocation2 + $0xf8] sm:$0xff] %vm1911_vm15, %v1866_v62  ;;  %1942 = vst.msk [vmem:[#allocation2 + $0xf0] sm:$0xff] %vm1911_vm15, %v1864_v63  ;;  %v3129_v2 = vpop.f32.mrf.mxu0 }
 0x2bb   : > { %v2084_v3 = vpop.permute.xlu1 %2083  ;;  %v2082_v4 = vpop.permute.xlu0 %2081 }
 0x2bc   : > { %2161 = vst.msk [vmem:[#allocation2 + $0xf8] sm:$0xff] %vm2129_vm0, %v2084_v3  ;;  %2160 = vst.msk [vmem:[#allocation2 + $0xf0] sm:$0xff] %vm2129_vm0, %v2082_v4 }
 0x2bf   : > { %v958_v5 = vpop.permute.xlu1 %957  ;;  %v956_v6 = vpop.permute.xlu0 %955 }
 0x2c0   : > { %1042 = vst.msk [vmem:[#allocation2 + $0x108] sm:$0xff] %vm1008_vm11, %v958_v5  ;;  %1041 = vst.msk [vmem:[#allocation2 + $0x100] sm:$0xff] %vm1008_vm11, %v956_v6 }
 0x2c3   : > { %v1194_v7 = vpop.permute.xlu1 %1193  ;;  %v1192_v8 = vpop.permute.xlu0 %1191  ;;  %v2197_v9 = vld [vmem:[#allocation2 + $0xf0] sm:$0xff]  ;;  %v2198_v10 = vld [vmem:[#allocation2 + $0xf8] sm:$0xff] }
 0x2c4   : > { %1278 = vst.msk [vmem:[#allocation2 + $0x108] sm:$0xff] %vm1244_vm12, %v1194_v7  ;;  %1277 = vst.msk [vmem:[#allocation2 + $0x100] sm:$0xff] %vm1244_vm12, %v1192_v8  ;;  %v2223_v11 = vpack.c.bf16 %v2198_v10, %v2197_v9 }
 0x2c6   : > { %v2399_v12 = vpop.f32.mrf.mxu0  ;;  %3167 = vmatmul.mubr.msk.bf16.gmra.mxu1 %vm2249_vm1, %v2223_v11 }
 0x2c7   : > { %v2546_v14 = vrot.slane %v2399_v12, 2  ;;  %v1428_v15 = vpop.permute.xlu1 %1427  ;;  %v1426_v16 = vpop.permute.xlu0 %1425  ;;  %3170 = vmatprep.mubr.msk.bf16.mxu1 %vm3254_vm9, %v3250_v53 }
 0x2c8   : > { %1509 = vst.msk [vmem:[#allocation2 + $0x108] sm:$0xff] %vm1475_vm13, %v1428_v15  ;;  %1508 = vst.msk [vmem:[#allocation2 + $0x100] sm:$0xff] %vm1475_vm13, %v1426_v16  ;;  %v3132_v17 = vpop.f32.mrf.mxu0 }
 0x2c9   : > { %v2547_v18 = vsel %vm2515_vm3, %v2545_v13, %v2546_v14 }
 0x2ca   : > { %2639 = vst.msk [vmem:[%s4356_s13 + $0x50] sm:$0xff] %vm2628_vm2, %v2547_v18  ;;  %v2681_v19 = vsel %vm2628_vm2, %v2547_v18, 0.0  ;;  %v2745_v21 = vmul.f32 %v2547_v18, %v2547_v18  ;;  %v4561_v38 = vpop.f32.mrf.mxu0 }
 0x2cb   : > { %v2682_v39 = vadd.f32 %v2681_v19, %v2680_v57  ;;  %v2548_v42 = vrot.slane %v4561_v38, 2  ;;  %v1653_v43 = vpop.permute.xlu1 %1652  ;;  %v1651_v46 = vpop.permute.xlu0 %1650  ;;  %v2554_v57 = vrot.slane %v4561_v38, 4 }
 0x2cc   : > { %v2786_v20 = vsel %vm2628_vm2, %v2745_v21, 0.0  ;;  %1728 = vst.msk [vmem:[#allocation2 + $0x108] sm:$0xff] %vm1694_vm14, %v1653_v43  ;;  %1727 = vst.msk [vmem:[#allocation2 + $0x100] sm:$0xff] %vm1694_vm14, %v1651_v46  ;;  %v3133_v23 = vpop.f32.mrf.mxu0 }
 0x2cd   : > { %v2787_v22 = vadd.f32 %v2786_v20, %v2785_v60  ;;  %v2549_v25 = vsel %vm2515_vm3, %v2546_v14, %v2548_v42 }
 0x2ce   : > { %2640 = vst.msk [vmem:[%s4356_s13 + $0x58] sm:$0xff] %vm2628_vm2, %v2549_v25  ;;  %v2683_v0 = vsel %vm2628_vm2, %v2549_v25, 0.0  ;;  %v2746_v24 = vmul.f32 %v2549_v25, %v2549_v25 }
 0x2cf   : > { %v4571_v27 = vadd.f32 %v2683_v0, %v2682_v39  ;;  %v1870_v1 = vpop.permute.xlu1 %1869  ;;  %v1868_v26 = vpop.permute.xlu0 %1867 }
 0x2d0   : > { %v2788_v29 = vsel %vm2628_vm2, %v2746_v24, 0.0  ;;  %1945 = vst.msk [vmem:[#allocation2 + $0x108] sm:$0xff] %vm1911_vm15, %v1870_v1  ;;  %1944 = vst.msk [vmem:[#allocation2 + $0x100] sm:$0xff] %vm1911_vm15, %v1868_v26  ;;  %v2207_v26 = vld [vmem:[#allocation2 + $0x140] sm:$0xf] }
 0x2d1   : > { %v4576_v28 = vadd.f32 %v2788_v29, %v2787_v22  ;;  %v2228_v29 = vpack.c.bf16 %v2207_v26, %v2207_v26 }
 0x2d3   : > { %v2088_v31 = vpop.permute.xlu1 %2087  ;;  %v2086_v30 = vpop.permute.xlu0 %2085 }
 0x2d4   : > { %2163 = vst.msk [vmem:[#allocation2 + $0x108] sm:$0xff] %vm2129_vm0, %v2088_v31  ;;  %2162 = vst.msk [vmem:[#allocation2 + $0x100] sm:$0xff] %vm2129_vm0, %v2086_v30 }
 0x2d7   : > { %v962_v33 = vpop.permute.xlu1 %961  ;;  %v960_v32 = vpop.permute.xlu0 %959 }
 0x2d8   : > { %1044 = vst.msk [vmem:[#allocation2 + $0x118] sm:$0xff] %vm1008_vm11, %v962_v33  ;;  %1043 = vst.msk [vmem:[#allocation2 + $0x110] sm:$0xff] %vm1008_vm11, %v960_v32 }
 0x2db   : > { %v1198_v35 = vpop.permute.xlu1 %1197  ;;  %v1196_v34 = vpop.permute.xlu0 %1195  ;;  %v2199_v37 = vld [vmem:[#allocation2 + $0x100] sm:$0xff]  ;;  %v2200_v36 = vld [vmem:[#allocation2 + $0x108] sm:$0xff] }
 0x2dc   : > { %1280 = vst.msk [vmem:[#allocation2 + $0x118] sm:$0xff] %vm1244_vm12, %v1198_v35  ;;  %1279 = vst.msk [vmem:[#allocation2 + $0x110] sm:$0xff] %vm1244_vm12, %v1196_v34  ;;  %v2224_v41 = vpack.c.bf16 %v2200_v36, %v2199_v37 }
 0x2de   : > { %3171 = vmatmul.mubr.msk.bf16.gmra.mxu1 %vm2249_vm1, %v2224_v41 }
 0x2df   : > { %v1432_v40 = vpop.permute.xlu1 %1431  ;;  %v1430_v45 = vpop.permute.xlu0 %1429  ;;  %3174 = vmatprep.mubr.msk.bf16.mxu1 %vm3254_vm9, %v3250_v53 }
 0x2e0   : > { %1511 = vst.msk [vmem:[#allocation2 + $0x118] sm:$0xff] %vm1475_vm13, %v1432_v40  ;;  %1510 = vst.msk [vmem:[#allocation2 + $0x110] sm:$0xff] %vm1475_vm13, %v1430_v45 }
 0x2e3   : > { %v1657_v44 = vpop.permute.xlu1 %1656  ;;  %v1655_v47 = vpop.permute.xlu0 %1654 }
 0x2e4   : > { %1730 = vst.msk [vmem:[#allocation2 + $0x118] sm:$0xff] %vm1694_vm14, %v1657_v44  ;;  %1729 = vst.msk [vmem:[#allocation2 + $0x110] sm:$0xff] %vm1694_vm14, %v1655_v47 }
 0x2e7   : > { %v1874_v49 = vpop.permute.xlu1 %1873  ;;  %v1872_v50 = vpop.permute.xlu0 %1871 }
 0x2e8   : > { %1948 = vst.msk [vmem:[#allocation2 + $0x118] sm:$0x7f] %vm1947_vm5, %v1874_v49 }
 0x2e9   : > { %1946 = vst.msk [vmem:[#allocation2 + $0x110] sm:$0xff] %vm1911_vm15, %v1872_v50 }
 0x2ea   : > { %v4592_v48 = vpop.f32.mrf.mxu1 }
 0x2eb   : > { %v2092_v51 = vpop.permute.xlu1 %2091  ;;  %v2090_v52 = vpop.permute.xlu0 %2089  ;;  %v2582_v58 = vrot.slane %v4592_v48, 4 }
 0x2ec   : > { %2166 = vst.msk [vmem:[#allocation2 + $0x118] sm:$0x3f] %vm2165_vm6, %v2092_v51  ;;  %v3152_v54 = vpop.f32.mrf.mxu1 }
 0x2ed   : > { %2164 = vst.msk [vmem:[#allocation2 + $0x110] sm:$0xff] %vm2129_vm0, %v2090_v52 }
 0x2ee   : > { %v2407_v55 = vpop.f32.mrf.mxu0  ;;  %v4595_v56 = vpop.f32.mrf.mxu1 }
 0x2ef   : > { %v2555_v59 = vrot.slane %v2407_v55, 4  ;;  %v2583_v60 = vrot.slane %v4595_v56, 4  ;;  %v966_v61 = vpop.permute.xlu1 %965  ;;  %v964_v62 = vpop.permute.xlu0 %963 }
 0x2f0   : > { %1046 = vst.msk [vmem:[#allocation2 + $0x128] sm:$0xff] %vm1008_vm11, %v966_v61  ;;  %1045 = vst.msk [vmem:[#allocation2 + $0x120] sm:$0xff] %vm1008_vm11, %v964_v62  ;;  %v3136_v63 = vpop.f32.mrf.mxu0  ;;  %v3153_v2 = vpop.f32.mrf.mxu1 }
 0x2f1   : > { %v2556_v3 = vsel %vm2525_vm4, %v2554_v57, %v2555_v59  ;;  %v4604_v4 = vsel %vm2525_vm4, %v2582_v58, %v2583_v60 }
 0x2f2   : > { %2641 = vst.msk [vmem:[%s4356_s13 + $0x60] sm:$0xff] %vm2628_vm2, %v2556_v3  ;;  %v2685_v5 = vsel %vm2628_vm2, %v2556_v3, 0.0  ;;  %v2747_v6 = vmul.f32 %v2556_v3, %v2556_v3  ;;  %2649 = vst.msk [vmem:[%s4356_s13 + $0xa0] sm:$0xff] %vm2628_vm2, %v4604_v4  ;;  %v2410_v7 = vpop.f32.mrf.mxu0 }
 0x2f3   : > { %v2686_v8 = vadd.f32 %v2685_v5, %v4571_v27  ;;  %v2557_v9 = vrot.slane %v2410_v7, 4  ;;  %v1202_v10 = vpop.permute.xlu1 %1201  ;;  %v1200_v11 = vpop.permute.xlu0 %1199  ;;  %v2202_v13 = vld [vmem:[#allocation2 + $0x118] sm:$0xff]  ;;  %v2563_v34 = vrot.slane %v2410_v7, 6 }
 0x2f4   : > { %v2201_v12 = vld [vmem:[#allocation2 + $0x110] sm:$0xff]  ;;  %v2790_v14 = vsel %vm2628_vm2, %v2747_v6, 0.0  ;;  %1282 = vst.msk [vmem:[#allocation2 + $0x128] sm:$0xff] %vm1244_vm12, %v1202_v10  ;;  %1281 = vst.msk [vmem:[#allocation2 + $0x120] sm:$0xff] %vm1244_vm12, %v1200_v11  ;;  %v3137_v15 = vpop.f32.mrf.mxu0  ;;  %v2206_v27 = vld [vmem:[#allocation2 + $0x138] sm:$0xff] }
 0x2f5   : > { %v2225_v16 = vpack.c.bf16 %v2202_v13, %v2201_v12  ;;  %v2791_v17 = vadd.f32 %v2790_v14, %v4576_v28  ;;  %v2558_v18 = vsel %vm2525_vm4, %v2555_v59, %v2557_v9 }
 0x2f6   : > { %2642 = vst.msk [vmem:[%s4356_s13 + $0x68] sm:$0xff] %vm2628_vm2, %v2558_v18  ;;  %v2687_v19 = vsel %vm2628_vm2, %v2558_v18, 0.0  ;;  %v2748_v21 = vmul.f32 %v2558_v18, %v2558_v18 }
 0x2f7   : > { %3175 = vmatmul.mubr.msk.bf16.gmra.mxu1 %vm2249_vm1, %v2225_v16  ;;  %v2688_v38 = vadd.f32 %v2687_v19, %v2686_v8  ;;  %v1436_v39 = vpop.permute.xlu1 %1435  ;;  %v1434_v42 = vpop.permute.xlu0 %1433 }
 0x2f8   : > { %3178 = vmatprep.mubr.msk.bf16.mxu1 %vm3254_vm9, %v3250_v53  ;;  %v2792_v43 = vsel %vm2628_vm2, %v2748_v21, 0.0  ;;  %1513 = vst.msk [vmem:[#allocation2 + $0x128] sm:$0xff] %vm1475_vm13, %v1436_v39  ;;  %1512 = vst.msk [vmem:[#allocation2 + $0x120] sm:$0xff] %vm1475_vm13, %v1434_v42 }
 0x2f9   : > { %v2793_v46 = vadd.f32 %v2792_v43, %v2791_v17 }
 0x2fb   : > { %v968_v20 = vpop.permute.xlu0 %967  ;;  %v1204_v23 = vpop.permute.xlu1 %1203 }
 0x2fc   : > { %1048 = vst.msk [vmem:[#allocation2 + $0x130] sm:$0x3] %vm1047_vm7, %v968_v20 }
 0x2fd   : > { %1284 = vst.msk [vmem:[#allocation2 + $0x130] sm:$0x1] %vm1283_vm10, %v1204_v23 }
 0x2ff   : > { %v2203_v22 = vld [vmem:[#allocation2 + $0x120] sm:$0xff]  ;;  %v2204_v25 = vld [vmem:[#allocation2 + $0x128] sm:$0xff] }
 0x300   : > { %v2226_v0 = vpack.c.bf16 %v2204_v25, %v2203_v22  ;;  %v2576_v25 = vrot.slane %v4592_v48, 2 }
 0x302   : > { %3179 = vmatmul.mubr.msk.bf16.gmra.mxu1 %vm2249_vm1, %v2226_v0 }
 0x303   : > { %3182 = vmatprep.mubr.msk.bf16.mxu1 %vm3254_vm9, %v3250_v53 }
 0x304   : > { %v2205_v24 = vld [vmem:[#allocation2 + $0x130] sm:$0xff] }
 0x305   : > { %v2227_v1 = vpack.c.bf16 %v2206_v27, %v2205_v24 }
 0x30a   : > { %3183 = vmatmul.mubr.msk.bf16.gmra.mxu1 %vm2249_vm1, %v2227_v1 }
 0x30b   : > { %3186 = vmatprep.mubr.msk.bf16.mxu1 %vm3254_vm9, %v3250_v53 }
 0x312   : > { %v2447_v28 = vpop.f32.mrf.mxu1  ;;  %3187 = vmatmul.mubr.msk.bf16.gmra.mxu1 %vm2249_vm1, %v2228_v29 }
 0x313   : > { %v2585_v31 = vrot.slane %v2447_v28, 4  ;;  %v2591_v37 = vrot.slane %v2447_v28, 6 }
 0x314   : > { %v3156_v30 = vpop.f32.mrf.mxu1 }
 0x315   : > { %v4635_v33 = vsel %vm2525_vm4, %v2583_v60, %v2585_v31 }
 0x316   : > { %2650 = vst.msk [vmem:[%s4356_s13 + $0xa8] sm:$0xff] %vm2628_vm2, %v4635_v33  ;;  %v2415_v32 = vpop.f32.mrf.mxu0  ;;  %v2450_v35 = vpop.f32.mrf.mxu1 }
 0x317   : > { %v2564_v53 = vrot.slane %v2415_v32, 6  ;;  %v2592_v36 = vrot.slane %v2450_v35, 6  ;;  %v2755_v32 = vmul.f32 %v4604_v4, %v4604_v4 }
 0x318   : > { %v3140_v41 = vpop.f32.mrf.mxu0  ;;  %v3157_v40 = vpop.f32.mrf.mxu1 }
 0x319   : > { %v2565_v45 = vsel %vm2313_vm8, %v2563_v34, %v2564_v53  ;;  %v4642_v44 = vsel %vm2313_vm8, %v2591_v37, %v2592_v36 }
 0x31a   : > { %2643 = vst.msk [vmem:[%s4356_s13 + $0x70] sm:$0xff] %vm2628_vm2, %v2565_v45  ;;  %v2689_v47 = vsel %vm2628_vm2, %v2565_v45, 0.0  ;;  %v2749_v49 = vmul.f32 %v2565_v45, %v2565_v45  ;;  %2651 = vst.msk [vmem:[%s4356_s13 + $0xb0] sm:$0xff] %vm2628_vm2, %v4642_v44  ;;  %v2418_v50 = vpop.f32.mrf.mxu0 }
 0x31b   : > { %v2690_v51 = vadd.f32 %v2689_v47, %v2688_v38  ;;  %v2566_v52 = vrot.slane %v2418_v50, 6  ;;  %v2806_v47 = vsel %vm2628_vm2, %v2755_v32, 0.0  ;;  %v2757_v50 = vmul.f32 %v4642_v44, %v4642_v44 }
 0x31c   : > { %v2794_v54 = vsel %vm2628_vm2, %v2749_v49, 0.0  ;;  %v3141_v55 = vpop.f32.mrf.mxu0  ;;  %v2703_v49 = vsel %vm2628_vm2, %v4635_v33, 0.0 }
 0x31d   : > { %v2795_v56 = vadd.f32 %v2794_v54, %v2793_v46  ;;  %v2567_v57 = vsel %vm2313_vm8, %v2564_v53, %v2566_v52  ;;  %v2701_v53 = vsel %vm2628_vm2, %v4604_v4, 0.0  ;;  %v2705_v4 = vsel %vm2628_vm2, %v4642_v44, 0.0 }
 0x31e   : > { %2644 = vst.msk [vmem:[%s4356_s13 + $0x78] sm:$0xff] %vm2628_vm2, %v2567_v57  ;;  %v2691_v58 = vsel %vm2628_vm2, %v2567_v57, 0.0  ;;  %v2750_v59 = vmul.f32 %v2567_v57, %v2567_v57 }
 0x31f   : > { %v2692_v60 = vadd.f32 %v2691_v58, %v2690_v51  ;;  %v2810_v58 = vsel %vm2628_vm2, %v2757_v50, 0.0 }
 0x320   : > { %v2796_v61 = vsel %vm2628_vm2, %v2750_v59, 0.0 }
 0x321   : > { %v2797_v62 = vadd.f32 %v2796_v61, %v2795_v56 }
 0x33e   : > { %v2455_v63 = vpop.f32.mrf.mxu1 }
 0x33f   : > { %v2594_v2 = vrot.slane %v2455_v63, 6 }
 0x340   : > { %v3160_v3 = vpop.f32.mrf.mxu1 }
 0x341   : > { %v2595_v5 = vsel %vm2313_vm8, %v2592_v36, %v2594_v2  ;;  %v2756_v36 = vmul.f32 %v4635_v33, %v4635_v33 }
 0x342   : > { %2652 = vst.msk [vmem:[%s4356_s13 + $0xb8] sm:$0xff] %vm2628_vm2, %v2595_v5  ;;  %v2423_v6 = vpop.f32.mrf.mxu0  ;;  %v4659_v7 = vpop.f32.mrf.mxu1  ;;  %v2758_v55 = vmul.f32 %v2595_v5, %v2595_v5  ;;  %v2707_v59 = vsel %vm2628_vm2, %v2595_v5, 0.0 }
 0x343   : > { %2645 = vst.msk [vmem:[%s4356_s13 + $0x80] sm:$0xff] %vm2628_vm2, %v2423_v6  ;;  %v2693_v8 = vsel %vm2628_vm2, %v2423_v6, 0.0  ;;  %v2751_v9 = vmul.f32 %v2423_v6, %v2423_v6  ;;  %2653 = vst.msk [vmem:[%s4356_s13 + $0xc0] sm:$0xff] %vm2628_vm2, %v4659_v7  ;;  %v2808_v54 = vsel %vm2628_vm2, %v2756_v36, 0.0  ;;  %v2759_v33 = vmul.f32 %v4659_v7, %v4659_v7 }
 0x344   : > { %v2694_v10 = vadd.f32 %v2693_v8, %v2692_v60  ;;  %v3144_v11 = vpop.f32.mrf.mxu0  ;;  %v3161_v12 = vpop.f32.mrf.mxu1  ;;  %v2709_v63 = vsel %vm2628_vm2, %v4659_v7, 0.0 }
 0x345   : > { %v2798_v13 = vsel %vm2628_vm2, %v2751_v9, 0.0  ;;  %v2814_v6 = vsel %vm2628_vm2, %v2759_v33, 0.0 }
 0x346   : > { %v2799_v14 = vadd.f32 %v2798_v13, %v2797_v62  ;;  %v2426_v15 = vpop.f32.mrf.mxu0  ;;  %v2812_v62 = vsel %vm2628_vm2, %v2758_v55, 0.0 }
 0x347   : > { %2646 = vst.msk [vmem:[%s4356_s13 + $0x88] sm:$0xff] %vm2628_vm2, %v2426_v15  ;;  %v2695_v16 = vsel %vm2628_vm2, %v2426_v15, 0.0  ;;  %v2752_v17 = vmul.f32 %v2426_v15, %v2426_v15 }
 0x348   : > { %v2696_v18 = vadd.f32 %v2695_v16, %v2694_v10  ;;  %v3145_v19 = vpop.f32.mrf.mxu0 }
 0x349   : > { %v2800_v21 = vsel %vm2628_vm2, %v2752_v17, 0.0 }
 0x34a   : > { %v2801_v38 = vadd.f32 %v2800_v21, %v2799_v14 }
 0x36a   : > { %v2463_v39 = vpop.f32.mrf.mxu1 }
 0x36b   : > { %2654 = vst.msk [vmem:[%s4356_s13 + $0xc8] sm:$0xff] %vm2628_vm2, %v2463_v39  ;;  %v2760_v2 = vmul.f32 %v2463_v39, %v2463_v39  ;;  %v2711_v8 = vsel %vm2628_vm2, %v2463_v39, 0.0 }
 0x36c   : > { %v3164_v42 = vpop.f32.mrf.mxu1 }
 0x36d   : > { %v2816_v10 = vsel %vm2628_vm2, %v2760_v2, 0.0 }
 0x36e   : > { %v2431_v43 = vpop.f32.mrf.mxu0  ;;  %v2466_v46 = vpop.f32.mrf.mxu1 }
 0x36f   : > { %v2573_v0 = vrot.slane %v2431_v43, 2  ;;  %v2601_v12 = vrot.slane %v2466_v46, 2 }
 0x370   : > { %v3148_v20 = vpop.f32.mrf.mxu0  ;;  %v3165_v23 = vpop.f32.mrf.mxu1 }
 0x372   : > { %v2434_v22 = vpop.f32.mrf.mxu0 }
 0x373   : > { %v2574_v24 = vrot.slane %v2434_v22, 2 }
 0x374   : > { %v3149_v27 = vpop.f32.mrf.mxu0 }
 0x375   : > { %v2575_v1 = vsel %vm2515_vm3, %v2573_v0, %v2574_v24  ;;  %v2577_v26 = vsel %vm2515_vm3, %v2574_v24, %v2576_v25 }
 0x376   : > { %2647 = vst.msk [vmem:[%s4356_s13 + $0x90] sm:$0xff] %vm2628_vm2, %v2575_v1  ;;  %2648 = vst.msk [vmem:[%s4356_s13 + $0x98] sm:$0xff] %vm2628_vm2, %v2577_v26  ;;  %v2697_v29 = vsel %vm2628_vm2, %v2575_v1, 0.0  ;;  %v2753_v28 = vmul.f32 %v2575_v1, %v2575_v1  ;;  %v2754_v31 = vmul.f32 %v2577_v26, %v2577_v26  ;;  %v2699_v48 = vsel %vm2628_vm2, %v2577_v26, 0.0 }
 0x377   : > { %v2698_v30 = vadd.f32 %v2697_v29, %v2696_v18 }
 0x378   : > { %v2802_v35 = vsel %vm2628_vm2, %v2753_v28, 0.0  ;;  %v2804_v41 = vsel %vm2628_vm2, %v2754_v31, 0.0 }
 0x379   : > { %v2700_v34 = vadd.f32 %v2699_v48, %v2698_v30  ;;  %v2803_v37 = vadd.f32 %v2802_v35, %v2801_v38 }
 0x37b   : > { %v2702_v40 = vadd.f32 %v2701_v53, %v2700_v34  ;;  %v2805_v45 = vadd.f32 %v2804_v41, %v2803_v37 }
 0x37d   : > { %v2704_v51 = vadd.f32 %v2703_v49, %v2702_v40  ;;  %v2807_v52 = vadd.f32 %v2806_v47, %v2805_v45 }
 0x37f   : > { %v2706_v56 = vadd.f32 %v2705_v4, %v2704_v51  ;;  %v2809_v57 = vadd.f32 %v2808_v54, %v2807_v52 }
 0x381   : > { %v2811_v60 = vadd.f32 %v2810_v58, %v2809_v57  ;;  %v2708_v61 = vadd.f32 %v2707_v59, %v2706_v56 }
 0x383   : > { %v2710_v44 = vadd.f32 %v2709_v63, %v2708_v61  ;;  %v2813_v3 = vadd.f32 %v2812_v62, %v2811_v60 }
 0x385   : > { %v2712_v5 = vadd.f32 %v2711_v8, %v2710_v44  ;;  %v2815_v9 = vadd.f32 %v2814_v6, %v2813_v3 }
 0x386   : > { %v2471_v11 = vpop.f32.mrf.mxu1 }
 0x387   : > { %v2602_v13 = vrot.slane %v2471_v11, 2  ;;  %v2817_v14 = vadd.f32 %v2816_v10, %v2815_v9 }
 0x388   : > { %v3168_v15 = vpop.f32.mrf.mxu1 }
 0x389   : > { %v2603_v7 = vsel %vm2515_vm3, %v2601_v12, %v2602_v13 }
 0x38a   : > { %2655 = vst.msk [vmem:[%s4356_s13 + $0xd0] sm:$0xff] %vm2628_vm2, %v2603_v7  ;;  %v2474_v16 = vpop.f32.mrf.mxu1  ;;  %v2761_v25 = vmul.f32 %v2603_v7, %v2603_v7  ;;  %v2713_v0 = vsel %vm2628_vm2, %v2603_v7, 0.0 }
 0x38b   : > { %v2604_v17 = vrot.slane %v2474_v16, 2  ;;  %v2610_v38 = vrot.slane %v2474_v16, 4  ;;  %v2714_v29 = vadd.f32 %v2713_v0, %v2712_v5 }
 0x38c   : > { %v3169_v18 = vpop.f32.mrf.mxu1  ;;  %v2818_v27 = vsel %vm2628_vm2, %v2761_v25, 0.0 }
 0x38d   : > { %v2605_v19 = vsel %vm2515_vm3, %v2602_v13, %v2604_v17  ;;  %v2819_v48 = vadd.f32 %v2818_v27, %v2817_v14  ;;  %v2661_v17 = vld [vmem:[#allocation3] sm:$0x1] }
 0x38e   : > { %2656 = vst.msk [vmem:[%s4356_s13 + $0xd8] sm:$0xff] %vm2628_vm2, %v2605_v19  ;;  %v2762_v24 = vmul.f32 %v2605_v19, %v2605_v19  ;;  %v2715_v1 = vsel %vm2628_vm2, %v2605_v19, 0.0 }
 0x38f   : > { %v2716_v35 = vadd.f32 %v2715_v1, %v2714_v29 }
 0x390   : > { %v2820_v28 = vsel %vm2628_vm2, %v2762_v24, 0.0 }
 0x391   : > { %v2821_v40 = vadd.f32 %v2820_v28, %v2819_v48 }
 0x39e   : > { %v2479_v21 = vpop.f32.mrf.mxu1 }
 0x39f   : > { %v2611_v39 = vrot.slane %v2479_v21, 4 }
 0x3a0   : > { %v3172_v42 = vpop.f32.mrf.mxu1 }
 0x3a1   : > { %v2612_v43 = vsel %vm2525_vm4, %v2610_v38, %v2611_v39  ;;  %v2734_v38 = vld [vmem:[#allocation3 + $0x1] sm:$0x1] }
 0x3a2   : > { %2657 = vst.msk [vmem:[%s4356_s13 + $0xe0] sm:$0xff] %vm2628_vm2, %v2612_v43  ;;  %v2482_v46 = vpop.f32.mrf.mxu1  ;;  %v2763_v26 = vmul.f32 %v2612_v43, %v2612_v43  ;;  %v2717_v31 = vsel %vm2628_vm2, %v2612_v43, 0.0 }
 0x3a3   : > { %v2613_v20 = vrot.slane %v2482_v46, 4  ;;  %v2619_v34 = vrot.slane %v2482_v46, 6  ;;  %v2718_v45 = vadd.f32 %v2717_v31, %v2716_v35 }
 0x3a4   : > { %v3173_v23 = vpop.f32.mrf.mxu1  ;;  %v2822_v53 = vsel %vm2628_vm2, %v2763_v26, 0.0 }
 0x3a5   : > { %v2614_v22 = vsel %vm2525_vm4, %v2611_v39, %v2613_v20  ;;  %v2823_v54 = vadd.f32 %v2822_v53, %v2821_v40 }
 0x3a6   : > { %2658 = vst.msk [vmem:[%s4356_s13 + $0xe8] sm:$0xff] %vm2628_vm2, %v2614_v22  ;;  %v2764_v30 = vmul.f32 %v2614_v22, %v2614_v22  ;;  %v2719_v36 = vsel %vm2628_vm2, %v2614_v22, 0.0 }
 0x3a7   : > { %v2720_v4 = vadd.f32 %v2719_v36, %v2718_v45 }
 0x3a8   : > { %v2824_v49 = vsel %vm2628_vm2, %v2764_v30, 0.0 }
 0x3a9   : > { %v2825_v58 = vadd.f32 %v2824_v49, %v2823_v54 }
 0x3b7   : > { %v2487_v32 = vpop.f32.mrf.mxu1 }
 0x3b8   : > { %v2620_v37 = vrot.slane %v2487_v32, 6 }
 0x3b9   : > { %v3176_v41 = vpop.f32.mrf.mxu1 }
 0x3ba   : > { %v2621_v47 = vsel %vm2313_vm8, %v2619_v34, %v2620_v37 }
 0x3bb   : > { %2659 = vst.msk [vmem:[%s4356_s13 + $0xf0] sm:$0xff] %vm2628_vm2, %v2621_v47  ;;  %v2721_v50 = vsel %vm2628_vm2, %v2621_v47, 0.0  ;;  %v2765_v51 = vmul.f32 %v2621_v47, %v2621_v47  ;;  %v2490_v52 = vpop.f32.mrf.mxu1 }
 0x3bc   : > { %v2622_v55 = vrot.slane %v2490_v52, 6  ;;  %v2722_v59 = vadd.f32 %v2721_v50, %v2720_v4 }
 0x3bd   : > { %v2826_v56 = vsel %vm2628_vm2, %v2765_v51, 0.0  ;;  %v3177_v57 = vpop.f32.mrf.mxu1 }
 0x3be   : > { %v2623_v33 = vsel %vm2313_vm8, %v2620_v37, %v2622_v55  ;;  %v2827_v62 = vadd.f32 %v2826_v56, %v2825_v58  ;;  %vm2732_vm8 = vcmask 57344  }
 0x3bf   : > { %2660 = vst.msk [vmem:[%s4356_s13 + $0xf8] sm:$0xff] %vm2628_vm2, %v2623_v33  ;;  %v2723_v60 = vsel %vm2628_vm2, %v2623_v33, 0.0  ;;  %v2766_v61 = vmul.f32 %v2623_v33, %v2623_v33 }
 0x3c0   : > { %v2724_v63 = vadd.f32 %v2723_v60, %v2722_v59 }
 0x3c1   : > { %v2828_v2 = vsel %vm2628_vm2, %v2766_v61, 0.0 }
 0x3c2   : > { %v2725_v44 = vrot.slane %v2724_v63, 4  ;;  %v2829_v3 = vadd.f32 %v2828_v2, %v2827_v62  ;;  %v2495_v6 = vpop.f32.mrf.mxu1 }
 0x3c4   : > { %v2726_v8 = vadd.f32 %v2725_v44, %v2724_v63  ;;  %v2830_v5 = vrot.slane %v2829_v3, 4  ;;  %v3180_v9 = vpop.f32.mrf.mxu1 }
 0x3c6   : > { %v2727_v10 = vrot.slane %v2726_v8, 2  ;;  %v2831_v11 = vadd.f32 %v2830_v5, %v2829_v3  ;;  %v2497_v12 = vpop.f32.mrf.mxu1 }
 0x3c8   : > { %v2728_v13 = vadd.f32 %v2727_v10, %v2726_v8  ;;  %v2832_v14 = vrot.slane %v2831_v11, 2  ;;  %v3181_v15 = vpop.f32.mrf.mxu1 }
 0x3ca   : > { %v2729_v7 = vrot.slane %v2728_v13, 1  ;;  %v2833_v16 = vadd.f32 %v2832_v14, %v2831_v11  ;;  %v2501_v18 = vpop.f32.mrf.mxu1 }
 0x3cc   : > { %v2730_v19 = vadd.f32 %v2729_v7, %v2728_v13  ;;  %v2834_v21 = vrot.slane %v2833_v16, 1  ;;  %v3184_v39 = vpop.f32.mrf.mxu1 }
 0x3ce   : > { %v2731_v42 = vadd.f32 %v2730_v19, %v2661_v17  ;;  %v2835_v43 = vadd.f32 %v2834_v21, %v2833_v16  ;;  %v2503_v46 = vpop.f32.mrf.mxu1 }
 0x3d0   : > { %2733 = vst.msk [vmem:[#allocation3] sm:$0x1] %vm2732_vm8, %v2731_v42  ;;  %v2836_v20 = vadd.f32 %v2835_v43, %v2734_v38  ;;  %v3185_v23 = vpop.f32.mrf.mxu1 }
 0x3d2   : > { %2837 = vst.msk [vmem:[#allocation3 + $0x1] sm:$0x1] %vm2732_vm8, %v2836_v20  ;;  %v2507_v22 = vpop.f32.mrf.mxu1 }
 0x3d4   : > { %v3188_v25 = vpop.f32.mrf.mxu1  ;;  %2841 = sbr.rel (%p3072_p5) target bundleno = 1043 (0x413), region = 44 }
 0x3d6   : > { %v2509_v0 = vpop.f32.mrf.mxu1 }
 0x3d8   : > { %v3189_v24 = vpop.f32.mrf.mxu1 }
 0x3d9   : > { %v2842_v27 = vld [vmem:[#allocation3] sm:$0x1]  ;;  %v2844_v1 = vld [vmem:[#allocation3 + $0x1] sm:$0x1]  ;;  %v2857_v48 = vlaneseq  ;;  %v2849_v34 = vld [vmem:[%s4929_s2] sm:$0x1] }
 0x3da   : > { %v2843_v26 = vmul.f32 0.001953125, %v2842_v27  ;;  %v2845_v29 = vmul.f32 0.001953125, %v2844_v1  ;;  %v2853_v41 = vld [vmem:[%s4930_s3] sm:$0x1] }
 0x3db   : > { %v2858_v35 = vshrl.u32 %v2857_v48, 7 }
 0x3dc   : > { %v2846_v28 = vmul.f32 %v2843_v26, %v2843_v26 }
 0x3dd   : > { %v2859_v37 = vsub.s32 0, %v2858_v35 }
 0x3de   : > { %v2847_v31 = vsub.f32 %v2845_v29, %v2846_v28 }
 0x3e0   : > { %v2848_v30 = vmax.f32 %v2847_v31, 0.0 }
 0x3e2   : > { %v2850_v32 = vadd.f32 1e-05, %v2848_v30 }
 0x3e4   : > { %3227 = vrsqrt.f32 %v2850_v32 }
 0x3f1   : > { %v3228_v53 = vpop.eup %3227 }
 0x3f2   : > { %v2852_v36 = vmul.f32 %v3228_v53, %v2849_v34 }
 0x3f4   : > { %v2854_v40 = vmul.f32 %v2852_v36, %v2843_v26  ;;  %v4746_v45 = vrot.slane %v2852_v36, %v2859_v37 }
 0x3f6   : > { %v2855_v47 = vsub.f32 %v2853_v41, %v2854_v40 }
 0x3f8   : > { %v4748_v49 = vrot.slane %v2855_v47, %v2859_v37 }
 0x3f9 LB: >> { %s3073_s20 = sshll.u32 %s3243_s19, 8  ;;  %s2873_s19 = sadd.s32 1, %s3243_s19   ;;  %s3243_s19 = sphi %s4750_s19, %s2873_s19  }
 0x3fa   : >> { %s4759_s23 = scalar_lea.vmem %s4931_s4, %s3073_s20  ;;  %p2870_p6 = scmp.ge.s32.totalorder %s2873_s19, 2  }
 0x3fb   : >> { %v2876_v50 = vld [vmem:[%s4759_s23] sm:$0xff]  ;;  %v2877_v51 = vld [vmem:[%s4759_s23 + $0x8] sm:$0xff]  ;;  %v2878_v52 = vld [vmem:[%s4759_s23 + $0x10] sm:$0xff] }
 0x3fc   : >> { %v2908_v54 = vmul.f32 %v2876_v50, %v4746_v45  ;;  %v2909_v4 = vmul.f32 %v2877_v51, %v4746_v45  ;;  %v2910_v55 = vmul.f32 %v2878_v52, %v4746_v45  ;;  %v2879_v56 = vld [vmem:[%s4759_s23 + $0x18] sm:$0xff]  ;;  %v2880_v57 = vld [vmem:[%s4759_s23 + $0x20] sm:$0xff]  ;;  %v2881_v58 = vld [vmem:[%s4759_s23 + $0x28] sm:$0xff] }
 0x3fd   : >> { %v2911_v59 = vmul.f32 %v2879_v56, %v4746_v45  ;;  %v2912_v33 = vmul.f32 %v2880_v57, %v4746_v45  ;;  %v2913_v60 = vmul.f32 %v2881_v58, %v4746_v45  ;;  %v2882_v61 = vld [vmem:[%s4759_s23 + $0x30] sm:$0xff]  ;;  %v2883_v62 = vld [vmem:[%s4759_s23 + $0x38] sm:$0xff]  ;;  %v2884_v63 = vld [vmem:[%s4759_s23 + $0x40] sm:$0xff] }
 0x3fe   : >> { %v2940_v2 = vadd.f32 %v2908_v54, %v4748_v49  ;;  %v2941_v44 = vadd.f32 %v2909_v4, %v4748_v49  ;;  %v2942_v3 = vadd.f32 %v2910_v55, %v4748_v49  ;;  %v2914_v6 = vmul.f32 %v2882_v61, %v4746_v45  ;;  %v2885_v8 = vld [vmem:[%s4759_s23 + $0x48] sm:$0xff]  ;;  %v2886_v5 = vld [vmem:[%s4759_s23 + $0x50] sm:$0xff]  ;;  %v2887_v9 = vld [vmem:[%s4759_s23 + $0x58] sm:$0xff] }
 0x3ff   : >> { %v2943_v10 = vadd.f32 %v2911_v59, %v4748_v49  ;;  %v2944_v11 = vadd.f32 %v2912_v33, %v4748_v49  ;;  %v2945_v12 = vadd.f32 %v2913_v60, %v4748_v49  ;;  %v2915_v13 = vmul.f32 %v2883_v62, %v4746_v45  ;;  %v2888_v14 = vld [vmem:[%s4759_s23 + $0x60] sm:$0xff]  ;;  %v2889_v15 = vld [vmem:[%s4759_s23 + $0x68] sm:$0xff]  ;;  %v2890_v7 = vld [vmem:[%s4759_s23 + $0x70] sm:$0xff] }
 0x400   : >> { %2972 = vst.msk [vmem:[%s4759_s23] sm:$0xff] %vm2628_vm2, %v2940_v2  ;;  %2973 = vst.msk [vmem:[%s4759_s23 + $0x8] sm:$0xff] %vm2628_vm2, %v2941_v44  ;;  %v2946_v16 = vadd.f32 %v2914_v6, %v4748_v49  ;;  %v2916_v17 = vmul.f32 %v2884_v63, %v4746_v45  ;;  %v2917_v18 = vmul.f32 %v2885_v8, %v4746_v45  ;;  %v2891_v21 = vld [vmem:[%s4759_s23 + $0x78] sm:$0xff]  ;;  %v2892_v46 = vld [vmem:[%s4759_s23 + $0x80] sm:$0xff] }
 0x401   : >> { %2974 = vst.msk [vmem:[%s4759_s23 + $0x10] sm:$0xff] %vm2628_vm2, %v2942_v3  ;;  %v2918_v19 = vmul.f32 %v2886_v5, %v4746_v45  ;;  %2975 = vst.msk [vmem:[%s4759_s23 + $0x18] sm:$0xff] %vm2628_vm2, %v2943_v10  ;;  %v2947_v38 = vadd.f32 %v2915_v13, %v4748_v49  ;;  %v2919_v39 = vmul.f32 %v2887_v9, %v4746_v45  ;;  %v2893_v20 = vld [vmem:[%s4759_s23 + $0x88] sm:$0xff]  ;;  %v2894_v23 = vld [vmem:[%s4759_s23 + $0x90] sm:$0xff] }
 0x402   : >> { %2976 = vst.msk [vmem:[%s4759_s23 + $0x20] sm:$0xff] %vm2628_vm2, %v2944_v11  ;;  %2977 = vst.msk [vmem:[%s4759_s23 + $0x28] sm:$0xff] %vm2628_vm2, %v2945_v12  ;;  %v2920_v42 = vmul.f32 %v2888_v14, %v4746_v45  ;;  %v2921_v43 = vmul.f32 %v2889_v15, %v4746_v45  ;;  %v2948_v22 = vadd.f32 %v2916_v17, %v4748_v49  ;;  %v2895_v27 = vld [vmem:[%s4759_s23 + $0x98] sm:$0xff]  ;;  %v2896_v1 = vld [vmem:[%s4759_s23 + $0xa0] sm:$0xff] }
 0x403   : >> { %2978 = vst.msk [vmem:[%s4759_s23 + $0x30] sm:$0xff] %vm2628_vm2, %v2946_v16  ;;  %v2949_v25 = vadd.f32 %v2917_v18, %v4748_v49  ;;  %v2950_v0 = vadd.f32 %v2918_v19, %v4748_v49  ;;  %v2922_v24 = vmul.f32 %v2890_v7, %v4746_v45  ;;  %v2897_v26 = vld [vmem:[%s4759_s23 + $0xa8] sm:$0xff]  ;;  %2979 = vst.msk [vmem:[%s4759_s23 + $0x38] sm:$0xff] %vm2628_vm2, %v2947_v38  ;;  %v2898_v32 = vld [vmem:[%s4759_s23 + $0xb0] sm:$0xff] }
 0x404   : >> { %v2951_v29 = vadd.f32 %v2919_v39, %v4748_v49  ;;  %v2952_v28 = vadd.f32 %v2920_v42, %v4748_v49  ;;  %v2953_v31 = vadd.f32 %v2921_v43, %v4748_v49  ;;  %v2923_v30 = vmul.f32 %v2891_v21, %v4746_v45  ;;  %2980 = vst.msk [vmem:[%s4759_s23 + $0x40] sm:$0xff] %vm2628_vm2, %v2948_v22  ;;  %v2899_v53 = vld [vmem:[%s4759_s23 + $0xb8] sm:$0xff]  ;;  %v2900_v50 = vld [vmem:[%s4759_s23 + $0xc0] sm:$0xff]  ;;  %v2901_v51 = vld [vmem:[%s4759_s23 + $0xc8] sm:$0xff] }
 0x405   : >> { %2981 = vst.msk [vmem:[%s4759_s23 + $0x48] sm:$0xff] %vm2628_vm2, %v2949_v25  ;;  %2982 = vst.msk [vmem:[%s4759_s23 + $0x50] sm:$0xff] %vm2628_vm2, %v2950_v0  ;;  %v2954_v48 = vadd.f32 %v2922_v24, %v4748_v49  ;;  %v2924_v35 = vmul.f32 %v2892_v46, %v4746_v45  ;;  %v2925_v34 = vmul.f32 %v2893_v20, %v4746_v45  ;;  %v2902_v52 = vld [vmem:[%s4759_s23 + $0xd0] sm:$0xff]  ;;  %v2903_v57 = vld [vmem:[%s4759_s23 + $0xd8] sm:$0xff] }
 0x406   : >> { %v2926_v37 = vmul.f32 %v2894_v23, %v4746_v45  ;;  %2983 = vst.msk [vmem:[%s4759_s23 + $0x58] sm:$0xff] %vm2628_vm2, %v2951_v29  ;;  %2984 = vst.msk [vmem:[%s4759_s23 + $0x60] sm:$0xff] %vm2628_vm2, %v2952_v28  ;;  %v2955_v36 = vadd.f32 %v2923_v30, %v4748_v49  ;;  %v2927_v41 = vmul.f32 %v2895_v27, %v4746_v45  ;;  %v2904_v58 = vld [vmem:[%s4759_s23 + $0xe0] sm:$0xff]  ;;  %v2905_v59 = vld [vmem:[%s4759_s23 + $0xe8] sm:$0xff] }
 0x407   : >> { %2985 = vst.msk [vmem:[%s4759_s23 + $0x68] sm:$0xff] %vm2628_vm2, %v2953_v31  ;;  %v2928_v40 = vmul.f32 %v2896_v1, %v4746_v45  ;;  %v2929_v47 = vmul.f32 %v2897_v26, %v4746_v45  ;;  %2986 = vst.msk [vmem:[%s4759_s23 + $0x70] sm:$0xff] %vm2628_vm2, %v2954_v48  ;;  %v2956_v54 = vadd.f32 %v2924_v35, %v4748_v49  ;;  %v2906_v63 = vld [vmem:[%s4759_s23 + $0xf0] sm:$0xff]  ;;  %v2907_v8 = vld [vmem:[%s4759_s23 + $0xf8] sm:$0xff] }
 0x408   : >> { %v2957_v4 = vadd.f32 %v2925_v34, %v4748_v49  ;;  %v2958_v55 = vadd.f32 %v2926_v37, %v4748_v49  ;;  %v2930_v56 = vmul.f32 %v2898_v32, %v4746_v45  ;;  %2987 = vst.msk [vmem:[%s4759_s23 + $0x78] sm:$0xff] %vm2628_vm2, %v2955_v36  ;;  %v2959_v33 = vadd.f32 %v2927_v41, %v4748_v49 }
 0x409   : >> { %v2960_v60 = vadd.f32 %v2928_v40, %v4748_v49  ;;  %v2961_v61 = vadd.f32 %v2929_v47, %v4748_v49  ;;  %v2931_v62 = vmul.f32 %v2899_v53, %v4746_v45  ;;  %2988 = vst.msk [vmem:[%s4759_s23 + $0x80] sm:$0xff] %vm2628_vm2, %v2956_v54  ;;  %v2932_v44 = vmul.f32 %v2900_v50, %v4746_v45 }
 0x40a   : >> { %2989 = vst.msk [vmem:[%s4759_s23 + $0x88] sm:$0xff] %vm2628_vm2, %v2957_v4  ;;  %2990 = vst.msk [vmem:[%s4759_s23 + $0x90] sm:$0xff] %vm2628_vm2, %v2958_v55  ;;  %v2962_v2 = vadd.f32 %v2930_v56, %v4748_v49  ;;  %v2933_v3 = vmul.f32 %v2901_v51, %v4746_v45  ;;  %v2934_v6 = vmul.f32 %v2902_v52, %v4746_v45 }
 0x40b   : >> { %2991 = vst.msk [vmem:[%s4759_s23 + $0x98] sm:$0xff] %vm2628_vm2, %v2959_v33  ;;  %2992 = vst.msk [vmem:[%s4759_s23 + $0xa0] sm:$0xff] %vm2628_vm2, %v2960_v60  ;;  %v2963_v5 = vadd.f32 %v2931_v62, %v4748_v49  ;;  %v2935_v9 = vmul.f32 %v2903_v57, %v4746_v45  ;;  %v2936_v10 = vmul.f32 %v2904_v58, %v4746_v45 }
 0x40c   : >> { %2993 = vst.msk [vmem:[%s4759_s23 + $0xa8] sm:$0xff] %vm2628_vm2, %v2961_v61  ;;  %v2937_v11 = vmul.f32 %v2905_v59, %v4746_v45  ;;  %2994 = vst.msk [vmem:[%s4759_s23 + $0xb0] sm:$0xff] %vm2628_vm2, %v2962_v2  ;;  %v2964_v12 = vadd.f32 %v2932_v44, %v4748_v49  ;;  %v2965_v13 = vadd.f32 %v2933_v3, %v4748_v49 }
 0x40d   : >> { %v2966_v14 = vadd.f32 %v2934_v6, %v4748_v49  ;;  %v2938_v15 = vmul.f32 %v2906_v63, %v4746_v45  ;;  %2995 = vst.msk [vmem:[%s4759_s23 + $0xb8] sm:$0xff] %vm2628_vm2, %v2963_v5  ;;  %v2967_v7 = vadd.f32 %v2935_v9, %v4748_v49  ;;  %v2968_v16 = vadd.f32 %v2936_v10, %v4748_v49 }
 0x40e   : >> { %v2969_v17 = vadd.f32 %v2937_v11, %v4748_v49  ;;  %v2939_v18 = vmul.f32 %v2907_v8, %v4746_v45  ;;  %2996 = vst.msk [vmem:[%s4759_s23 + $0xc0] sm:$0xff] %vm2628_vm2, %v2964_v12  ;;  %2997 = vst.msk [vmem:[%s4759_s23 + $0xc8] sm:$0xff] %vm2628_vm2, %v2965_v13  ;;  %2872 = sbr.rel (!%p2870_p6) target bundleno = 1017 (0x3f9), region = 79 }
 0x40f   : >> { %2998 = vst.msk [vmem:[%s4759_s23 + $0xd0] sm:$0xff] %vm2628_vm2, %v2966_v14  ;;  %v2970_v19 = vadd.f32 %v2938_v15, %v4748_v49  ;;  %2999 = vst.msk [vmem:[%s4759_s23 + $0xd8] sm:$0xff] %vm2628_vm2, %v2967_v7 }
 0x410   : >> { %3000 = vst.msk [vmem:[%s4759_s23 + $0xe0] sm:$0xff] %vm2628_vm2, %v2968_v16  ;;  %3001 = vst.msk [vmem:[%s4759_s23 + $0xe8] sm:$0xff] %vm2628_vm2, %v2969_v17  ;;  %v2971_v21 = vadd.f32 %v2939_v18, %v4748_v49 }
 0x411   : >> { %3002 = vst.msk [vmem:[%s4759_s23 + $0xf0] sm:$0xff] %vm2628_vm2, %v2970_v19 }
 0x412   : >> { %3003 = vst.msk [vmem:[%s4759_s23 + $0xf8] sm:$0xff] %vm2628_vm2, %v2971_v21 }
 0x413 PF: > { %s14_s15 = sadd.s32 1, %s3239_s15  }
 0x414   : > { %p11_p7 = scmp.ge.s32.totalorder %s14_s15, 4  }
 0x416   :  { %13 = sbr.rel (!%p11_p7) target bundleno = 1 (0x1), region = 90 }

</bundles_post_ra>
